<compile_context>
chip_gen: v5e
topology: v5e:2x2
jax: 0.10.0
libtpu: 0.0.40
codegen_flags: <defaults>
</compile_context>

<pallas_src>
import functools

import numpy as np
import jax
import jax.numpy as jnp
from jax.experimental import pallas as pl
from jax.experimental.pallas import tpu as pltpu

OUT_CLASSES = 3
LRELU_SLOPE = 0.2
IN_EPS = 1e-5

CONST_ORDER = ("m1", "m2", "m3", "g1", "g2", "u1", "u2")
WEIGHT_ORDER = ("e1c1", "e1c2", "e2c1", "e2c2", "jc1", "jc2",
                "d1up", "d1c1", "d1c2", "d2up", "d2c1", "d2c2",
                "out_w", "out_b")


# ----------------------------------------------------------------------------
# Host-side constants (numpy, built once per (H, W); never generated in-kernel).
# ----------------------------------------------------------------------------
def _boundary_masks(h, w):
    """(9, h*w) f32; mask[t, y*w+x] = 1 iff pixel (y+di, x+dj) is inside the
    image (padding_mode='zeros'), t = (di+1)*3 + (dj+1)."""
    y = np.arange(h).reshape(h, 1)
    x = np.arange(w).reshape(1, w)
    rows = []
    for di in (-1, 0, 1):
        for dj in (-1, 0, 1):
            ok = (y + di >= 0) & (y + di < h) & (x + dj >= 0) & (x + dj < w)
            rows.append(ok.reshape(h * w))
    return np.stack(rows).astype(np.float32)


def _pool_gather(h, w):
    """(h*w, h*w/4) 0/1 compaction matrix: picks the (even row, even col)
    positions where the rolled 2x2 max lives and packs them densely."""
    hw = h * w
    g = np.zeros((hw, hw // 4), np.float32)
    for y2 in range(h // 2):
        for x2 in range(w // 2):
            g[(2 * y2) * w + 2 * x2, y2 * (w // 2) + x2] = 1.0
    return g


def _up_scatter(h, w):
    """(h*w, 4*h*w) 0/1 scatter for the (a=0, b=0) sub-pixel of
    ConvTranspose2d(k=2, s=2); the other 3 sub-pixels are lane rolls of it."""
    hw = h * w
    u = np.zeros((hw, 4 * hw), np.float32)
    for ys in range(h):
        for xs in range(w):
            u[ys * w + xs, (2 * ys) * (2 * w) + 2 * xs] = 1.0
    return u


def make_shift_constants(h, w):
    h2, w2, h4, w4 = h // 2, w // 2, h // 4, w // 4
    bf16 = jnp.bfloat16
    return {
        "m1": jnp.asarray(_boundary_masks(h, w)),        # f32, applied pre-cast
        "m2": jnp.asarray(_boundary_masks(h2, w2)),
        "m3": jnp.asarray(_boundary_masks(h4, w4)),
        "g1": jnp.asarray(_pool_gather(h, w), dtype=bf16),
        "g2": jnp.asarray(_pool_gather(h2, w2), dtype=bf16),
        "u1": jnp.asarray(_up_scatter(h4, w4), dtype=bf16),
        "u2": jnp.asarray(_up_scatter(h2, w2), dtype=bf16),
    }


# ----------------------------------------------------------------------------
# The fused whole-network kernel (one grid step == one batch sample).
# ----------------------------------------------------------------------------
def _unet_kernel(x_ref,
                 m1_ref, m2_ref, m3_ref, g1_ref, g2_ref, u1_ref, u2_ref,
                 e1c1, e1c2, e2c1, e2c2, jc1, jc2,
                 d1up, d1c1, d1c2, d2up, d2c1, d2c2, out_w, out_b,
                 o_ref, *, H, W):
    f32, bf16 = jnp.float32, jnp.bfloat16
    W2, W4 = W // 2, W // 4

    def roll_lanes(x, shift):
        # Cyclic shift toward higher lane indices: out[..., p] = x[..., p-shift].
        n = x.shape[-1]
        shift = shift % n
        if shift == 0:
            return x
        if n % 128 == 0:
            return pltpu.roll(x, shift, x.ndim - 1)          # XLU rotate
        # Tiny pooled levels (lane dim 64 / 16): two static lane slices.
        return jnp.concatenate([x[:, n - shift:], x[:, :n - shift]], axis=-1)

    def conv3x3(x, w_ref, mask, width):
        # 'same' 3x3 conv, no bias.  x: (Cin, hw) f32, w_ref: (Cout, 9*Cin) bf16,
        # mask: (9, hw) f32.  9 taps -> roll + boundary mask, stacked along the
        # contraction axis, then ONE MXU matmul.
        hw = x.shape[-1]
        parts = []
        t = 0
        for di in (-1, 0, 1):
            for dj in (-1, 0, 1):
                off = di * width + dj
                if off == 0:                                  # center tap
                    parts.append(x)
                else:
                    # shifted[p] = x[p + off] for in-image sources, else 0.
                    parts.append(roll_lanes(x, (-off) % hw) * mask[t:t + 1, :])
                t += 1
        xs = jnp.concatenate(parts, axis=0).astype(bf16)      # (9*Cin, hw)
        return jnp.dot(w_ref[...], xs, preferred_element_type=f32)

    def inorm_lrelu(x):
        # InstanceNorm2d(affine=False, eps=1e-5) + LeakyReLU(0.2), f32 stats.
        mean = jnp.mean(x, axis=1, keepdims=True)
        cen = x - mean
        var = jnp.mean(cen * cen, axis=1, keepdims=True)
        y = cen * jax.lax.rsqrt(var + IN_EPS)
        return jnp.where(y >= 0, y, LRELU_SLOPE * y)

    def maxpool(x, width, g_ref):
        # 2x2 / stride-2 max pool: two rolls + max, then one gather matmul
        # that compacts the (even row, even col) results.
        hw = x.shape[-1]
        h1 = jnp.maximum(x, roll_lanes(x, hw - 1))            # max(x[p], x[p+1])
        v = jnp.maximum(h1, roll_lanes(h1, hw - width))       # + rows p+W, p+W+1
        return jnp.dot(v.astype(bf16), g_ref[...], preferred_element_type=f32)

    def upconv(x, w_ref, u_ref, width):
        # ConvTranspose2d(k=2, s=2, bias=False).
        # w_ref: (4*Co, Cin) stacked over sub-pixels (a,b); u_ref: (hw, 4*hw)
        # scatter for (a,b)=(0,0); other sub-pixels are lane rolls.
        co = w_ref.shape[0] // 4
        z = jnp.dot(w_ref[...], x.astype(bf16), preferred_element_type=f32)
        p = jnp.dot(z.astype(bf16), u_ref[...], preferred_element_type=f32)
        out = p[0:co]
        out = out + roll_lanes(p[co:2 * co], 1)               # (a,b) = (0,1)
        out = out + roll_lanes(p[2 * co:3 * co], 2 * width)   # (1,0)
        out = out + roll_lanes(p[3 * co:4 * co], 2 * width + 1)  # (1,1)
        return out

    x = x_ref[...].astype(f32)                                # (4+1, H*W)
    m1, m2, m3 = m1_ref[...], m2_ref[...], m3_ref[...]

    # ---- Encoder level 1 ----
    h = inorm_lrelu(conv3x3(x, e1c1, m1, W))
    h = inorm_lrelu(conv3x3(h, e1c2, m1, W))
    skip1 = h                                                 # (8, HW)
    h = maxpool(h, W, g1_ref)                                 # (8, HW/4)

    # ---- Encoder level 2 ----
    h = inorm_lrelu(conv3x3(h, e2c1, m2, W2))
    h = inorm_lrelu(conv3x3(h, e2c2, m2, W2))
    skip2 = h                                                 # (16, HW/4)
    h = maxpool(h, W2, g2_ref)                                # (16, HW/16)

    # ---- Joiner (bottleneck EncodingBlock, downsampling_type=None) ----
    h = inorm_lrelu(conv3x3(h, jc1, m3, W4))
    h = inorm_lrelu(conv3x3(h, jc2, m3, W4))                  # (32, HW/16)

    # ---- Decoder level 1 (skip concatenated first along channels) ----
    u = upconv(h, d1up, u1_ref, W4)                           # (16, HW/4)
    h = jnp.concatenate([skip2, u], axis=0)                   # (32, HW/4)
    h = inorm_lrelu(conv3x3(h, d1c1, m2, W2))
    h = inorm_lrelu(conv3x3(h, d1c2, m2, W2))                 # (16, HW/4)

    # ---- Decoder level 2 ----
    u = upconv(h, d2up, u2_ref, W2)                           # (8, HW)
    h = jnp.concatenate([skip1, u], axis=0)                   # (16, HW)
    h = inorm_lrelu(conv3x3(h, d2c1, m1, W))
    h = inorm_lrelu(conv3x3(h, d2c2, m1, W))                  # (8, HW)

    # merge_original_patches=False; use_tanh=False.
    # ---- Output head: 1x1 conv with bias, no norm/activation ----
    o_ref[...] = (jnp.dot(out_w[...], h.astype(bf16),
                          preferred_element_type=f32) + out_b[...])


# ----------------------------------------------------------------------------
# Parameters (deterministic synthetic init, He-scaled, already in fused layout).
# ----------------------------------------------------------------------------
def init_params(key):
    ks = jax.random.split(key, 16)
    bf16 = jnp.bfloat16

    def conv_w(k, cout, cin):                     # fused 3x3 conv, (Cout, 9*Cin)
        w = jax.random.normal(k, (cout, 9 * cin), jnp.float32)
        return (w * (2.0 / (9 * cin)) ** 0.5).astype(bf16)

    def up_w(k, cout, cin):                       # transposed conv, (4*Cout, Cin)
        w = jax.random.normal(k, (4 * cout, cin), jnp.float32)
        return (w * (2.0 / (4 * cin)) ** 0.5).astype(bf16)

    p = {}
    # encoder level 1: (4 input ch + 1 time ch) -> 8 -> 8
    p["e1c1"] = conv_w(ks[0], 8, 5)
    p["e1c2"] = conv_w(ks[1], 8, 8)
    # encoder level 2: 8 -> 16 -> 16
    p["e2c1"] = conv_w(ks[2], 16, 8)
    p["e2c2"] = conv_w(ks[3], 16, 16)
    # joiner (bottleneck): 16 -> 32 -> 32
    p["jc1"] = conv_w(ks[4], 32, 16)
    p["jc2"] = conv_w(ks[5], 32, 32)
    # decoder level 1: upconv 32 -> 16, then [skip2(16) | up(16)] -> 16 -> 16
    p["d1up"] = up_w(ks[6], 16, 32)
    p["d1c1"] = conv_w(ks[7], 16, 32)
    p["d1c2"] = conv_w(ks[8], 16, 16)
    # decoder level 2: upconv 16 -> 8, then [skip1(8) | up(8)] -> 8 -> 8
    p["d2up"] = up_w(ks[9], 8, 16)
    p["d2c1"] = conv_w(ks[10], 8, 16)
    p["d2c2"] = conv_w(ks[11], 8, 8)
    # output head: 1x1 conv 8 -> 3 with bias
    p["out_w"] = (jax.random.normal(ks[12], (OUT_CLASSES, 8), jnp.float32)
                  * (2.0 / 8) ** 0.5).astype(bf16)
    p["out_b"] = jnp.zeros((OUT_CLASSES, 1), jnp.float32)
    return p


# ----------------------------------------------------------------------------
# Full UNet forward: one fused pallas_call.
# ----------------------------------------------------------------------------
def unet_forward(params, x, predict_time):
    """x: (N, 4, H, W) float32 NCHW (like the PyTorch module), predict_time: (N,).
    Returns (N, out_classes, H, W) float32."""
    N, C, H, W = x.shape
    HW = H * W

    # TODO(synk): CreateStructuredData / PATCH_SIZE_3D were not provided;
    # approximated as broadcasting predict_time into one extra input channel.
    xf = x.astype(jnp.float32).reshape(N, C, HW)
    t = jnp.broadcast_to(predict_time.astype(jnp.float32).reshape(N, 1, 1),
                         (N, 1, HW))
    xin = jnp.concatenate([xf, t], axis=1)                    # (N, C+1, HW)

    consts = make_shift_constants(H, W)
    operands = [consts[k] for k in CONST_ORDER] + [params[k] for k in WEIGHT_ORDER]

    in_specs = [pl.BlockSpec((pl.Squeezed(), C + 1, HW), lambda n: (n, 0, 0))]
    for a in operands:                    # all constants / weights are 2-D,
        in_specs.append(pl.BlockSpec(a.shape, lambda n: (0, 0)))  # grid-invariant

    out = pl.pallas_call(
        functools.partial(_unet_kernel, H=H, W=W),
        grid=(N,),
        in_specs=in_specs,
        out_specs=pl.BlockSpec((pl.Squeezed(), OUT_CLASSES, HW),
                               lambda n: (n, 0, 0)),
        out_shape=jax.ShapeDtypeStruct((N, OUT_CLASSES, HW), jnp.float32),
        compiler_params=pltpu.CompilerParams(
            dimension_semantics=("parallel",),   # batch split across TCs (v7x)
            vmem_limit_bytes=32 * 1024 * 1024),  # working set is now < 1 MiB
    )(xin, *operands)
    return out.reshape(N, OUT_CLASSES, H, W)                  # already NCHW


if __name__ == "__main__":
    key = jax.random.PRNGKey(0)
    kx, kt, kp = jax.random.split(key, 3)

    x = jax.random.normal(kx, (2, 4, 16, 16), jnp.float32)
    predict_time = jax.random.uniform(kt, (2,), jnp.float32)
    params = init_params(kp)

    out = jax.jit(unet_forward)(params, x, predict_time)
    jax.block_until_ready(out)

    assert out.shape == (2, 3, 16, 16), out.shape
    assert out.dtype == jnp.float32
    assert bool(jnp.all(jnp.isfinite(out)))
    print("KERNEL_OK")
</pallas_src>

<mosaic_0001>
module attributes {stable_mosaic.version = 11 : i64} {
  func.func @_unet_kernel(%arg0: i32, %arg1: memref<1x5x256xf32, #tpu.memory_space<vmem>>, %arg2: memref<9x256xf32, #tpu.memory_space<vmem>>, %arg3: memref<9x64xf32, #tpu.memory_space<vmem>>, %arg4: memref<9x16xf32, #tpu.memory_space<vmem>>, %arg5: memref<256x64xbf16, #tpu.memory_space<vmem>>, %arg6: memref<64x16xbf16, #tpu.memory_space<vmem>>, %arg7: memref<16x64xbf16, #tpu.memory_space<vmem>>, %arg8: memref<64x256xbf16, #tpu.memory_space<vmem>>, %arg9: memref<8x45xbf16, #tpu.memory_space<vmem>>, %arg10: memref<8x72xbf16, #tpu.memory_space<vmem>>, %arg11: memref<16x72xbf16, #tpu.memory_space<vmem>>, %arg12: memref<16x144xbf16, #tpu.memory_space<vmem>>, %arg13: memref<32x144xbf16, #tpu.memory_space<vmem>>, %arg14: memref<32x288xbf16, #tpu.memory_space<vmem>>, %arg15: memref<64x32xbf16, #tpu.memory_space<vmem>>, %arg16: memref<16x288xbf16, #tpu.memory_space<vmem>>, %arg17: memref<16x144xbf16, #tpu.memory_space<vmem>>, %arg18: memref<32x16xbf16, #tpu.memory_space<vmem>>, %arg19: memref<8x144xbf16, #tpu.memory_space<vmem>>, %arg20: memref<8x72xbf16, #tpu.memory_space<vmem>>, %arg21: memref<3x8xbf16, #tpu.memory_space<vmem>>, %arg22: memref<3x1xf32, #tpu.memory_space<vmem>>, %arg23: memref<1x3x256xf32, #tpu.memory_space<vmem>>) attributes {dimension_semantics = [#tpu.dimension_semantics<parallel>], iteration_bounds = array<i64: 2>, scalar_prefetch = 0 : i64, scratch_operands = 0 : i64, tpu.core_type = #tpu.core_type<tc>, window_params = [{transform_indices = @transform_0, window_bounds = array<i64: 1, 5, 256>}, {pipeline_mode = #tpu.pipeline_mode<synchronous>, transform_indices = @transform_1, window_bounds = array<i64: 9, 256>}, {pipeline_mode = #tpu.pipeline_mode<synchronous>, transform_indices = @transform_2, window_bounds = array<i64: 9, 64>}, {pipeline_mode = #tpu.pipeline_mode<synchronous>, transform_indices = @transform_3, window_bounds = array<i64: 9, 16>}, {pipeline_mode = #tpu.pipeline_mode<synchronous>, transform_indices = @transform_4, window_bounds = array<i64: 256, 64>}, {pipeline_mode = #tpu.pipeline_mode<synchronous>, transform_indices = @transform_5, window_bounds = array<i64: 64, 16>}, {pipeline_mode = #tpu.pipeline_mode<synchronous>, transform_indices = @transform_6, window_bounds = array<i64: 16, 64>}, {pipeline_mode = #tpu.pipeline_mode<synchronous>, transform_indices = @transform_7, window_bounds = array<i64: 64, 256>}, {pipeline_mode = #tpu.pipeline_mode<synchronous>, transform_indices = @transform_8, window_bounds = array<i64: 8, 45>}, {pipeline_mode = #tpu.pipeline_mode<synchronous>, transform_indices = @transform_9, window_bounds = array<i64: 8, 72>}, {pipeline_mode = #tpu.pipeline_mode<synchronous>, transform_indices = @transform_10, window_bounds = array<i64: 16, 72>}, {pipeline_mode = #tpu.pipeline_mode<synchronous>, transform_indices = @transform_11, window_bounds = array<i64: 16, 144>}, {pipeline_mode = #tpu.pipeline_mode<synchronous>, transform_indices = @transform_12, window_bounds = array<i64: 32, 144>}, {pipeline_mode = #tpu.pipeline_mode<synchronous>, transform_indices = @transform_13, window_bounds = array<i64: 32, 288>}, {pipeline_mode = #tpu.pipeline_mode<synchronous>, transform_indices = @transform_14, window_bounds = array<i64: 64, 32>}, {pipeline_mode = #tpu.pipeline_mode<synchronous>, transform_indices = @transform_15, window_bounds = array<i64: 16, 288>}, {pipeline_mode = #tpu.pipeline_mode<synchronous>, transform_indices = @transform_16, window_bounds = array<i64: 16, 144>}, {pipeline_mode = #tpu.pipeline_mode<synchronous>, transform_indices = @transform_17, window_bounds = array<i64: 32, 16>}, {pipeline_mode = #tpu.pipeline_mode<synchronous>, transform_indices = @transform_18, window_bounds = array<i64: 8, 144>}, {pipeline_mode = #tpu.pipeline_mode<synchronous>, transform_indices = @transform_19, window_bounds = array<i64: 8, 72>}, {pipeline_mode = #tpu.pipeline_mode<synchronous>, transform_indices = @transform_20, window_bounds = array<i64: 3, 8>}, {pipeline_mode = #tpu.pipeline_mode<synchronous>, transform_indices = @transform_21, window_bounds = array<i64: 3, 1>}, {transform_indices = @transform_22, window_bounds = array<i64: 1, 3, 256>}]} {
    %c0 = arith.constant 0 : index
    %c0_0 = arith.constant 0 : index
    %c0_1 = arith.constant 0 : index
    %0 = vector.load %arg1[%c0, %c0_0, %c0_1] : memref<1x5x256xf32, #tpu.memory_space<vmem>>, vector<1x5x256xf32>
    %1 = vector.shape_cast %0 : vector<1x5x256xf32> to vector<5x256xf32>
    %c0_2 = arith.constant 0 : index
    %c0_3 = arith.constant 0 : index
    %2 = vector.load %arg2[%c0_2, %c0_3] : memref<9x256xf32, #tpu.memory_space<vmem>>, vector<9x256xf32>
    %c0_4 = arith.constant 0 : index
    %c0_5 = arith.constant 0 : index
    %3 = vector.load %arg3[%c0_4, %c0_5] : memref<9x64xf32, #tpu.memory_space<vmem>>, vector<9x64xf32>
    %c0_6 = arith.constant 0 : index
    %c0_7 = arith.constant 0 : index
    %4 = vector.load %arg4[%c0_6, %c0_7] : memref<9x16xf32, #tpu.memory_space<vmem>>, vector<9x16xf32>
    %c17_i32 = arith.constant 17 : i32
    %5 = tpu.dynamic_rotate %1 by %c17_i32 dim 1 : vector<5x256xf32>, i32 -> vector<5x256xf32>
    %6 = vector.extract_strided_slice %2 {offsets = [0, 0], sizes = [1, 256], strides = [1, 1]} : vector<9x256xf32> to vector<1x256xf32>
    %7 = vector.broadcast %6 : vector<1x256xf32> to vector<5x256xf32>
    %8 = arith.mulf %5, %7 : vector<5x256xf32>
    %c16_i32 = arith.constant 16 : i32
    %9 = tpu.dynamic_rotate %1 by %c16_i32 dim 1 : vector<5x256xf32>, i32 -> vector<5x256xf32>
    %10 = vector.extract_strided_slice %2 {offsets = [1, 0], sizes = [1, 256], strides = [1, 1]} : vector<9x256xf32> to vector<1x256xf32>
    %11 = vector.broadcast %10 : vector<1x256xf32> to vector<5x256xf32>
    %12 = arith.mulf %9, %11 : vector<5x256xf32>
    %c15_i32 = arith.constant 15 : i32
    %13 = tpu.dynamic_rotate %1 by %c15_i32 dim 1 : vector<5x256xf32>, i32 -> vector<5x256xf32>
    %14 = vector.extract_strided_slice %2 {offsets = [2, 0], sizes = [1, 256], strides = [1, 1]} : vector<9x256xf32> to vector<1x256xf32>
    %15 = vector.broadcast %14 : vector<1x256xf32> to vector<5x256xf32>
    %16 = arith.mulf %13, %15 : vector<5x256xf32>
    %c1_i32 = arith.constant 1 : i32
    %17 = tpu.dynamic_rotate %1 by %c1_i32 dim 1 : vector<5x256xf32>, i32 -> vector<5x256xf32>
    %18 = vector.extract_strided_slice %2 {offsets = [3, 0], sizes = [1, 256], strides = [1, 1]} : vector<9x256xf32> to vector<1x256xf32>
    %19 = vector.broadcast %18 : vector<1x256xf32> to vector<5x256xf32>
    %20 = arith.mulf %17, %19 : vector<5x256xf32>
    %c255_i32 = arith.constant 255 : i32
    %21 = tpu.dynamic_rotate %1 by %c255_i32 dim 1 : vector<5x256xf32>, i32 -> vector<5x256xf32>
    %22 = vector.extract_strided_slice %2 {offsets = [5, 0], sizes = [1, 256], strides = [1, 1]} : vector<9x256xf32> to vector<1x256xf32>
    %23 = vector.broadcast %22 : vector<1x256xf32> to vector<5x256xf32>
    %24 = arith.mulf %21, %23 : vector<5x256xf32>
    %c241_i32 = arith.constant 241 : i32
    %25 = tpu.dynamic_rotate %1 by %c241_i32 dim 1 : vector<5x256xf32>, i32 -> vector<5x256xf32>
    %26 = vector.extract_strided_slice %2 {offsets = [6, 0], sizes = [1, 256], strides = [1, 1]} : vector<9x256xf32> to vector<1x256xf32>
    %27 = vector.broadcast %26 : vector<1x256xf32> to vector<5x256xf32>
    %28 = arith.mulf %25, %27 : vector<5x256xf32>
    %c240_i32 = arith.constant 240 : i32
    %29 = tpu.dynamic_rotate %1 by %c240_i32 dim 1 : vector<5x256xf32>, i32 -> vector<5x256xf32>
    %30 = vector.extract_strided_slice %2 {offsets = [7, 0], sizes = [1, 256], strides = [1, 1]} : vector<9x256xf32> to vector<1x256xf32>
    %31 = vector.broadcast %30 : vector<1x256xf32> to vector<5x256xf32>
    %32 = arith.mulf %29, %31 : vector<5x256xf32>
    %c239_i32 = arith.constant 239 : i32
    %33 = tpu.dynamic_rotate %1 by %c239_i32 dim 1 : vector<5x256xf32>, i32 -> vector<5x256xf32>
    %34 = vector.extract_strided_slice %2 {offsets = [8, 0], sizes = [1, 256], strides = [1, 1]} : vector<9x256xf32> to vector<1x256xf32>
    %35 = vector.broadcast %34 : vector<1x256xf32> to vector<5x256xf32>
    %36 = arith.mulf %33, %35 : vector<5x256xf32>
    %37 = tpu.concatenate %8, %12, %16, %20, %1, %24, %28, %32, %36 in 0 : vector<5x256xf32>, vector<5x256xf32>, vector<5x256xf32>, vector<5x256xf32>, vector<5x256xf32>, vector<5x256xf32>, vector<5x256xf32>, vector<5x256xf32>, vector<5x256xf32> -> vector<45x256xf32>
    %38 = arith.truncf %37 : vector<45x256xf32> to vector<45x256xbf16>
    %c0_8 = arith.constant 0 : index
    %c0_9 = arith.constant 0 : index
    %39 = vector.load %arg9[%c0_8, %c0_9] : memref<8x45xbf16, #tpu.memory_space<vmem>>, vector<8x45xbf16>
    %cst = arith.constant dense<0.000000e+00> : vector<8x256xf32>
    %40 = tpu.matmul %39, %38, %cst {dimension_numbers = #tpu.dot_dimension_numbers<[1], [0], [0], [1], [0, 0, 1, 1], [], []>} : vector<8x45xbf16>, vector<45x256xbf16>, vector<8x256xf32> -> vector<8x256xf32>
    %cst_10 = arith.constant dense<0.000000e+00> : vector<8xf32>
    %41 = vector.multi_reduction <add>, %40, %cst_10 [1] : vector<8x256xf32> to vector<8xf32>
    %42 = vector.shape_cast %41 : vector<8xf32> to vector<8x1xf32>
    %cst_11 = arith.constant 2.560000e+02 : f32
    %43 = vector.broadcast %cst_11 : f32 to vector<8x1xf32>
    %44 = arith.divf %42, %43 : vector<8x1xf32>
    %45 = vector.broadcast %44 : vector<8x1xf32> to vector<8x256xf32>
    %46 = arith.subf %40, %45 : vector<8x256xf32>
    %47 = arith.mulf %46, %46 : vector<8x256xf32>
    %cst_12 = arith.constant dense<0.000000e+00> : vector<8xf32>
    %48 = vector.multi_reduction <add>, %47, %cst_12 [1] : vector<8x256xf32> to vector<8xf32>
    %49 = vector.shape_cast %48 : vector<8xf32> to vector<8x1xf32>
    %cst_13 = arith.constant 2.560000e+02 : f32
    %50 = vector.broadcast %cst_13 : f32 to vector<8x1xf32>
    %51 = arith.divf %49, %50 : vector<8x1xf32>
    %cst_14 = arith.constant 9.99999974E-6 : f32
    %52 = vector.broadcast %cst_14 : f32 to vector<8x1xf32>
    %53 = arith.addf %51, %52 : vector<8x1xf32>
    %54 = math.rsqrt %53 : vector<8x1xf32>
    %55 = vector.broadcast %54 : vector<8x1xf32> to vector<8x256xf32>
    %56 = arith.mulf %46, %55 : vector<8x256xf32>
    %cst_15 = arith.constant 0.000000e+00 : f32
    %57 = vector.broadcast %cst_15 : f32 to vector<8x256xf32>
    %58 = arith.cmpf oge, %56, %57 : vector<8x256xf32>
    %cst_16 = arith.constant 2.000000e-01 : f32
    %59 = vector.broadcast %cst_16 : f32 to vector<8x256xf32>
    %60 = arith.mulf %59, %56 : vector<8x256xf32>
    %61 = arith.select %58, %56, %60 : vector<8x256xi1>, vector<8x256xf32>
    %c17_i32_17 = arith.constant 17 : i32
    %62 = tpu.dynamic_rotate %61 by %c17_i32_17 dim 1 : vector<8x256xf32>, i32 -> vector<8x256xf32>
    %63 = vector.extract_strided_slice %2 {offsets = [0, 0], sizes = [1, 256], strides = [1, 1]} : vector<9x256xf32> to vector<1x256xf32>
    %64 = vector.broadcast %63 : vector<1x256xf32> to vector<8x256xf32>
    %65 = arith.mulf %62, %64 : vector<8x256xf32>
    %c16_i32_18 = arith.constant 16 : i32
    %66 = tpu.dynamic_rotate %61 by %c16_i32_18 dim 1 : vector<8x256xf32>, i32 -> vector<8x256xf32>
    %67 = vector.extract_strided_slice %2 {offsets = [1, 0], sizes = [1, 256], strides = [1, 1]} : vector<9x256xf32> to vector<1x256xf32>
    %68 = vector.broadcast %67 : vector<1x256xf32> to vector<8x256xf32>
    %69 = arith.mulf %66, %68 : vector<8x256xf32>
    %c15_i32_19 = arith.constant 15 : i32
    %70 = tpu.dynamic_rotate %61 by %c15_i32_19 dim 1 : vector<8x256xf32>, i32 -> vector<8x256xf32>
    %71 = vector.extract_strided_slice %2 {offsets = [2, 0], sizes = [1, 256], strides = [1, 1]} : vector<9x256xf32> to vector<1x256xf32>
    %72 = vector.broadcast %71 : vector<1x256xf32> to vector<8x256xf32>
    %73 = arith.mulf %70, %72 : vector<8x256xf32>
    %c1_i32_20 = arith.constant 1 : i32
    %74 = tpu.dynamic_rotate %61 by %c1_i32_20 dim 1 : vector<8x256xf32>, i32 -> vector<8x256xf32>
    %75 = vector.extract_strided_slice %2 {offsets = [3, 0], sizes = [1, 256], strides = [1, 1]} : vector<9x256xf32> to vector<1x256xf32>
    %76 = vector.broadcast %75 : vector<1x256xf32> to vector<8x256xf32>
    %77 = arith.mulf %74, %76 : vector<8x256xf32>
    %c255_i32_21 = arith.constant 255 : i32
    %78 = tpu.dynamic_rotate %61 by %c255_i32_21 dim 1 : vector<8x256xf32>, i32 -> vector<8x256xf32>
    %79 = vector.extract_strided_slice %2 {offsets = [5, 0], sizes = [1, 256], strides = [1, 1]} : vector<9x256xf32> to vector<1x256xf32>
    %80 = vector.broadcast %79 : vector<1x256xf32> to vector<8x256xf32>
    %81 = arith.mulf %78, %80 : vector<8x256xf32>
    %c241_i32_22 = arith.constant 241 : i32
    %82 = tpu.dynamic_rotate %61 by %c241_i32_22 dim 1 : vector<8x256xf32>, i32 -> vector<8x256xf32>
    %83 = vector.extract_strided_slice %2 {offsets = [6, 0], sizes = [1, 256], strides = [1, 1]} : vector<9x256xf32> to vector<1x256xf32>
    %84 = vector.broadcast %83 : vector<1x256xf32> to vector<8x256xf32>
    %85 = arith.mulf %82, %84 : vector<8x256xf32>
    %c240_i32_23 = arith.constant 240 : i32
    %86 = tpu.dynamic_rotate %61 by %c240_i32_23 dim 1 : vector<8x256xf32>, i32 -> vector<8x256xf32>
    %87 = vector.extract_strided_slice %2 {offsets = [7, 0], sizes = [1, 256], strides = [1, 1]} : vector<9x256xf32> to vector<1x256xf32>
    %88 = vector.broadcast %87 : vector<1x256xf32> to vector<8x256xf32>
    %89 = arith.mulf %86, %88 : vector<8x256xf32>
    %c239_i32_24 = arith.constant 239 : i32
    %90 = tpu.dynamic_rotate %61 by %c239_i32_24 dim 1 : vector<8x256xf32>, i32 -> vector<8x256xf32>
    %91 = vector.extract_strided_slice %2 {offsets = [8, 0], sizes = [1, 256], strides = [1, 1]} : vector<9x256xf32> to vector<1x256xf32>
    %92 = vector.broadcast %91 : vector<1x256xf32> to vector<8x256xf32>
    %93 = arith.mulf %90, %92 : vector<8x256xf32>
    %94 = tpu.concatenate %65, %69, %73, %77, %61, %81, %85, %89, %93 in 0 : vector<8x256xf32>, vector<8x256xf32>, vector<8x256xf32>, vector<8x256xf32>, vector<8x256xf32>, vector<8x256xf32>, vector<8x256xf32>, vector<8x256xf32>, vector<8x256xf32> -> vector<72x256xf32>
    %95 = arith.truncf %94 : vector<72x256xf32> to vector<72x256xbf16>
    %c0_25 = arith.constant 0 : index
    %c0_26 = arith.constant 0 : index
    %96 = vector.load %arg10[%c0_25, %c0_26] : memref<8x72xbf16, #tpu.memory_space<vmem>>, vector<8x72xbf16>
    %cst_27 = arith.constant dense<0.000000e+00> : vector<8x256xf32>
    %97 = tpu.matmul %96, %95, %cst_27 {dimension_numbers = #tpu.dot_dimension_numbers<[1], [0], [0], [1], [0, 0, 1, 1], [], []>} : vector<8x72xbf16>, vector<72x256xbf16>, vector<8x256xf32> -> vector<8x256xf32>
    %cst_28 = arith.constant dense<0.000000e+00> : vector<8xf32>
    %98 = vector.multi_reduction <add>, %97, %cst_28 [1] : vector<8x256xf32> to vector<8xf32>
    %99 = vector.shape_cast %98 : vector<8xf32> to vector<8x1xf32>
    %cst_29 = arith.constant 2.560000e+02 : f32
    %100 = vector.broadcast %cst_29 : f32 to vector<8x1xf32>
    %101 = arith.divf %99, %100 : vector<8x1xf32>
    %102 = vector.broadcast %101 : vector<8x1xf32> to vector<8x256xf32>
    %103 = arith.subf %97, %102 : vector<8x256xf32>
    %104 = arith.mulf %103, %103 : vector<8x256xf32>
    %cst_30 = arith.constant dense<0.000000e+00> : vector<8xf32>
    %105 = vector.multi_reduction <add>, %104, %cst_30 [1] : vector<8x256xf32> to vector<8xf32>
    %106 = vector.shape_cast %105 : vector<8xf32> to vector<8x1xf32>
    %cst_31 = arith.constant 2.560000e+02 : f32
    %107 = vector.broadcast %cst_31 : f32 to vector<8x1xf32>
    %108 = arith.divf %106, %107 : vector<8x1xf32>
    %cst_32 = arith.constant 9.99999974E-6 : f32
    %109 = vector.broadcast %cst_32 : f32 to vector<8x1xf32>
    %110 = arith.addf %108, %109 : vector<8x1xf32>
    %111 = math.rsqrt %110 : vector<8x1xf32>
    %112 = vector.broadcast %111 : vector<8x1xf32> to vector<8x256xf32>
    %113 = arith.mulf %103, %112 : vector<8x256xf32>
    %cst_33 = arith.constant 0.000000e+00 : f32
    %114 = vector.broadcast %cst_33 : f32 to vector<8x256xf32>
    %115 = arith.cmpf oge, %113, %114 : vector<8x256xf32>
    %cst_34 = arith.constant 2.000000e-01 : f32
    %116 = vector.broadcast %cst_34 : f32 to vector<8x256xf32>
    %117 = arith.mulf %116, %113 : vector<8x256xf32>
    %118 = arith.select %115, %113, %117 : vector<8x256xi1>, vector<8x256xf32>
    %c255_i32_35 = arith.constant 255 : i32
    %119 = tpu.dynamic_rotate %118 by %c255_i32_35 dim 1 : vector<8x256xf32>, i32 -> vector<8x256xf32>
    %120 = arith.maximumf %118, %119 : vector<8x256xf32>
    %c240_i32_36 = arith.constant 240 : i32
    %121 = tpu.dynamic_rotate %120 by %c240_i32_36 dim 1 : vector<8x256xf32>, i32 -> vector<8x256xf32>
    %122 = arith.maximumf %120, %121 : vector<8x256xf32>
    %123 = arith.truncf %122 : vector<8x256xf32> to vector<8x256xbf16>
    %c0_37 = arith.constant 0 : index
    %c0_38 = arith.constant 0 : index
    %124 = vector.load %arg5[%c0_37, %c0_38] : memref<256x64xbf16, #tpu.memory_space<vmem>>, vector<256x64xbf16>
    %cst_39 = arith.constant dense<0.000000e+00> : vector<8x64xf32>
    %125 = tpu.matmul %123, %124, %cst_39 {dimension_numbers = #tpu.dot_dimension_numbers<[1], [0], [0], [1], [0, 0, 1, 1], [], []>} : vector<8x256xbf16>, vector<256x64xbf16>, vector<8x64xf32> -> vector<8x64xf32>
    %126 = vector.extract_strided_slice %125 {offsets = [0, 55], sizes = [8, 9], strides = [1, 1]} : vector<8x64xf32> to vector<8x9xf32>
    %127 = vector.extract_strided_slice %125 {offsets = [0, 0], sizes = [8, 55], strides = [1, 1]} : vector<8x64xf32> to vector<8x55xf32>
    %128 = tpu.concatenate %126, %127 in 1 : vector<8x9xf32>, vector<8x55xf32> -> vector<8x64xf32>
    %129 = vector.extract_strided_slice %3 {offsets = [0, 0], sizes = [1, 64], strides = [1, 1]} : vector<9x64xf32> to vector<1x64xf32>
    %130 = vector.broadcast %129 : vector<1x64xf32> to vector<8x64xf32>
    %131 = arith.mulf %128, %130 : vector<8x64xf32>
    %132 = vector.extract_strided_slice %125 {offsets = [0, 56], sizes = [8, 8], strides = [1, 1]} : vector<8x64xf32> to vector<8x8xf32>
    %133 = vector.extract_strided_slice %125 {offsets = [0, 0], sizes = [8, 56], strides = [1, 1]} : vector<8x64xf32> to vector<8x56xf32>
    %134 = tpu.concatenate %132, %133 in 1 : vector<8x8xf32>, vector<8x56xf32> -> vector<8x64xf32>
    %135 = vector.extract_strided_slice %3 {offsets = [1, 0], sizes = [1, 64], strides = [1, 1]} : vector<9x64xf32> to vector<1x64xf32>
    %136 = vector.broadcast %135 : vector<1x64xf32> to vector<8x64xf32>
    %137 = arith.mulf %134, %136 : vector<8x64xf32>
    %138 = vector.extract_strided_slice %125 {offsets = [0, 57], sizes = [8, 7], strides = [1, 1]} : vector<8x64xf32> to vector<8x7xf32>
    %139 = vector.extract_strided_slice %125 {offsets = [0, 0], sizes = [8, 57], strides = [1, 1]} : vector<8x64xf32> to vector<8x57xf32>
    %140 = tpu.concatenate %138, %139 in 1 : vector<8x7xf32>, vector<8x57xf32> -> vector<8x64xf32>
    %141 = vector.extract_strided_slice %3 {offsets = [2, 0], sizes = [1, 64], strides = [1, 1]} : vector<9x64xf32> to vector<1x64xf32>
    %142 = vector.broadcast %141 : vector<1x64xf32> to vector<8x64xf32>
    %143 = arith.mulf %140, %142 : vector<8x64xf32>
    %144 = vector.extract_strided_slice %125 {offsets = [0, 63], sizes = [8, 1], strides = [1, 1]} : vector<8x64xf32> to vector<8x1xf32>
    %145 = vector.extract_strided_slice %125 {offsets = [0, 0], sizes = [8, 63], strides = [1, 1]} : vector<8x64xf32> to vector<8x63xf32>
    %146 = tpu.concatenate %144, %145 in 1 : vector<8x1xf32>, vector<8x63xf32> -> vector<8x64xf32>
    %147 = vector.extract_strided_slice %3 {offsets = [3, 0], sizes = [1, 64], strides = [1, 1]} : vector<9x64xf32> to vector<1x64xf32>
    %148 = vector.broadcast %147 : vector<1x64xf32> to vector<8x64xf32>
    %149 = arith.mulf %146, %148 : vector<8x64xf32>
    %150 = vector.extract_strided_slice %125 {offsets = [0, 1], sizes = [8, 63], strides = [1, 1]} : vector<8x64xf32> to vector<8x63xf32>
    %151 = vector.extract_strided_slice %125 {offsets = [0, 0], sizes = [8, 1], strides = [1, 1]} : vector<8x64xf32> to vector<8x1xf32>
    %152 = tpu.concatenate %150, %151 in 1 : vector<8x63xf32>, vector<8x1xf32> -> vector<8x64xf32>
    %153 = vector.extract_strided_slice %3 {offsets = [5, 0], sizes = [1, 64], strides = [1, 1]} : vector<9x64xf32> to vector<1x64xf32>
    %154 = vector.broadcast %153 : vector<1x64xf32> to vector<8x64xf32>
    %155 = arith.mulf %152, %154 : vector<8x64xf32>
    %156 = vector.extract_strided_slice %125 {offsets = [0, 7], sizes = [8, 57], strides = [1, 1]} : vector<8x64xf32> to vector<8x57xf32>
    %157 = vector.extract_strided_slice %125 {offsets = [0, 0], sizes = [8, 7], strides = [1, 1]} : vector<8x64xf32> to vector<8x7xf32>
    %158 = tpu.concatenate %156, %157 in 1 : vector<8x57xf32>, vector<8x7xf32> -> vector<8x64xf32>
    %159 = vector.extract_strided_slice %3 {offsets = [6, 0], sizes = [1, 64], strides = [1, 1]} : vector<9x64xf32> to vector<1x64xf32>
    %160 = vector.broadcast %159 : vector<1x64xf32> to vector<8x64xf32>
    %161 = arith.mulf %158, %160 : vector<8x64xf32>
    %162 = vector.extract_strided_slice %125 {offsets = [0, 8], sizes = [8, 56], strides = [1, 1]} : vector<8x64xf32> to vector<8x56xf32>
    %163 = vector.extract_strided_slice %125 {offsets = [0, 0], sizes = [8, 8], strides = [1, 1]} : vector<8x64xf32> to vector<8x8xf32>
    %164 = tpu.concatenate %162, %163 in 1 : vector<8x56xf32>, vector<8x8xf32> -> vector<8x64xf32>
    %165 = vector.extract_strided_slice %3 {offsets = [7, 0], sizes = [1, 64], strides = [1, 1]} : vector<9x64xf32> to vector<1x64xf32>
    %166 = vector.broadcast %165 : vector<1x64xf32> to vector<8x64xf32>
    %167 = arith.mulf %164, %166 : vector<8x64xf32>
    %168 = vector.extract_strided_slice %125 {offsets = [0, 9], sizes = [8, 55], strides = [1, 1]} : vector<8x64xf32> to vector<8x55xf32>
    %169 = vector.extract_strided_slice %125 {offsets = [0, 0], sizes = [8, 9], strides = [1, 1]} : vector<8x64xf32> to vector<8x9xf32>
    %170 = tpu.concatenate %168, %169 in 1 : vector<8x55xf32>, vector<8x9xf32> -> vector<8x64xf32>
    %171 = vector.extract_strided_slice %3 {offsets = [8, 0], sizes = [1, 64], strides = [1, 1]} : vector<9x64xf32> to vector<1x64xf32>
    %172 = vector.broadcast %171 : vector<1x64xf32> to vector<8x64xf32>
    %173 = arith.mulf %170, %172 : vector<8x64xf32>
    %174 = tpu.concatenate %131, %137, %143, %149, %125, %155, %161, %167, %173 in 0 : vector<8x64xf32>, vector<8x64xf32>, vector<8x64xf32>, vector<8x64xf32>, vector<8x64xf32>, vector<8x64xf32>, vector<8x64xf32>, vector<8x64xf32>, vector<8x64xf32> -> vector<72x64xf32>
    %175 = arith.truncf %174 : vector<72x64xf32> to vector<72x64xbf16>
    %c0_40 = arith.constant 0 : index
    %c0_41 = arith.constant 0 : index
    %176 = vector.load %arg11[%c0_40, %c0_41] : memref<16x72xbf16, #tpu.memory_space<vmem>>, vector<16x72xbf16>
    %cst_42 = arith.constant dense<0.000000e+00> : vector<16x64xf32>
    %177 = tpu.matmul %176, %175, %cst_42 {dimension_numbers = #tpu.dot_dimension_numbers<[1], [0], [0], [1], [0, 0, 1, 1], [], []>} : vector<16x72xbf16>, vector<72x64xbf16>, vector<16x64xf32> -> vector<16x64xf32>
    %cst_43 = arith.constant dense<0.000000e+00> : vector<16xf32>
    %178 = vector.multi_reduction <add>, %177, %cst_43 [1] : vector<16x64xf32> to vector<16xf32>
    %179 = vector.shape_cast %178 : vector<16xf32> to vector<16x1xf32>
    %cst_44 = arith.constant 6.400000e+01 : f32
    %180 = vector.broadcast %cst_44 : f32 to vector<16x1xf32>
    %181 = arith.divf %179, %180 : vector<16x1xf32>
    %182 = vector.broadcast %181 : vector<16x1xf32> to vector<16x64xf32>
    %183 = arith.subf %177, %182 : vector<16x64xf32>
    %184 = arith.mulf %183, %183 : vector<16x64xf32>
    %cst_45 = arith.constant dense<0.000000e+00> : vector<16xf32>
    %185 = vector.multi_reduction <add>, %184, %cst_45 [1] : vector<16x64xf32> to vector<16xf32>
    %186 = vector.shape_cast %185 : vector<16xf32> to vector<16x1xf32>
    %cst_46 = arith.constant 6.400000e+01 : f32
    %187 = vector.broadcast %cst_46 : f32 to vector<16x1xf32>
    %188 = arith.divf %186, %187 : vector<16x1xf32>
    %cst_47 = arith.constant 9.99999974E-6 : f32
    %189 = vector.broadcast %cst_47 : f32 to vector<16x1xf32>
    %190 = arith.addf %188, %189 : vector<16x1xf32>
    %191 = math.rsqrt %190 : vector<16x1xf32>
    %192 = vector.broadcast %191 : vector<16x1xf32> to vector<16x64xf32>
    %193 = arith.mulf %183, %192 : vector<16x64xf32>
    %cst_48 = arith.constant 0.000000e+00 : f32
    %194 = vector.broadcast %cst_48 : f32 to vector<16x64xf32>
    %195 = arith.cmpf oge, %193, %194 : vector<16x64xf32>
    %cst_49 = arith.constant 2.000000e-01 : f32
    %196 = vector.broadcast %cst_49 : f32 to vector<16x64xf32>
    %197 = arith.mulf %196, %193 : vector<16x64xf32>
    %198 = arith.select %195, %193, %197 : vector<16x64xi1>, vector<16x64xf32>
    %199 = vector.extract_strided_slice %198 {offsets = [0, 55], sizes = [16, 9], strides = [1, 1]} : vector<16x64xf32> to vector<16x9xf32>
    %200 = vector.extract_strided_slice %198 {offsets = [0, 0], sizes = [16, 55], strides = [1, 1]} : vector<16x64xf32> to vector<16x55xf32>
    %201 = tpu.concatenate %199, %200 in 1 : vector<16x9xf32>, vector<16x55xf32> -> vector<16x64xf32>
    %202 = vector.extract_strided_slice %3 {offsets = [0, 0], sizes = [1, 64], strides = [1, 1]} : vector<9x64xf32> to vector<1x64xf32>
    %203 = vector.broadcast %202 : vector<1x64xf32> to vector<16x64xf32>
    %204 = arith.mulf %201, %203 : vector<16x64xf32>
    %205 = vector.extract_strided_slice %198 {offsets = [0, 56], sizes = [16, 8], strides = [1, 1]} : vector<16x64xf32> to vector<16x8xf32>
    %206 = vector.extract_strided_slice %198 {offsets = [0, 0], sizes = [16, 56], strides = [1, 1]} : vector<16x64xf32> to vector<16x56xf32>
    %207 = tpu.concatenate %205, %206 in 1 : vector<16x8xf32>, vector<16x56xf32> -> vector<16x64xf32>
    %208 = vector.extract_strided_slice %3 {offsets = [1, 0], sizes = [1, 64], strides = [1, 1]} : vector<9x64xf32> to vector<1x64xf32>
    %209 = vector.broadcast %208 : vector<1x64xf32> to vector<16x64xf32>
    %210 = arith.mulf %207, %209 : vector<16x64xf32>
    %211 = vector.extract_strided_slice %198 {offsets = [0, 57], sizes = [16, 7], strides = [1, 1]} : vector<16x64xf32> to vector<16x7xf32>
    %212 = vector.extract_strided_slice %198 {offsets = [0, 0], sizes = [16, 57], strides = [1, 1]} : vector<16x64xf32> to vector<16x57xf32>
    %213 = tpu.concatenate %211, %212 in 1 : vector<16x7xf32>, vector<16x57xf32> -> vector<16x64xf32>
    %214 = vector.extract_strided_slice %3 {offsets = [2, 0], sizes = [1, 64], strides = [1, 1]} : vector<9x64xf32> to vector<1x64xf32>
    %215 = vector.broadcast %214 : vector<1x64xf32> to vector<16x64xf32>
    %216 = arith.mulf %213, %215 : vector<16x64xf32>
    %217 = vector.extract_strided_slice %198 {offsets = [0, 63], sizes = [16, 1], strides = [1, 1]} : vector<16x64xf32> to vector<16x1xf32>
    %218 = vector.extract_strided_slice %198 {offsets = [0, 0], sizes = [16, 63], strides = [1, 1]} : vector<16x64xf32> to vector<16x63xf32>
    %219 = tpu.concatenate %217, %218 in 1 : vector<16x1xf32>, vector<16x63xf32> -> vector<16x64xf32>
    %220 = vector.extract_strided_slice %3 {offsets = [3, 0], sizes = [1, 64], strides = [1, 1]} : vector<9x64xf32> to vector<1x64xf32>
    %221 = vector.broadcast %220 : vector<1x64xf32> to vector<16x64xf32>
    %222 = arith.mulf %219, %221 : vector<16x64xf32>
    %223 = vector.extract_strided_slice %198 {offsets = [0, 1], sizes = [16, 63], strides = [1, 1]} : vector<16x64xf32> to vector<16x63xf32>
    %224 = vector.extract_strided_slice %198 {offsets = [0, 0], sizes = [16, 1], strides = [1, 1]} : vector<16x64xf32> to vector<16x1xf32>
    %225 = tpu.concatenate %223, %224 in 1 : vector<16x63xf32>, vector<16x1xf32> -> vector<16x64xf32>
    %226 = vector.extract_strided_slice %3 {offsets = [5, 0], sizes = [1, 64], strides = [1, 1]} : vector<9x64xf32> to vector<1x64xf32>
    %227 = vector.broadcast %226 : vector<1x64xf32> to vector<16x64xf32>
    %228 = arith.mulf %225, %227 : vector<16x64xf32>
    %229 = vector.extract_strided_slice %198 {offsets = [0, 7], sizes = [16, 57], strides = [1, 1]} : vector<16x64xf32> to vector<16x57xf32>
    %230 = vector.extract_strided_slice %198 {offsets = [0, 0], sizes = [16, 7], strides = [1, 1]} : vector<16x64xf32> to vector<16x7xf32>
    %231 = tpu.concatenate %229, %230 in 1 : vector<16x57xf32>, vector<16x7xf32> -> vector<16x64xf32>
    %232 = vector.extract_strided_slice %3 {offsets = [6, 0], sizes = [1, 64], strides = [1, 1]} : vector<9x64xf32> to vector<1x64xf32>
    %233 = vector.broadcast %232 : vector<1x64xf32> to vector<16x64xf32>
    %234 = arith.mulf %231, %233 : vector<16x64xf32>
    %235 = vector.extract_strided_slice %198 {offsets = [0, 8], sizes = [16, 56], strides = [1, 1]} : vector<16x64xf32> to vector<16x56xf32>
    %236 = vector.extract_strided_slice %198 {offsets = [0, 0], sizes = [16, 8], strides = [1, 1]} : vector<16x64xf32> to vector<16x8xf32>
    %237 = tpu.concatenate %235, %236 in 1 : vector<16x56xf32>, vector<16x8xf32> -> vector<16x64xf32>
    %238 = vector.extract_strided_slice %3 {offsets = [7, 0], sizes = [1, 64], strides = [1, 1]} : vector<9x64xf32> to vector<1x64xf32>
    %239 = vector.broadcast %238 : vector<1x64xf32> to vector<16x64xf32>
    %240 = arith.mulf %237, %239 : vector<16x64xf32>
    %241 = vector.extract_strided_slice %198 {offsets = [0, 9], sizes = [16, 55], strides = [1, 1]} : vector<16x64xf32> to vector<16x55xf32>
    %242 = vector.extract_strided_slice %198 {offsets = [0, 0], sizes = [16, 9], strides = [1, 1]} : vector<16x64xf32> to vector<16x9xf32>
    %243 = tpu.concatenate %241, %242 in 1 : vector<16x55xf32>, vector<16x9xf32> -> vector<16x64xf32>
    %244 = vector.extract_strided_slice %3 {offsets = [8, 0], sizes = [1, 64], strides = [1, 1]} : vector<9x64xf32> to vector<1x64xf32>
    %245 = vector.broadcast %244 : vector<1x64xf32> to vector<16x64xf32>
    %246 = arith.mulf %243, %245 : vector<16x64xf32>
    %247 = tpu.concatenate %204, %210, %216, %222, %198, %228, %234, %240, %246 in 0 : vector<16x64xf32>, vector<16x64xf32>, vector<16x64xf32>, vector<16x64xf32>, vector<16x64xf32>, vector<16x64xf32>, vector<16x64xf32>, vector<16x64xf32>, vector<16x64xf32> -> vector<144x64xf32>
    %248 = arith.truncf %247 : vector<144x64xf32> to vector<144x64xbf16>
    %c0_50 = arith.constant 0 : index
    %c0_51 = arith.constant 0 : index
    %249 = vector.load %arg12[%c0_50, %c0_51] : memref<16x144xbf16, #tpu.memory_space<vmem>>, vector<16x144xbf16>
    %cst_52 = arith.constant dense<0.000000e+00> : vector<16x64xf32>
    %250 = tpu.matmul %249, %248, %cst_52 {dimension_numbers = #tpu.dot_dimension_numbers<[1], [0], [0], [1], [0, 0, 1, 1], [], []>} : vector<16x144xbf16>, vector<144x64xbf16>, vector<16x64xf32> -> vector<16x64xf32>
    %cst_53 = arith.constant dense<0.000000e+00> : vector<16xf32>
    %251 = vector.multi_reduction <add>, %250, %cst_53 [1] : vector<16x64xf32> to vector<16xf32>
    %252 = vector.shape_cast %251 : vector<16xf32> to vector<16x1xf32>
    %cst_54 = arith.constant 6.400000e+01 : f32
    %253 = vector.broadcast %cst_54 : f32 to vector<16x1xf32>
    %254 = arith.divf %252, %253 : vector<16x1xf32>
    %255 = vector.broadcast %254 : vector<16x1xf32> to vector<16x64xf32>
    %256 = arith.subf %250, %255 : vector<16x64xf32>
    %257 = arith.mulf %256, %256 : vector<16x64xf32>
    %cst_55 = arith.constant dense<0.000000e+00> : vector<16xf32>
    %258 = vector.multi_reduction <add>, %257, %cst_55 [1] : vector<16x64xf32> to vector<16xf32>
    %259 = vector.shape_cast %258 : vector<16xf32> to vector<16x1xf32>
    %cst_56 = arith.constant 6.400000e+01 : f32
    %260 = vector.broadcast %cst_56 : f32 to vector<16x1xf32>
    %261 = arith.divf %259, %260 : vector<16x1xf32>
    %cst_57 = arith.constant 9.99999974E-6 : f32
    %262 = vector.broadcast %cst_57 : f32 to vector<16x1xf32>
    %263 = arith.addf %261, %262 : vector<16x1xf32>
    %264 = math.rsqrt %263 : vector<16x1xf32>
    %265 = vector.broadcast %264 : vector<16x1xf32> to vector<16x64xf32>
    %266 = arith.mulf %256, %265 : vector<16x64xf32>
    %cst_58 = arith.constant 0.000000e+00 : f32
    %267 = vector.broadcast %cst_58 : f32 to vector<16x64xf32>
    %268 = arith.cmpf oge, %266, %267 : vector<16x64xf32>
    %cst_59 = arith.constant 2.000000e-01 : f32
    %269 = vector.broadcast %cst_59 : f32 to vector<16x64xf32>
    %270 = arith.mulf %269, %266 : vector<16x64xf32>
    %271 = arith.select %268, %266, %270 : vector<16x64xi1>, vector<16x64xf32>
    %272 = vector.extract_strided_slice %271 {offsets = [0, 1], sizes = [16, 63], strides = [1, 1]} : vector<16x64xf32> to vector<16x63xf32>
    %273 = vector.extract_strided_slice %271 {offsets = [0, 0], sizes = [16, 1], strides = [1, 1]} : vector<16x64xf32> to vector<16x1xf32>
    %274 = tpu.concatenate %272, %273 in 1 : vector<16x63xf32>, vector<16x1xf32> -> vector<16x64xf32>
    %275 = arith.maximumf %271, %274 : vector<16x64xf32>
    %276 = vector.extract_strided_slice %275 {offsets = [0, 8], sizes = [16, 56], strides = [1, 1]} : vector<16x64xf32> to vector<16x56xf32>
    %277 = vector.extract_strided_slice %275 {offsets = [0, 0], sizes = [16, 8], strides = [1, 1]} : vector<16x64xf32> to vector<16x8xf32>
    %278 = tpu.concatenate %276, %277 in 1 : vector<16x56xf32>, vector<16x8xf32> -> vector<16x64xf32>
    %279 = arith.maximumf %275, %278 : vector<16x64xf32>
    %280 = arith.truncf %279 : vector<16x64xf32> to vector<16x64xbf16>
    %c0_60 = arith.constant 0 : index
    %c0_61 = arith.constant 0 : index
    %281 = vector.load %arg6[%c0_60, %c0_61] : memref<64x16xbf16, #tpu.memory_space<vmem>>, vector<64x16xbf16>
    %cst_62 = arith.constant dense<0.000000e+00> : vector<16x16xf32>
    %282 = tpu.matmul %280, %281, %cst_62 {dimension_numbers = #tpu.dot_dimension_numbers<[1], [0], [0], [1], [0, 0, 1, 1], [], []>} : vector<16x64xbf16>, vector<64x16xbf16>, vector<16x16xf32> -> vector<16x16xf32>
    %283 = vector.extract_strided_slice %282 {offsets = [0, 11], sizes = [16, 5], strides = [1, 1]} : vector<16x16xf32> to vector<16x5xf32>
    %284 = vector.extract_strided_slice %282 {offsets = [0, 0], sizes = [16, 11], strides = [1, 1]} : vector<16x16xf32> to vector<16x11xf32>
    %285 = tpu.concatenate %283, %284 in 1 : vector<16x5xf32>, vector<16x11xf32> -> vector<16x16xf32>
    %286 = vector.extract_strided_slice %4 {offsets = [0, 0], sizes = [1, 16], strides = [1, 1]} : vector<9x16xf32> to vector<1x16xf32>
    %287 = vector.broadcast %286 : vector<1x16xf32> to vector<16x16xf32>
    %288 = arith.mulf %285, %287 : vector<16x16xf32>
    %289 = vector.extract_strided_slice %282 {offsets = [0, 12], sizes = [16, 4], strides = [1, 1]} : vector<16x16xf32> to vector<16x4xf32>
    %290 = vector.extract_strided_slice %282 {offsets = [0, 0], sizes = [16, 12], strides = [1, 1]} : vector<16x16xf32> to vector<16x12xf32>
    %291 = tpu.concatenate %289, %290 in 1 : vector<16x4xf32>, vector<16x12xf32> -> vector<16x16xf32>
    %292 = vector.extract_strided_slice %4 {offsets = [1, 0], sizes = [1, 16], strides = [1, 1]} : vector<9x16xf32> to vector<1x16xf32>
    %293 = vector.broadcast %292 : vector<1x16xf32> to vector<16x16xf32>
    %294 = arith.mulf %291, %293 : vector<16x16xf32>
    %295 = vector.extract_strided_slice %282 {offsets = [0, 13], sizes = [16, 3], strides = [1, 1]} : vector<16x16xf32> to vector<16x3xf32>
    %296 = vector.extract_strided_slice %282 {offsets = [0, 0], sizes = [16, 13], strides = [1, 1]} : vector<16x16xf32> to vector<16x13xf32>
    %297 = tpu.concatenate %295, %296 in 1 : vector<16x3xf32>, vector<16x13xf32> -> vector<16x16xf32>
    %298 = vector.extract_strided_slice %4 {offsets = [2, 0], sizes = [1, 16], strides = [1, 1]} : vector<9x16xf32> to vector<1x16xf32>
    %299 = vector.broadcast %298 : vector<1x16xf32> to vector<16x16xf32>
    %300 = arith.mulf %297, %299 : vector<16x16xf32>
    %301 = vector.extract_strided_slice %282 {offsets = [0, 15], sizes = [16, 1], strides = [1, 1]} : vector<16x16xf32> to vector<16x1xf32>
    %302 = vector.extract_strided_slice %282 {offsets = [0, 0], sizes = [16, 15], strides = [1, 1]} : vector<16x16xf32> to vector<16x15xf32>
    %303 = tpu.concatenate %301, %302 in 1 : vector<16x1xf32>, vector<16x15xf32> -> vector<16x16xf32>
    %304 = vector.extract_strided_slice %4 {offsets = [3, 0], sizes = [1, 16], strides = [1, 1]} : vector<9x16xf32> to vector<1x16xf32>
    %305 = vector.broadcast %304 : vector<1x16xf32> to vector<16x16xf32>
    %306 = arith.mulf %303, %305 : vector<16x16xf32>
    %307 = vector.extract_strided_slice %282 {offsets = [0, 1], sizes = [16, 15], strides = [1, 1]} : vector<16x16xf32> to vector<16x15xf32>
    %308 = vector.extract_strided_slice %282 {offsets = [0, 0], sizes = [16, 1], strides = [1, 1]} : vector<16x16xf32> to vector<16x1xf32>
    %309 = tpu.concatenate %307, %308 in 1 : vector<16x15xf32>, vector<16x1xf32> -> vector<16x16xf32>
    %310 = vector.extract_strided_slice %4 {offsets = [5, 0], sizes = [1, 16], strides = [1, 1]} : vector<9x16xf32> to vector<1x16xf32>
    %311 = vector.broadcast %310 : vector<1x16xf32> to vector<16x16xf32>
    %312 = arith.mulf %309, %311 : vector<16x16xf32>
    %313 = vector.extract_strided_slice %282 {offsets = [0, 3], sizes = [16, 13], strides = [1, 1]} : vector<16x16xf32> to vector<16x13xf32>
    %314 = vector.extract_strided_slice %282 {offsets = [0, 0], sizes = [16, 3], strides = [1, 1]} : vector<16x16xf32> to vector<16x3xf32>
    %315 = tpu.concatenate %313, %314 in 1 : vector<16x13xf32>, vector<16x3xf32> -> vector<16x16xf32>
    %316 = vector.extract_strided_slice %4 {offsets = [6, 0], sizes = [1, 16], strides = [1, 1]} : vector<9x16xf32> to vector<1x16xf32>
    %317 = vector.broadcast %316 : vector<1x16xf32> to vector<16x16xf32>
    %318 = arith.mulf %315, %317 : vector<16x16xf32>
    %319 = vector.extract_strided_slice %282 {offsets = [0, 4], sizes = [16, 12], strides = [1, 1]} : vector<16x16xf32> to vector<16x12xf32>
    %320 = vector.extract_strided_slice %282 {offsets = [0, 0], sizes = [16, 4], strides = [1, 1]} : vector<16x16xf32> to vector<16x4xf32>
    %321 = tpu.concatenate %319, %320 in 1 : vector<16x12xf32>, vector<16x4xf32> -> vector<16x16xf32>
    %322 = vector.extract_strided_slice %4 {offsets = [7, 0], sizes = [1, 16], strides = [1, 1]} : vector<9x16xf32> to vector<1x16xf32>
    %323 = vector.broadcast %322 : vector<1x16xf32> to vector<16x16xf32>
    %324 = arith.mulf %321, %323 : vector<16x16xf32>
    %325 = vector.extract_strided_slice %282 {offsets = [0, 5], sizes = [16, 11], strides = [1, 1]} : vector<16x16xf32> to vector<16x11xf32>
    %326 = vector.extract_strided_slice %282 {offsets = [0, 0], sizes = [16, 5], strides = [1, 1]} : vector<16x16xf32> to vector<16x5xf32>
    %327 = tpu.concatenate %325, %326 in 1 : vector<16x11xf32>, vector<16x5xf32> -> vector<16x16xf32>
    %328 = vector.extract_strided_slice %4 {offsets = [8, 0], sizes = [1, 16], strides = [1, 1]} : vector<9x16xf32> to vector<1x16xf32>
    %329 = vector.broadcast %328 : vector<1x16xf32> to vector<16x16xf32>
    %330 = arith.mulf %327, %329 : vector<16x16xf32>
    %331 = tpu.concatenate %288, %294, %300, %306, %282, %312, %318, %324, %330 in 0 : vector<16x16xf32>, vector<16x16xf32>, vector<16x16xf32>, vector<16x16xf32>, vector<16x16xf32>, vector<16x16xf32>, vector<16x16xf32>, vector<16x16xf32>, vector<16x16xf32> -> vector<144x16xf32>
    %332 = arith.truncf %331 : vector<144x16xf32> to vector<144x16xbf16>
    %c0_63 = arith.constant 0 : index
    %c0_64 = arith.constant 0 : index
    %333 = vector.load %arg13[%c0_63, %c0_64] : memref<32x144xbf16, #tpu.memory_space<vmem>>, vector<32x144xbf16>
    %cst_65 = arith.constant dense<0.000000e+00> : vector<32x16xf32>
    %334 = tpu.matmul %333, %332, %cst_65 {dimension_numbers = #tpu.dot_dimension_numbers<[1], [0], [0], [1], [0, 0, 1, 1], [], []>} : vector<32x144xbf16>, vector<144x16xbf16>, vector<32x16xf32> -> vector<32x16xf32>
    %cst_66 = arith.constant dense<0.000000e+00> : vector<32xf32>
    %335 = vector.multi_reduction <add>, %334, %cst_66 [1] : vector<32x16xf32> to vector<32xf32>
    %336 = vector.shape_cast %335 : vector<32xf32> to vector<32x1xf32>
    %cst_67 = arith.constant 1.600000e+01 : f32
    %337 = vector.broadcast %cst_67 : f32 to vector<32x1xf32>
    %338 = arith.divf %336, %337 : vector<32x1xf32>
    %339 = vector.broadcast %338 : vector<32x1xf32> to vector<32x16xf32>
    %340 = arith.subf %334, %339 : vector<32x16xf32>
    %341 = arith.mulf %340, %340 : vector<32x16xf32>
    %cst_68 = arith.constant dense<0.000000e+00> : vector<32xf32>
    %342 = vector.multi_reduction <add>, %341, %cst_68 [1] : vector<32x16xf32> to vector<32xf32>
    %343 = vector.shape_cast %342 : vector<32xf32> to vector<32x1xf32>
    %cst_69 = arith.constant 1.600000e+01 : f32
    %344 = vector.broadcast %cst_69 : f32 to vector<32x1xf32>
    %345 = arith.divf %343, %344 : vector<32x1xf32>
    %cst_70 = arith.constant 9.99999974E-6 : f32
    %346 = vector.broadcast %cst_70 : f32 to vector<32x1xf32>
    %347 = arith.addf %345, %346 : vector<32x1xf32>
    %348 = math.rsqrt %347 : vector<32x1xf32>
    %349 = vector.broadcast %348 : vector<32x1xf32> to vector<32x16xf32>
    %350 = arith.mulf %340, %349 : vector<32x16xf32>
    %cst_71 = arith.constant 0.000000e+00 : f32
    %351 = vector.broadcast %cst_71 : f32 to vector<32x16xf32>
    %352 = arith.cmpf oge, %350, %351 : vector<32x16xf32>
    %cst_72 = arith.constant 2.000000e-01 : f32
    %353 = vector.broadcast %cst_72 : f32 to vector<32x16xf32>
    %354 = arith.mulf %353, %350 : vector<32x16xf32>
    %355 = arith.select %352, %350, %354 : vector<32x16xi1>, vector<32x16xf32>
    %356 = vector.extract_strided_slice %355 {offsets = [0, 11], sizes = [32, 5], strides = [1, 1]} : vector<32x16xf32> to vector<32x5xf32>
    %357 = vector.extract_strided_slice %355 {offsets = [0, 0], sizes = [32, 11], strides = [1, 1]} : vector<32x16xf32> to vector<32x11xf32>
    %358 = tpu.concatenate %356, %357 in 1 : vector<32x5xf32>, vector<32x11xf32> -> vector<32x16xf32>
    %359 = vector.extract_strided_slice %4 {offsets = [0, 0], sizes = [1, 16], strides = [1, 1]} : vector<9x16xf32> to vector<1x16xf32>
    %360 = vector.broadcast %359 : vector<1x16xf32> to vector<32x16xf32>
    %361 = arith.mulf %358, %360 : vector<32x16xf32>
    %362 = vector.extract_strided_slice %355 {offsets = [0, 12], sizes = [32, 4], strides = [1, 1]} : vector<32x16xf32> to vector<32x4xf32>
    %363 = vector.extract_strided_slice %355 {offsets = [0, 0], sizes = [32, 12], strides = [1, 1]} : vector<32x16xf32> to vector<32x12xf32>
    %364 = tpu.concatenate %362, %363 in 1 : vector<32x4xf32>, vector<32x12xf32> -> vector<32x16xf32>
    %365 = vector.extract_strided_slice %4 {offsets = [1, 0], sizes = [1, 16], strides = [1, 1]} : vector<9x16xf32> to vector<1x16xf32>
    %366 = vector.broadcast %365 : vector<1x16xf32> to vector<32x16xf32>
    %367 = arith.mulf %364, %366 : vector<32x16xf32>
    %368 = vector.extract_strided_slice %355 {offsets = [0, 13], sizes = [32, 3], strides = [1, 1]} : vector<32x16xf32> to vector<32x3xf32>
    %369 = vector.extract_strided_slice %355 {offsets = [0, 0], sizes = [32, 13], strides = [1, 1]} : vector<32x16xf32> to vector<32x13xf32>
    %370 = tpu.concatenate %368, %369 in 1 : vector<32x3xf32>, vector<32x13xf32> -> vector<32x16xf32>
    %371 = vector.extract_strided_slice %4 {offsets = [2, 0], sizes = [1, 16], strides = [1, 1]} : vector<9x16xf32> to vector<1x16xf32>
    %372 = vector.broadcast %371 : vector<1x16xf32> to vector<32x16xf32>
    %373 = arith.mulf %370, %372 : vector<32x16xf32>
    %374 = vector.extract_strided_slice %355 {offsets = [0, 15], sizes = [32, 1], strides = [1, 1]} : vector<32x16xf32> to vector<32x1xf32>
    %375 = vector.extract_strided_slice %355 {offsets = [0, 0], sizes = [32, 15], strides = [1, 1]} : vector<32x16xf32> to vector<32x15xf32>
    %376 = tpu.concatenate %374, %375 in 1 : vector<32x1xf32>, vector<32x15xf32> -> vector<32x16xf32>
    %377 = vector.extract_strided_slice %4 {offsets = [3, 0], sizes = [1, 16], strides = [1, 1]} : vector<9x16xf32> to vector<1x16xf32>
    %378 = vector.broadcast %377 : vector<1x16xf32> to vector<32x16xf32>
    %379 = arith.mulf %376, %378 : vector<32x16xf32>
    %380 = vector.extract_strided_slice %355 {offsets = [0, 1], sizes = [32, 15], strides = [1, 1]} : vector<32x16xf32> to vector<32x15xf32>
    %381 = vector.extract_strided_slice %355 {offsets = [0, 0], sizes = [32, 1], strides = [1, 1]} : vector<32x16xf32> to vector<32x1xf32>
    %382 = tpu.concatenate %380, %381 in 1 : vector<32x15xf32>, vector<32x1xf32> -> vector<32x16xf32>
    %383 = vector.extract_strided_slice %4 {offsets = [5, 0], sizes = [1, 16], strides = [1, 1]} : vector<9x16xf32> to vector<1x16xf32>
    %384 = vector.broadcast %383 : vector<1x16xf32> to vector<32x16xf32>
    %385 = arith.mulf %382, %384 : vector<32x16xf32>
    %386 = vector.extract_strided_slice %355 {offsets = [0, 3], sizes = [32, 13], strides = [1, 1]} : vector<32x16xf32> to vector<32x13xf32>
    %387 = vector.extract_strided_slice %355 {offsets = [0, 0], sizes = [32, 3], strides = [1, 1]} : vector<32x16xf32> to vector<32x3xf32>
    %388 = tpu.concatenate %386, %387 in 1 : vector<32x13xf32>, vector<32x3xf32> -> vector<32x16xf32>
    %389 = vector.extract_strided_slice %4 {offsets = [6, 0], sizes = [1, 16], strides = [1, 1]} : vector<9x16xf32> to vector<1x16xf32>
    %390 = vector.broadcast %389 : vector<1x16xf32> to vector<32x16xf32>
    %391 = arith.mulf %388, %390 : vector<32x16xf32>
    %392 = vector.extract_strided_slice %355 {offsets = [0, 4], sizes = [32, 12], strides = [1, 1]} : vector<32x16xf32> to vector<32x12xf32>
    %393 = vector.extract_strided_slice %355 {offsets = [0, 0], sizes = [32, 4], strides = [1, 1]} : vector<32x16xf32> to vector<32x4xf32>
    %394 = tpu.concatenate %392, %393 in 1 : vector<32x12xf32>, vector<32x4xf32> -> vector<32x16xf32>
    %395 = vector.extract_strided_slice %4 {offsets = [7, 0], sizes = [1, 16], strides = [1, 1]} : vector<9x16xf32> to vector<1x16xf32>
    %396 = vector.broadcast %395 : vector<1x16xf32> to vector<32x16xf32>
    %397 = arith.mulf %394, %396 : vector<32x16xf32>
    %398 = vector.extract_strided_slice %355 {offsets = [0, 5], sizes = [32, 11], strides = [1, 1]} : vector<32x16xf32> to vector<32x11xf32>
    %399 = vector.extract_strided_slice %355 {offsets = [0, 0], sizes = [32, 5], strides = [1, 1]} : vector<32x16xf32> to vector<32x5xf32>
    %400 = tpu.concatenate %398, %399 in 1 : vector<32x11xf32>, vector<32x5xf32> -> vector<32x16xf32>
    %401 = vector.extract_strided_slice %4 {offsets = [8, 0], sizes = [1, 16], strides = [1, 1]} : vector<9x16xf32> to vector<1x16xf32>
    %402 = vector.broadcast %401 : vector<1x16xf32> to vector<32x16xf32>
    %403 = arith.mulf %400, %402 : vector<32x16xf32>
    %404 = tpu.concatenate %361, %367, %373, %379, %355, %385, %391, %397, %403 in 0 : vector<32x16xf32>, vector<32x16xf32>, vector<32x16xf32>, vector<32x16xf32>, vector<32x16xf32>, vector<32x16xf32>, vector<32x16xf32>, vector<32x16xf32>, vector<32x16xf32> -> vector<288x16xf32>
    %405 = arith.truncf %404 : vector<288x16xf32> to vector<288x16xbf16>
    %c0_73 = arith.constant 0 : index
    %c0_74 = arith.constant 0 : index
    %406 = vector.load %arg14[%c0_73, %c0_74] : memref<32x288xbf16, #tpu.memory_space<vmem>>, vector<32x288xbf16>
    %cst_75 = arith.constant dense<0.000000e+00> : vector<32x16xf32>
    %407 = tpu.matmul %406, %405, %cst_75 {dimension_numbers = #tpu.dot_dimension_numbers<[1], [0], [0], [1], [0, 0, 1, 1], [], []>} : vector<32x288xbf16>, vector<288x16xbf16>, vector<32x16xf32> -> vector<32x16xf32>
    %cst_76 = arith.constant dense<0.000000e+00> : vector<32xf32>
    %408 = vector.multi_reduction <add>, %407, %cst_76 [1] : vector<32x16xf32> to vector<32xf32>
    %409 = vector.shape_cast %408 : vector<32xf32> to vector<32x1xf32>
    %cst_77 = arith.constant 1.600000e+01 : f32
    %410 = vector.broadcast %cst_77 : f32 to vector<32x1xf32>
    %411 = arith.divf %409, %410 : vector<32x1xf32>
    %412 = vector.broadcast %411 : vector<32x1xf32> to vector<32x16xf32>
    %413 = arith.subf %407, %412 : vector<32x16xf32>
    %414 = arith.mulf %413, %413 : vector<32x16xf32>
    %cst_78 = arith.constant dense<0.000000e+00> : vector<32xf32>
    %415 = vector.multi_reduction <add>, %414, %cst_78 [1] : vector<32x16xf32> to vector<32xf32>
    %416 = vector.shape_cast %415 : vector<32xf32> to vector<32x1xf32>
    %cst_79 = arith.constant 1.600000e+01 : f32
    %417 = vector.broadcast %cst_79 : f32 to vector<32x1xf32>
    %418 = arith.divf %416, %417 : vector<32x1xf32>
    %cst_80 = arith.constant 9.99999974E-6 : f32
    %419 = vector.broadcast %cst_80 : f32 to vector<32x1xf32>
    %420 = arith.addf %418, %419 : vector<32x1xf32>
    %421 = math.rsqrt %420 : vector<32x1xf32>
    %422 = vector.broadcast %421 : vector<32x1xf32> to vector<32x16xf32>
    %423 = arith.mulf %413, %422 : vector<32x16xf32>
    %cst_81 = arith.constant 0.000000e+00 : f32
    %424 = vector.broadcast %cst_81 : f32 to vector<32x16xf32>
    %425 = arith.cmpf oge, %423, %424 : vector<32x16xf32>
    %cst_82 = arith.constant 2.000000e-01 : f32
    %426 = vector.broadcast %cst_82 : f32 to vector<32x16xf32>
    %427 = arith.mulf %426, %423 : vector<32x16xf32>
    %428 = arith.select %425, %423, %427 : vector<32x16xi1>, vector<32x16xf32>
    %c0_83 = arith.constant 0 : index
    %c0_84 = arith.constant 0 : index
    %429 = vector.load %arg15[%c0_83, %c0_84] : memref<64x32xbf16, #tpu.memory_space<vmem>>, vector<64x32xbf16>
    %430 = arith.truncf %428 : vector<32x16xf32> to vector<32x16xbf16>
    %cst_85 = arith.constant dense<0.000000e+00> : vector<64x16xf32>
    %431 = tpu.matmul %429, %430, %cst_85 {dimension_numbers = #tpu.dot_dimension_numbers<[1], [0], [0], [1], [0, 0, 1, 1], [], []>} : vector<64x32xbf16>, vector<32x16xbf16>, vector<64x16xf32> -> vector<64x16xf32>
    %432 = arith.truncf %431 : vector<64x16xf32> to vector<64x16xbf16>
    %c0_86 = arith.constant 0 : index
    %c0_87 = arith.constant 0 : index
    %433 = vector.load %arg7[%c0_86, %c0_87] : memref<16x64xbf16, #tpu.memory_space<vmem>>, vector<16x64xbf16>
    %cst_88 = arith.constant dense<0.000000e+00> : vector<64x64xf32>
    %434 = tpu.matmul %432, %433, %cst_88 {dimension_numbers = #tpu.dot_dimension_numbers<[1], [0], [0], [1], [0, 0, 1, 1], [], []>} : vector<64x16xbf16>, vector<16x64xbf16>, vector<64x64xf32> -> vector<64x64xf32>
    %435 = vector.extract_strided_slice %434 {offsets = [0, 0], sizes = [16, 64], strides = [1, 1]} : vector<64x64xf32> to vector<16x64xf32>
    %436 = vector.extract_strided_slice %434 {offsets = [16, 0], sizes = [16, 64], strides = [1, 1]} : vector<64x64xf32> to vector<16x64xf32>
    %437 = vector.extract_strided_slice %436 {offsets = [0, 63], sizes = [16, 1], strides = [1, 1]} : vector<16x64xf32> to vector<16x1xf32>
    %438 = vector.extract_strided_slice %436 {offsets = [0, 0], sizes = [16, 63], strides = [1, 1]} : vector<16x64xf32> to vector<16x63xf32>
    %439 = tpu.concatenate %437, %438 in 1 : vector<16x1xf32>, vector<16x63xf32> -> vector<16x64xf32>
    %440 = arith.addf %435, %439 : vector<16x64xf32>
    %441 = vector.extract_strided_slice %434 {offsets = [32, 0], sizes = [16, 64], strides = [1, 1]} : vector<64x64xf32> to vector<16x64xf32>
    %442 = vector.extract_strided_slice %441 {offsets = [0, 56], sizes = [16, 8], strides = [1, 1]} : vector<16x64xf32> to vector<16x8xf32>
    %443 = vector.extract_strided_slice %441 {offsets = [0, 0], sizes = [16, 56], strides = [1, 1]} : vector<16x64xf32> to vector<16x56xf32>
    %444 = tpu.concatenate %442, %443 in 1 : vector<16x8xf32>, vector<16x56xf32> -> vector<16x64xf32>
    %445 = arith.addf %440, %444 : vector<16x64xf32>
    %446 = vector.extract_strided_slice %434 {offsets = [48, 0], sizes = [16, 64], strides = [1, 1]} : vector<64x64xf32> to vector<16x64xf32>
    %447 = vector.extract_strided_slice %446 {offsets = [0, 55], sizes = [16, 9], strides = [1, 1]} : vector<16x64xf32> to vector<16x9xf32>
    %448 = vector.extract_strided_slice %446 {offsets = [0, 0], sizes = [16, 55], strides = [1, 1]} : vector<16x64xf32> to vector<16x55xf32>
    %449 = tpu.concatenate %447, %448 in 1 : vector<16x9xf32>, vector<16x55xf32> -> vector<16x64xf32>
    %450 = arith.addf %445, %449 : vector<16x64xf32>
    %451 = tpu.concatenate %271, %450 in 0 : vector<16x64xf32>, vector<16x64xf32> -> vector<32x64xf32>
    %452 = vector.extract_strided_slice %451 {offsets = [0, 55], sizes = [32, 9], strides = [1, 1]} : vector<32x64xf32> to vector<32x9xf32>
    %453 = vector.extract_strided_slice %451 {offsets = [0, 0], sizes = [32, 55], strides = [1, 1]} : vector<32x64xf32> to vector<32x55xf32>
    %454 = tpu.concatenate %452, %453 in 1 : vector<32x9xf32>, vector<32x55xf32> -> vector<32x64xf32>
    %455 = vector.extract_strided_slice %3 {offsets = [0, 0], sizes = [1, 64], strides = [1, 1]} : vector<9x64xf32> to vector<1x64xf32>
    %456 = vector.broadcast %455 : vector<1x64xf32> to vector<32x64xf32>
    %457 = arith.mulf %454, %456 : vector<32x64xf32>
    %458 = vector.extract_strided_slice %451 {offsets = [0, 56], sizes = [32, 8], strides = [1, 1]} : vector<32x64xf32> to vector<32x8xf32>
    %459 = vector.extract_strided_slice %451 {offsets = [0, 0], sizes = [32, 56], strides = [1, 1]} : vector<32x64xf32> to vector<32x56xf32>
    %460 = tpu.concatenate %458, %459 in 1 : vector<32x8xf32>, vector<32x56xf32> -> vector<32x64xf32>
    %461 = vector.extract_strided_slice %3 {offsets = [1, 0], sizes = [1, 64], strides = [1, 1]} : vector<9x64xf32> to vector<1x64xf32>
    %462 = vector.broadcast %461 : vector<1x64xf32> to vector<32x64xf32>
    %463 = arith.mulf %460, %462 : vector<32x64xf32>
    %464 = vector.extract_strided_slice %451 {offsets = [0, 57], sizes = [32, 7], strides = [1, 1]} : vector<32x64xf32> to vector<32x7xf32>
    %465 = vector.extract_strided_slice %451 {offsets = [0, 0], sizes = [32, 57], strides = [1, 1]} : vector<32x64xf32> to vector<32x57xf32>
    %466 = tpu.concatenate %464, %465 in 1 : vector<32x7xf32>, vector<32x57xf32> -> vector<32x64xf32>
    %467 = vector.extract_strided_slice %3 {offsets = [2, 0], sizes = [1, 64], strides = [1, 1]} : vector<9x64xf32> to vector<1x64xf32>
    %468 = vector.broadcast %467 : vector<1x64xf32> to vector<32x64xf32>
    %469 = arith.mulf %466, %468 : vector<32x64xf32>
    %470 = vector.extract_strided_slice %451 {offsets = [0, 63], sizes = [32, 1], strides = [1, 1]} : vector<32x64xf32> to vector<32x1xf32>
    %471 = vector.extract_strided_slice %451 {offsets = [0, 0], sizes = [32, 63], strides = [1, 1]} : vector<32x64xf32> to vector<32x63xf32>
    %472 = tpu.concatenate %470, %471 in 1 : vector<32x1xf32>, vector<32x63xf32> -> vector<32x64xf32>
    %473 = vector.extract_strided_slice %3 {offsets = [3, 0], sizes = [1, 64], strides = [1, 1]} : vector<9x64xf32> to vector<1x64xf32>
    %474 = vector.broadcast %473 : vector<1x64xf32> to vector<32x64xf32>
    %475 = arith.mulf %472, %474 : vector<32x64xf32>
    %476 = vector.extract_strided_slice %451 {offsets = [0, 1], sizes = [32, 63], strides = [1, 1]} : vector<32x64xf32> to vector<32x63xf32>
    %477 = vector.extract_strided_slice %451 {offsets = [0, 0], sizes = [32, 1], strides = [1, 1]} : vector<32x64xf32> to vector<32x1xf32>
    %478 = tpu.concatenate %476, %477 in 1 : vector<32x63xf32>, vector<32x1xf32> -> vector<32x64xf32>
    %479 = vector.extract_strided_slice %3 {offsets = [5, 0], sizes = [1, 64], strides = [1, 1]} : vector<9x64xf32> to vector<1x64xf32>
    %480 = vector.broadcast %479 : vector<1x64xf32> to vector<32x64xf32>
    %481 = arith.mulf %478, %480 : vector<32x64xf32>
    %482 = vector.extract_strided_slice %451 {offsets = [0, 7], sizes = [32, 57], strides = [1, 1]} : vector<32x64xf32> to vector<32x57xf32>
    %483 = vector.extract_strided_slice %451 {offsets = [0, 0], sizes = [32, 7], strides = [1, 1]} : vector<32x64xf32> to vector<32x7xf32>
    %484 = tpu.concatenate %482, %483 in 1 : vector<32x57xf32>, vector<32x7xf32> -> vector<32x64xf32>
    %485 = vector.extract_strided_slice %3 {offsets = [6, 0], sizes = [1, 64], strides = [1, 1]} : vector<9x64xf32> to vector<1x64xf32>
    %486 = vector.broadcast %485 : vector<1x64xf32> to vector<32x64xf32>
    %487 = arith.mulf %484, %486 : vector<32x64xf32>
    %488 = vector.extract_strided_slice %451 {offsets = [0, 8], sizes = [32, 56], strides = [1, 1]} : vector<32x64xf32> to vector<32x56xf32>
    %489 = vector.extract_strided_slice %451 {offsets = [0, 0], sizes = [32, 8], strides = [1, 1]} : vector<32x64xf32> to vector<32x8xf32>
    %490 = tpu.concatenate %488, %489 in 1 : vector<32x56xf32>, vector<32x8xf32> -> vector<32x64xf32>
    %491 = vector.extract_strided_slice %3 {offsets = [7, 0], sizes = [1, 64], strides = [1, 1]} : vector<9x64xf32> to vector<1x64xf32>
    %492 = vector.broadcast %491 : vector<1x64xf32> to vector<32x64xf32>
    %493 = arith.mulf %490, %492 : vector<32x64xf32>
    %494 = vector.extract_strided_slice %451 {offsets = [0, 9], sizes = [32, 55], strides = [1, 1]} : vector<32x64xf32> to vector<32x55xf32>
    %495 = vector.extract_strided_slice %451 {offsets = [0, 0], sizes = [32, 9], strides = [1, 1]} : vector<32x64xf32> to vector<32x9xf32>
    %496 = tpu.concatenate %494, %495 in 1 : vector<32x55xf32>, vector<32x9xf32> -> vector<32x64xf32>
    %497 = vector.extract_strided_slice %3 {offsets = [8, 0], sizes = [1, 64], strides = [1, 1]} : vector<9x64xf32> to vector<1x64xf32>
    %498 = vector.broadcast %497 : vector<1x64xf32> to vector<32x64xf32>
    %499 = arith.mulf %496, %498 : vector<32x64xf32>
    %500 = tpu.concatenate %457, %463, %469, %475, %451, %481, %487, %493, %499 in 0 : vector<32x64xf32>, vector<32x64xf32>, vector<32x64xf32>, vector<32x64xf32>, vector<32x64xf32>, vector<32x64xf32>, vector<32x64xf32>, vector<32x64xf32>, vector<32x64xf32> -> vector<288x64xf32>
    %501 = arith.truncf %500 : vector<288x64xf32> to vector<288x64xbf16>
    %c0_89 = arith.constant 0 : index
    %c0_90 = arith.constant 0 : index
    %502 = vector.load %arg16[%c0_89, %c0_90] : memref<16x288xbf16, #tpu.memory_space<vmem>>, vector<16x288xbf16>
    %cst_91 = arith.constant dense<0.000000e+00> : vector<16x64xf32>
    %503 = tpu.matmul %502, %501, %cst_91 {dimension_numbers = #tpu.dot_dimension_numbers<[1], [0], [0], [1], [0, 0, 1, 1], [], []>} : vector<16x288xbf16>, vector<288x64xbf16>, vector<16x64xf32> -> vector<16x64xf32>
    %cst_92 = arith.constant dense<0.000000e+00> : vector<16xf32>
    %504 = vector.multi_reduction <add>, %503, %cst_92 [1] : vector<16x64xf32> to vector<16xf32>
    %505 = vector.shape_cast %504 : vector<16xf32> to vector<16x1xf32>
    %cst_93 = arith.constant 6.400000e+01 : f32
    %506 = vector.broadcast %cst_93 : f32 to vector<16x1xf32>
    %507 = arith.divf %505, %506 : vector<16x1xf32>
    %508 = vector.broadcast %507 : vector<16x1xf32> to vector<16x64xf32>
    %509 = arith.subf %503, %508 : vector<16x64xf32>
    %510 = arith.mulf %509, %509 : vector<16x64xf32>
    %cst_94 = arith.constant dense<0.000000e+00> : vector<16xf32>
    %511 = vector.multi_reduction <add>, %510, %cst_94 [1] : vector<16x64xf32> to vector<16xf32>
    %512 = vector.shape_cast %511 : vector<16xf32> to vector<16x1xf32>
    %cst_95 = arith.constant 6.400000e+01 : f32
    %513 = vector.broadcast %cst_95 : f32 to vector<16x1xf32>
    %514 = arith.divf %512, %513 : vector<16x1xf32>
    %cst_96 = arith.constant 9.99999974E-6 : f32
    %515 = vector.broadcast %cst_96 : f32 to vector<16x1xf32>
    %516 = arith.addf %514, %515 : vector<16x1xf32>
    %517 = math.rsqrt %516 : vector<16x1xf32>
    %518 = vector.broadcast %517 : vector<16x1xf32> to vector<16x64xf32>
    %519 = arith.mulf %509, %518 : vector<16x64xf32>
    %cst_97 = arith.constant 0.000000e+00 : f32
    %520 = vector.broadcast %cst_97 : f32 to vector<16x64xf32>
    %521 = arith.cmpf oge, %519, %520 : vector<16x64xf32>
    %cst_98 = arith.constant 2.000000e-01 : f32
    %522 = vector.broadcast %cst_98 : f32 to vector<16x64xf32>
    %523 = arith.mulf %522, %519 : vector<16x64xf32>
    %524 = arith.select %521, %519, %523 : vector<16x64xi1>, vector<16x64xf32>
    %525 = vector.extract_strided_slice %524 {offsets = [0, 55], sizes = [16, 9], strides = [1, 1]} : vector<16x64xf32> to vector<16x9xf32>
    %526 = vector.extract_strided_slice %524 {offsets = [0, 0], sizes = [16, 55], strides = [1, 1]} : vector<16x64xf32> to vector<16x55xf32>
    %527 = tpu.concatenate %525, %526 in 1 : vector<16x9xf32>, vector<16x55xf32> -> vector<16x64xf32>
    %528 = vector.extract_strided_slice %3 {offsets = [0, 0], sizes = [1, 64], strides = [1, 1]} : vector<9x64xf32> to vector<1x64xf32>
    %529 = vector.broadcast %528 : vector<1x64xf32> to vector<16x64xf32>
    %530 = arith.mulf %527, %529 : vector<16x64xf32>
    %531 = vector.extract_strided_slice %524 {offsets = [0, 56], sizes = [16, 8], strides = [1, 1]} : vector<16x64xf32> to vector<16x8xf32>
    %532 = vector.extract_strided_slice %524 {offsets = [0, 0], sizes = [16, 56], strides = [1, 1]} : vector<16x64xf32> to vector<16x56xf32>
    %533 = tpu.concatenate %531, %532 in 1 : vector<16x8xf32>, vector<16x56xf32> -> vector<16x64xf32>
    %534 = vector.extract_strided_slice %3 {offsets = [1, 0], sizes = [1, 64], strides = [1, 1]} : vector<9x64xf32> to vector<1x64xf32>
    %535 = vector.broadcast %534 : vector<1x64xf32> to vector<16x64xf32>
    %536 = arith.mulf %533, %535 : vector<16x64xf32>
    %537 = vector.extract_strided_slice %524 {offsets = [0, 57], sizes = [16, 7], strides = [1, 1]} : vector<16x64xf32> to vector<16x7xf32>
    %538 = vector.extract_strided_slice %524 {offsets = [0, 0], sizes = [16, 57], strides = [1, 1]} : vector<16x64xf32> to vector<16x57xf32>
    %539 = tpu.concatenate %537, %538 in 1 : vector<16x7xf32>, vector<16x57xf32> -> vector<16x64xf32>
    %540 = vector.extract_strided_slice %3 {offsets = [2, 0], sizes = [1, 64], strides = [1, 1]} : vector<9x64xf32> to vector<1x64xf32>
    %541 = vector.broadcast %540 : vector<1x64xf32> to vector<16x64xf32>
    %542 = arith.mulf %539, %541 : vector<16x64xf32>
    %543 = vector.extract_strided_slice %524 {offsets = [0, 63], sizes = [16, 1], strides = [1, 1]} : vector<16x64xf32> to vector<16x1xf32>
    %544 = vector.extract_strided_slice %524 {offsets = [0, 0], sizes = [16, 63], strides = [1, 1]} : vector<16x64xf32> to vector<16x63xf32>
    %545 = tpu.concatenate %543, %544 in 1 : vector<16x1xf32>, vector<16x63xf32> -> vector<16x64xf32>
    %546 = vector.extract_strided_slice %3 {offsets = [3, 0], sizes = [1, 64], strides = [1, 1]} : vector<9x64xf32> to vector<1x64xf32>
    %547 = vector.broadcast %546 : vector<1x64xf32> to vector<16x64xf32>
    %548 = arith.mulf %545, %547 : vector<16x64xf32>
    %549 = vector.extract_strided_slice %524 {offsets = [0, 1], sizes = [16, 63], strides = [1, 1]} : vector<16x64xf32> to vector<16x63xf32>
    %550 = vector.extract_strided_slice %524 {offsets = [0, 0], sizes = [16, 1], strides = [1, 1]} : vector<16x64xf32> to vector<16x1xf32>
    %551 = tpu.concatenate %549, %550 in 1 : vector<16x63xf32>, vector<16x1xf32> -> vector<16x64xf32>
    %552 = vector.extract_strided_slice %3 {offsets = [5, 0], sizes = [1, 64], strides = [1, 1]} : vector<9x64xf32> to vector<1x64xf32>
    %553 = vector.broadcast %552 : vector<1x64xf32> to vector<16x64xf32>
    %554 = arith.mulf %551, %553 : vector<16x64xf32>
    %555 = vector.extract_strided_slice %524 {offsets = [0, 7], sizes = [16, 57], strides = [1, 1]} : vector<16x64xf32> to vector<16x57xf32>
    %556 = vector.extract_strided_slice %524 {offsets = [0, 0], sizes = [16, 7], strides = [1, 1]} : vector<16x64xf32> to vector<16x7xf32>
    %557 = tpu.concatenate %555, %556 in 1 : vector<16x57xf32>, vector<16x7xf32> -> vector<16x64xf32>
    %558 = vector.extract_strided_slice %3 {offsets = [6, 0], sizes = [1, 64], strides = [1, 1]} : vector<9x64xf32> to vector<1x64xf32>
    %559 = vector.broadcast %558 : vector<1x64xf32> to vector<16x64xf32>
    %560 = arith.mulf %557, %559 : vector<16x64xf32>
    %561 = vector.extract_strided_slice %524 {offsets = [0, 8], sizes = [16, 56], strides = [1, 1]} : vector<16x64xf32> to vector<16x56xf32>
    %562 = vector.extract_strided_slice %524 {offsets = [0, 0], sizes = [16, 8], strides = [1, 1]} : vector<16x64xf32> to vector<16x8xf32>
    %563 = tpu.concatenate %561, %562 in 1 : vector<16x56xf32>, vector<16x8xf32> -> vector<16x64xf32>
    %564 = vector.extract_strided_slice %3 {offsets = [7, 0], sizes = [1, 64], strides = [1, 1]} : vector<9x64xf32> to vector<1x64xf32>
    %565 = vector.broadcast %564 : vector<1x64xf32> to vector<16x64xf32>
    %566 = arith.mulf %563, %565 : vector<16x64xf32>
    %567 = vector.extract_strided_slice %524 {offsets = [0, 9], sizes = [16, 55], strides = [1, 1]} : vector<16x64xf32> to vector<16x55xf32>
    %568 = vector.extract_strided_slice %524 {offsets = [0, 0], sizes = [16, 9], strides = [1, 1]} : vector<16x64xf32> to vector<16x9xf32>
    %569 = tpu.concatenate %567, %568 in 1 : vector<16x55xf32>, vector<16x9xf32> -> vector<16x64xf32>
    %570 = vector.extract_strided_slice %3 {offsets = [8, 0], sizes = [1, 64], strides = [1, 1]} : vector<9x64xf32> to vector<1x64xf32>
    %571 = vector.broadcast %570 : vector<1x64xf32> to vector<16x64xf32>
    %572 = arith.mulf %569, %571 : vector<16x64xf32>
    %573 = tpu.concatenate %530, %536, %542, %548, %524, %554, %560, %566, %572 in 0 : vector<16x64xf32>, vector<16x64xf32>, vector<16x64xf32>, vector<16x64xf32>, vector<16x64xf32>, vector<16x64xf32>, vector<16x64xf32>, vector<16x64xf32>, vector<16x64xf32> -> vector<144x64xf32>
    %574 = arith.truncf %573 : vector<144x64xf32> to vector<144x64xbf16>
    %c0_99 = arith.constant 0 : index
    %c0_100 = arith.constant 0 : index
    %575 = vector.load %arg17[%c0_99, %c0_100] : memref<16x144xbf16, #tpu.memory_space<vmem>>, vector<16x144xbf16>
    %cst_101 = arith.constant dense<0.000000e+00> : vector<16x64xf32>
    %576 = tpu.matmul %575, %574, %cst_101 {dimension_numbers = #tpu.dot_dimension_numbers<[1], [0], [0], [1], [0, 0, 1, 1], [], []>} : vector<16x144xbf16>, vector<144x64xbf16>, vector<16x64xf32> -> vector<16x64xf32>
    %cst_102 = arith.constant dense<0.000000e+00> : vector<16xf32>
    %577 = vector.multi_reduction <add>, %576, %cst_102 [1] : vector<16x64xf32> to vector<16xf32>
    %578 = vector.shape_cast %577 : vector<16xf32> to vector<16x1xf32>
    %cst_103 = arith.constant 6.400000e+01 : f32
    %579 = vector.broadcast %cst_103 : f32 to vector<16x1xf32>
    %580 = arith.divf %578, %579 : vector<16x1xf32>
    %581 = vector.broadcast %580 : vector<16x1xf32> to vector<16x64xf32>
    %582 = arith.subf %576, %581 : vector<16x64xf32>
    %583 = arith.mulf %582, %582 : vector<16x64xf32>
    %cst_104 = arith.constant dense<0.000000e+00> : vector<16xf32>
    %584 = vector.multi_reduction <add>, %583, %cst_104 [1] : vector<16x64xf32> to vector<16xf32>
    %585 = vector.shape_cast %584 : vector<16xf32> to vector<16x1xf32>
    %cst_105 = arith.constant 6.400000e+01 : f32
    %586 = vector.broadcast %cst_105 : f32 to vector<16x1xf32>
    %587 = arith.divf %585, %586 : vector<16x1xf32>
    %cst_106 = arith.constant 9.99999974E-6 : f32
    %588 = vector.broadcast %cst_106 : f32 to vector<16x1xf32>
    %589 = arith.addf %587, %588 : vector<16x1xf32>
    %590 = math.rsqrt %589 : vector<16x1xf32>
    %591 = vector.broadcast %590 : vector<16x1xf32> to vector<16x64xf32>
    %592 = arith.mulf %582, %591 : vector<16x64xf32>
    %cst_107 = arith.constant 0.000000e+00 : f32
    %593 = vector.broadcast %cst_107 : f32 to vector<16x64xf32>
    %594 = arith.cmpf oge, %592, %593 : vector<16x64xf32>
    %cst_108 = arith.constant 2.000000e-01 : f32
    %595 = vector.broadcast %cst_108 : f32 to vector<16x64xf32>
    %596 = arith.mulf %595, %592 : vector<16x64xf32>
    %597 = arith.select %594, %592, %596 : vector<16x64xi1>, vector<16x64xf32>
    %c0_109 = arith.constant 0 : index
    %c0_110 = arith.constant 0 : index
    %598 = vector.load %arg18[%c0_109, %c0_110] : memref<32x16xbf16, #tpu.memory_space<vmem>>, vector<32x16xbf16>
    %599 = arith.truncf %597 : vector<16x64xf32> to vector<16x64xbf16>
    %cst_111 = arith.constant dense<0.000000e+00> : vector<32x64xf32>
    %600 = tpu.matmul %598, %599, %cst_111 {dimension_numbers = #tpu.dot_dimension_numbers<[1], [0], [0], [1], [0, 0, 1, 1], [], []>} : vector<32x16xbf16>, vector<16x64xbf16>, vector<32x64xf32> -> vector<32x64xf32>
    %601 = arith.truncf %600 : vector<32x64xf32> to vector<32x64xbf16>
    %c0_112 = arith.constant 0 : index
    %c0_113 = arith.constant 0 : index
    %602 = vector.load %arg8[%c0_112, %c0_113] : memref<64x256xbf16, #tpu.memory_space<vmem>>, vector<64x256xbf16>
    %cst_114 = arith.constant dense<0.000000e+00> : vector<32x256xf32>
    %603 = tpu.matmul %601, %602, %cst_114 {dimension_numbers = #tpu.dot_dimension_numbers<[1], [0], [0], [1], [0, 0, 1, 1], [], []>} : vector<32x64xbf16>, vector<64x256xbf16>, vector<32x256xf32> -> vector<32x256xf32>
    %604 = vector.extract_strided_slice %603 {offsets = [0, 0], sizes = [8, 256], strides = [1, 1]} : vector<32x256xf32> to vector<8x256xf32>
    %605 = vector.extract_strided_slice %603 {offsets = [8, 0], sizes = [8, 256], strides = [1, 1]} : vector<32x256xf32> to vector<8x256xf32>
    %c1_i32_115 = arith.constant 1 : i32
    %606 = tpu.dynamic_rotate %605 by %c1_i32_115 dim 1 : vector<8x256xf32>, i32 -> vector<8x256xf32>
    %607 = arith.addf %604, %606 : vector<8x256xf32>
    %608 = vector.extract_strided_slice %603 {offsets = [16, 0], sizes = [8, 256], strides = [1, 1]} : vector<32x256xf32> to vector<8x256xf32>
    %c16_i32_116 = arith.constant 16 : i32
    %609 = tpu.dynamic_rotate %608 by %c16_i32_116 dim 1 : vector<8x256xf32>, i32 -> vector<8x256xf32>
    %610 = arith.addf %607, %609 : vector<8x256xf32>
    %611 = vector.extract_strided_slice %603 {offsets = [24, 0], sizes = [8, 256], strides = [1, 1]} : vector<32x256xf32> to vector<8x256xf32>
    %c17_i32_117 = arith.constant 17 : i32
    %612 = tpu.dynamic_rotate %611 by %c17_i32_117 dim 1 : vector<8x256xf32>, i32 -> vector<8x256xf32>
    %613 = arith.addf %610, %612 : vector<8x256xf32>
    %614 = tpu.concatenate %118, %613 in 0 : vector<8x256xf32>, vector<8x256xf32> -> vector<16x256xf32>
    %c17_i32_118 = arith.constant 17 : i32
    %615 = tpu.dynamic_rotate %614 by %c17_i32_118 dim 1 : vector<16x256xf32>, i32 -> vector<16x256xf32>
    %616 = vector.extract_strided_slice %2 {offsets = [0, 0], sizes = [1, 256], strides = [1, 1]} : vector<9x256xf32> to vector<1x256xf32>
    %617 = vector.broadcast %616 : vector<1x256xf32> to vector<16x256xf32>
    %618 = arith.mulf %615, %617 : vector<16x256xf32>
    %c16_i32_119 = arith.constant 16 : i32
    %619 = tpu.dynamic_rotate %614 by %c16_i32_119 dim 1 : vector<16x256xf32>, i32 -> vector<16x256xf32>
    %620 = vector.extract_strided_slice %2 {offsets = [1, 0], sizes = [1, 256], strides = [1, 1]} : vector<9x256xf32> to vector<1x256xf32>
    %621 = vector.broadcast %620 : vector<1x256xf32> to vector<16x256xf32>
    %622 = arith.mulf %619, %621 : vector<16x256xf32>
    %c15_i32_120 = arith.constant 15 : i32
    %623 = tpu.dynamic_rotate %614 by %c15_i32_120 dim 1 : vector<16x256xf32>, i32 -> vector<16x256xf32>
    %624 = vector.extract_strided_slice %2 {offsets = [2, 0], sizes = [1, 256], strides = [1, 1]} : vector<9x256xf32> to vector<1x256xf32>
    %625 = vector.broadcast %624 : vector<1x256xf32> to vector<16x256xf32>
    %626 = arith.mulf %623, %625 : vector<16x256xf32>
    %c1_i32_121 = arith.constant 1 : i32
    %627 = tpu.dynamic_rotate %614 by %c1_i32_121 dim 1 : vector<16x256xf32>, i32 -> vector<16x256xf32>
    %628 = vector.extract_strided_slice %2 {offsets = [3, 0], sizes = [1, 256], strides = [1, 1]} : vector<9x256xf32> to vector<1x256xf32>
    %629 = vector.broadcast %628 : vector<1x256xf32> to vector<16x256xf32>
    %630 = arith.mulf %627, %629 : vector<16x256xf32>
    %c255_i32_122 = arith.constant 255 : i32
    %631 = tpu.dynamic_rotate %614 by %c255_i32_122 dim 1 : vector<16x256xf32>, i32 -> vector<16x256xf32>
    %632 = vector.extract_strided_slice %2 {offsets = [5, 0], sizes = [1, 256], strides = [1, 1]} : vector<9x256xf32> to vector<1x256xf32>
    %633 = vector.broadcast %632 : vector<1x256xf32> to vector<16x256xf32>
    %634 = arith.mulf %631, %633 : vector<16x256xf32>
    %c241_i32_123 = arith.constant 241 : i32
    %635 = tpu.dynamic_rotate %614 by %c241_i32_123 dim 1 : vector<16x256xf32>, i32 -> vector<16x256xf32>
    %636 = vector.extract_strided_slice %2 {offsets = [6, 0], sizes = [1, 256], strides = [1, 1]} : vector<9x256xf32> to vector<1x256xf32>
    %637 = vector.broadcast %636 : vector<1x256xf32> to vector<16x256xf32>
    %638 = arith.mulf %635, %637 : vector<16x256xf32>
    %c240_i32_124 = arith.constant 240 : i32
    %639 = tpu.dynamic_rotate %614 by %c240_i32_124 dim 1 : vector<16x256xf32>, i32 -> vector<16x256xf32>
    %640 = vector.extract_strided_slice %2 {offsets = [7, 0], sizes = [1, 256], strides = [1, 1]} : vector<9x256xf32> to vector<1x256xf32>
    %641 = vector.broadcast %640 : vector<1x256xf32> to vector<16x256xf32>
    %642 = arith.mulf %639, %641 : vector<16x256xf32>
    %c239_i32_125 = arith.constant 239 : i32
    %643 = tpu.dynamic_rotate %614 by %c239_i32_125 dim 1 : vector<16x256xf32>, i32 -> vector<16x256xf32>
    %644 = vector.extract_strided_slice %2 {offsets = [8, 0], sizes = [1, 256], strides = [1, 1]} : vector<9x256xf32> to vector<1x256xf32>
    %645 = vector.broadcast %644 : vector<1x256xf32> to vector<16x256xf32>
    %646 = arith.mulf %643, %645 : vector<16x256xf32>
    %647 = tpu.concatenate %618, %622, %626, %630, %614, %634, %638, %642, %646 in 0 : vector<16x256xf32>, vector<16x256xf32>, vector<16x256xf32>, vector<16x256xf32>, vector<16x256xf32>, vector<16x256xf32>, vector<16x256xf32>, vector<16x256xf32>, vector<16x256xf32> -> vector<144x256xf32>
    %648 = arith.truncf %647 : vector<144x256xf32> to vector<144x256xbf16>
    %c0_126 = arith.constant 0 : index
    %c0_127 = arith.constant 0 : index
    %649 = vector.load %arg19[%c0_126, %c0_127] : memref<8x144xbf16, #tpu.memory_space<vmem>>, vector<8x144xbf16>
    %cst_128 = arith.constant dense<0.000000e+00> : vector<8x256xf32>
    %650 = tpu.matmul %649, %648, %cst_128 {dimension_numbers = #tpu.dot_dimension_numbers<[1], [0], [0], [1], [0, 0, 1, 1], [], []>} : vector<8x144xbf16>, vector<144x256xbf16>, vector<8x256xf32> -> vector<8x256xf32>
    %cst_129 = arith.constant dense<0.000000e+00> : vector<8xf32>
    %651 = vector.multi_reduction <add>, %650, %cst_129 [1] : vector<8x256xf32> to vector<8xf32>
    %652 = vector.shape_cast %651 : vector<8xf32> to vector<8x1xf32>
    %cst_130 = arith.constant 2.560000e+02 : f32
    %653 = vector.broadcast %cst_130 : f32 to vector<8x1xf32>
    %654 = arith.divf %652, %653 : vector<8x1xf32>
    %655 = vector.broadcast %654 : vector<8x1xf32> to vector<8x256xf32>
    %656 = arith.subf %650, %655 : vector<8x256xf32>
    %657 = arith.mulf %656, %656 : vector<8x256xf32>
    %cst_131 = arith.constant dense<0.000000e+00> : vector<8xf32>
    %658 = vector.multi_reduction <add>, %657, %cst_131 [1] : vector<8x256xf32> to vector<8xf32>
    %659 = vector.shape_cast %658 : vector<8xf32> to vector<8x1xf32>
    %cst_132 = arith.constant 2.560000e+02 : f32
    %660 = vector.broadcast %cst_132 : f32 to vector<8x1xf32>
    %661 = arith.divf %659, %660 : vector<8x1xf32>
    %cst_133 = arith.constant 9.99999974E-6 : f32
    %662 = vector.broadcast %cst_133 : f32 to vector<8x1xf32>
    %663 = arith.addf %661, %662 : vector<8x1xf32>
    %664 = math.rsqrt %663 : vector<8x1xf32>
    %665 = vector.broadcast %664 : vector<8x1xf32> to vector<8x256xf32>
    %666 = arith.mulf %656, %665 : vector<8x256xf32>
    %cst_134 = arith.constant 0.000000e+00 : f32
    %667 = vector.broadcast %cst_134 : f32 to vector<8x256xf32>
    %668 = arith.cmpf oge, %666, %667 : vector<8x256xf32>
    %cst_135 = arith.constant 2.000000e-01 : f32
    %669 = vector.broadcast %cst_135 : f32 to vector<8x256xf32>
    %670 = arith.mulf %669, %666 : vector<8x256xf32>
    %671 = arith.select %668, %666, %670 : vector<8x256xi1>, vector<8x256xf32>
    %c17_i32_136 = arith.constant 17 : i32
    %672 = tpu.dynamic_rotate %671 by %c17_i32_136 dim 1 : vector<8x256xf32>, i32 -> vector<8x256xf32>
    %673 = vector.extract_strided_slice %2 {offsets = [0, 0], sizes = [1, 256], strides = [1, 1]} : vector<9x256xf32> to vector<1x256xf32>
    %674 = vector.broadcast %673 : vector<1x256xf32> to vector<8x256xf32>
    %675 = arith.mulf %672, %674 : vector<8x256xf32>
    %c16_i32_137 = arith.constant 16 : i32
    %676 = tpu.dynamic_rotate %671 by %c16_i32_137 dim 1 : vector<8x256xf32>, i32 -> vector<8x256xf32>
    %677 = vector.extract_strided_slice %2 {offsets = [1, 0], sizes = [1, 256], strides = [1, 1]} : vector<9x256xf32> to vector<1x256xf32>
    %678 = vector.broadcast %677 : vector<1x256xf32> to vector<8x256xf32>
    %679 = arith.mulf %676, %678 : vector<8x256xf32>
    %c15_i32_138 = arith.constant 15 : i32
    %680 = tpu.dynamic_rotate %671 by %c15_i32_138 dim 1 : vector<8x256xf32>, i32 -> vector<8x256xf32>
    %681 = vector.extract_strided_slice %2 {offsets = [2, 0], sizes = [1, 256], strides = [1, 1]} : vector<9x256xf32> to vector<1x256xf32>
    %682 = vector.broadcast %681 : vector<1x256xf32> to vector<8x256xf32>
    %683 = arith.mulf %680, %682 : vector<8x256xf32>
    %c1_i32_139 = arith.constant 1 : i32
    %684 = tpu.dynamic_rotate %671 by %c1_i32_139 dim 1 : vector<8x256xf32>, i32 -> vector<8x256xf32>
    %685 = vector.extract_strided_slice %2 {offsets = [3, 0], sizes = [1, 256], strides = [1, 1]} : vector<9x256xf32> to vector<1x256xf32>
    %686 = vector.broadcast %685 : vector<1x256xf32> to vector<8x256xf32>
    %687 = arith.mulf %684, %686 : vector<8x256xf32>
    %c255_i32_140 = arith.constant 255 : i32
    %688 = tpu.dynamic_rotate %671 by %c255_i32_140 dim 1 : vector<8x256xf32>, i32 -> vector<8x256xf32>
    %689 = vector.extract_strided_slice %2 {offsets = [5, 0], sizes = [1, 256], strides = [1, 1]} : vector<9x256xf32> to vector<1x256xf32>
    %690 = vector.broadcast %689 : vector<1x256xf32> to vector<8x256xf32>
    %691 = arith.mulf %688, %690 : vector<8x256xf32>
    %c241_i32_141 = arith.constant 241 : i32
    %692 = tpu.dynamic_rotate %671 by %c241_i32_141 dim 1 : vector<8x256xf32>, i32 -> vector<8x256xf32>
    %693 = vector.extract_strided_slice %2 {offsets = [6, 0], sizes = [1, 256], strides = [1, 1]} : vector<9x256xf32> to vector<1x256xf32>
    %694 = vector.broadcast %693 : vector<1x256xf32> to vector<8x256xf32>
    %695 = arith.mulf %692, %694 : vector<8x256xf32>
    %c240_i32_142 = arith.constant 240 : i32
    %696 = tpu.dynamic_rotate %671 by %c240_i32_142 dim 1 : vector<8x256xf32>, i32 -> vector<8x256xf32>
    %697 = vector.extract_strided_slice %2 {offsets = [7, 0], sizes = [1, 256], strides = [1, 1]} : vector<9x256xf32> to vector<1x256xf32>
    %698 = vector.broadcast %697 : vector<1x256xf32> to vector<8x256xf32>
    %699 = arith.mulf %696, %698 : vector<8x256xf32>
    %c239_i32_143 = arith.constant 239 : i32
    %700 = tpu.dynamic_rotate %671 by %c239_i32_143 dim 1 : vector<8x256xf32>, i32 -> vector<8x256xf32>
    %701 = vector.extract_strided_slice %2 {offsets = [8, 0], sizes = [1, 256], strides = [1, 1]} : vector<9x256xf32> to vector<1x256xf32>
    %702 = vector.broadcast %701 : vector<1x256xf32> to vector<8x256xf32>
    %703 = arith.mulf %700, %702 : vector<8x256xf32>
    %704 = tpu.concatenate %675, %679, %683, %687, %671, %691, %695, %699, %703 in 0 : vector<8x256xf32>, vector<8x256xf32>, vector<8x256xf32>, vector<8x256xf32>, vector<8x256xf32>, vector<8x256xf32>, vector<8x256xf32>, vector<8x256xf32>, vector<8x256xf32> -> vector<72x256xf32>
    %705 = arith.truncf %704 : vector<72x256xf32> to vector<72x256xbf16>
    %c0_144 = arith.constant 0 : index
    %c0_145 = arith.constant 0 : index
    %706 = vector.load %arg20[%c0_144, %c0_145] : memref<8x72xbf16, #tpu.memory_space<vmem>>, vector<8x72xbf16>
    %cst_146 = arith.constant dense<0.000000e+00> : vector<8x256xf32>
    %707 = tpu.matmul %706, %705, %cst_146 {dimension_numbers = #tpu.dot_dimension_numbers<[1], [0], [0], [1], [0, 0, 1, 1], [], []>} : vector<8x72xbf16>, vector<72x256xbf16>, vector<8x256xf32> -> vector<8x256xf32>
    %cst_147 = arith.constant dense<0.000000e+00> : vector<8xf32>
    %708 = vector.multi_reduction <add>, %707, %cst_147 [1] : vector<8x256xf32> to vector<8xf32>
    %709 = vector.shape_cast %708 : vector<8xf32> to vector<8x1xf32>
    %cst_148 = arith.constant 2.560000e+02 : f32
    %710 = vector.broadcast %cst_148 : f32 to vector<8x1xf32>
    %711 = arith.divf %709, %710 : vector<8x1xf32>
    %712 = vector.broadcast %711 : vector<8x1xf32> to vector<8x256xf32>
    %713 = arith.subf %707, %712 : vector<8x256xf32>
    %714 = arith.mulf %713, %713 : vector<8x256xf32>
    %cst_149 = arith.constant dense<0.000000e+00> : vector<8xf32>
    %715 = vector.multi_reduction <add>, %714, %cst_149 [1] : vector<8x256xf32> to vector<8xf32>
    %716 = vector.shape_cast %715 : vector<8xf32> to vector<8x1xf32>
    %cst_150 = arith.constant 2.560000e+02 : f32
    %717 = vector.broadcast %cst_150 : f32 to vector<8x1xf32>
    %718 = arith.divf %716, %717 : vector<8x1xf32>
    %cst_151 = arith.constant 9.99999974E-6 : f32
    %719 = vector.broadcast %cst_151 : f32 to vector<8x1xf32>
    %720 = arith.addf %718, %719 : vector<8x1xf32>
    %721 = math.rsqrt %720 : vector<8x1xf32>
    %722 = vector.broadcast %721 : vector<8x1xf32> to vector<8x256xf32>
    %723 = arith.mulf %713, %722 : vector<8x256xf32>
    %cst_152 = arith.constant 0.000000e+00 : f32
    %724 = vector.broadcast %cst_152 : f32 to vector<8x256xf32>
    %725 = arith.cmpf oge, %723, %724 : vector<8x256xf32>
    %cst_153 = arith.constant 2.000000e-01 : f32
    %726 = vector.broadcast %cst_153 : f32 to vector<8x256xf32>
    %727 = arith.mulf %726, %723 : vector<8x256xf32>
    %728 = arith.select %725, %723, %727 : vector<8x256xi1>, vector<8x256xf32>
    %c0_154 = arith.constant 0 : index
    %c0_155 = arith.constant 0 : index
    %729 = vector.load %arg21[%c0_154, %c0_155] : memref<3x8xbf16, #tpu.memory_space<vmem>>, vector<3x8xbf16>
    %730 = arith.truncf %728 : vector<8x256xf32> to vector<8x256xbf16>
    %cst_156 = arith.constant dense<0.000000e+00> : vector<3x256xf32>
    %731 = tpu.matmul %729, %730, %cst_156 {dimension_numbers = #tpu.dot_dimension_numbers<[1], [0], [0], [1], [0, 0, 1, 1], [], []>} : vector<3x8xbf16>, vector<8x256xbf16>, vector<3x256xf32> -> vector<3x256xf32>
    %c0_157 = arith.constant 0 : index
    %c0_158 = arith.constant 0 : index
    %732 = vector.load %arg22[%c0_157, %c0_158] : memref<3x1xf32, #tpu.memory_space<vmem>>, vector<3x1xf32>
    %733 = vector.broadcast %732 : vector<3x1xf32> to vector<3x256xf32>
    %734 = arith.addf %731, %733 : vector<3x256xf32>
    %c0_159 = arith.constant 0 : index
    %c0_160 = arith.constant 0 : index
    %c0_161 = arith.constant 0 : index
    %735 = vector.load %arg23[%c0_159, %c0_160, %c0_161] : memref<1x3x256xf32, #tpu.memory_space<vmem>>, vector<1x3x256xf32>
    %736 = vector.shape_cast %735 : vector<1x3x256xf32> to vector<3x256xf32>
    %737 = vector.shape_cast %734 : vector<3x256xf32> to vector<1x3x256xf32>
    tpu.vector_store %arg23[%c0_159, %c0_160, %c0_161], %737 {strides = array<i32>} : memref<1x3x256xf32, #tpu.memory_space<vmem>>, vector<1x3x256xf32>,
    return
  }
  func.func @transform_0(%arg0: i32) -> (i32, i32, i32) {
    %c0_i32 = arith.constant 0 : i32
    %c0_i32_0 = arith.constant 0 : i32
    %c0_i32_1 = arith.constant 0 : i32
    return %arg0, %c0_i32, %c0_i32_0 : i32, i32, i32
  }
  func.func @transform_1(%arg0: i32) -> (i32, i32) {
    %c0_i32 = arith.constant 0 : i32
    %c0_i32_0 = arith.constant 0 : i32
    %c0_i32_1 = arith.constant 0 : i32
    return %c0_i32, %c0_i32_0 : i32, i32
  }
  func.func @transform_2(%arg0: i32) -> (i32, i32) {
    %c0_i32 = arith.constant 0 : i32
    %c0_i32_0 = arith.constant 0 : i32
    %c0_i32_1 = arith.constant 0 : i32
    return %c0_i32, %c0_i32_0 : i32, i32
  }
  func.func @transform_3(%arg0: i32) -> (i32, i32) {
    %c0_i32 = arith.constant 0 : i32
    %c0_i32_0 = arith.constant 0 : i32
    %c0_i32_1 = arith.constant 0 : i32
    return %c0_i32, %c0_i32_0 : i32, i32
  }
  func.func @transform_4(%arg0: i32) -> (i32, i32) {
    %c0_i32 = arith.constant 0 : i32
    %c0_i32_0 = arith.constant 0 : i32
    %c0_i32_1 = arith.constant 0 : i32
    return %c0_i32, %c0_i32_0 : i32, i32
  }
  func.func @transform_5(%arg0: i32) -> (i32, i32) {
    %c0_i32 = arith.constant 0 : i32
    %c0_i32_0 = arith.constant 0 : i32
    %c0_i32_1 = arith.constant 0 : i32
    return %c0_i32, %c0_i32_0 : i32, i32
  }
  func.func @transform_6(%arg0: i32) -> (i32, i32) {
    %c0_i32 = arith.constant 0 : i32
    %c0_i32_0 = arith.constant 0 : i32
    %c0_i32_1 = arith.constant 0 : i32
    return %c0_i32, %c0_i32_0 : i32, i32
  }
  func.func @transform_7(%arg0: i32) -> (i32, i32) {
    %c0_i32 = arith.constant 0 : i32
    %c0_i32_0 = arith.constant 0 : i32
    %c0_i32_1 = arith.constant 0 : i32
    return %c0_i32, %c0_i32_0 : i32, i32
  }
  func.func @transform_8(%arg0: i32) -> (i32, i32) {
    %c0_i32 = arith.constant 0 : i32
    %c0_i32_0 = arith.constant 0 : i32
    %c0_i32_1 = arith.constant 0 : i32
    return %c0_i32, %c0_i32_0 : i32, i32
  }
  func.func @transform_9(%arg0: i32) -> (i32, i32) {
    %c0_i32 = arith.constant 0 : i32
    %c0_i32_0 = arith.constant 0 : i32
    %c0_i32_1 = arith.constant 0 : i32
    return %c0_i32, %c0_i32_0 : i32, i32
  }
  func.func @transform_10(%arg0: i32) -> (i32, i32) {
    %c0_i32 = arith.constant 0 : i32
    %c0_i32_0 = arith.constant 0 : i32
    %c0_i32_1 = arith.constant 0 : i32
    return %c0_i32, %c0_i32_0 : i32, i32
  }
  func.func @transform_11(%arg0: i32) -> (i32, i32) {
    %c0_i32 = arith.constant 0 : i32
    %c0_i32_0 = arith.constant 0 : i32
    %c0_i32_1 = arith.constant 0 : i32
    return %c0_i32, %c0_i32_0 : i32, i32
  }
  func.func @transform_12(%arg0: i32) -> (i32, i32) {
    %c0_i32 = arith.constant 0 : i32
    %c0_i32_0 = arith.constant 0 : i32
    %c0_i32_1 = arith.constant 0 : i32
    return %c0_i32, %c0_i32_0 : i32, i32
  }
  func.func @transform_13(%arg0: i32) -> (i32, i32) {
    %c0_i32 = arith.constant 0 : i32
    %c0_i32_0 = arith.constant 0 : i32
    %c0_i32_1 = arith.constant 0 : i32
    return %c0_i32, %c0_i32_0 : i32, i32
  }
  func.func @transform_14(%arg0: i32) -> (i32, i32) {
    %c0_i32 = arith.constant 0 : i32
    %c0_i32_0 = arith.constant 0 : i32
    %c0_i32_1 = arith.constant 0 : i32
    return %c0_i32, %c0_i32_0 : i32, i32
  }
  func.func @transform_15(%arg0: i32) -> (i32, i32) {
    %c0_i32 = arith.constant 0 : i32
    %c0_i32_0 = arith.constant 0 : i32
    %c0_i32_1 = arith.constant 0 : i32
    return %c0_i32, %c0_i32_0 : i32, i32
  }
  func.func @transform_16(%arg0: i32) -> (i32, i32) {
    %c0_i32 = arith.constant 0 : i32
    %c0_i32_0 = arith.constant 0 : i32
    %c0_i32_1 = arith.constant 0 : i32
    return %c0_i32, %c0_i32_0 : i32, i32
  }
  func.func @transform_17(%arg0: i32) -> (i32, i32) {
    %c0_i32 = arith.constant 0 : i32
    %c0_i32_0 = arith.constant 0 : i32
    %c0_i32_1 = arith.constant 0 : i32
    return %c0_i32, %c0_i32_0 : i32, i32
  }
  func.func @transform_18(%arg0: i32) -> (i32, i32) {
    %c0_i32 = arith.constant 0 : i32
    %c0_i32_0 = arith.constant 0 : i32
    %c0_i32_1 = arith.constant 0 : i32
    return %c0_i32, %c0_i32_0 : i32, i32
  }
  func.func @transform_19(%arg0: i32) -> (i32, i32) {
    %c0_i32 = arith.constant 0 : i32
    %c0_i32_0 = arith.constant 0 : i32
    %c0_i32_1 = arith.constant 0 : i32
    return %c0_i32, %c0_i32_0 : i32, i32
  }
  func.func @transform_20(%arg0: i32) -> (i32, i32) {
    %c0_i32 = arith.constant 0 : i32
    %c0_i32_0 = arith.constant 0 : i32
    %c0_i32_1 = arith.constant 0 : i32
    return %c0_i32, %c0_i32_0 : i32, i32
  }
  func.func @transform_21(%arg0: i32) -> (i32, i32) {
    %c0_i32 = arith.constant 0 : i32
    %c0_i32_0 = arith.constant 0 : i32
    %c0_i32_1 = arith.constant 0 : i32
    return %c0_i32, %c0_i32_0 : i32, i32
  }
  func.func @transform_22(%arg0: i32) -> (i32, i32, i32) {
    %c0_i32 = arith.constant 0 : i32
    %c0_i32_0 = arith.constant 0 : i32
    %c0_i32_1 = arith.constant 0 : i32
    return %arg0, %c0_i32, %c0_i32_0 : i32, i32, i32
  }
}

</mosaic_0001>

<bundles_post_ra>
// kernel: unet_forward.1
= control target key start
LH: loop header
LB: loop body
LE: loop exit
PB: predicated region body
PF: predicated region fallthrough
CT: control target
= control target key end

     0   :  { %s7425_s0 = inlined_call_operand.vmem [shape: f32[2,5,256], index: 0, kind: input, shape index: {}]   ;;  %s7426_s1 = inlined_call_operand.hbm [shape: f32[9,256], index: 1, kind: input, shape index: {}]   ;;  %s7427_s2 = inlined_call_operand.hbm [shape: f32[9,64], index: 2, kind: input, shape index: {}]   ;;  %s7428_s3 = inlined_call_operand.hbm [shape: f32[9,16], index: 3, kind: input, shape index: {}]   ;;  %s7429_s4 = inlined_call_operand.vmem [shape: bf16[256,64], index: 4, kind: input, shape index: {}]   ;;  %s7430_s5 = inlined_call_operand.hbm [shape: bf16[64,16], index: 5, kind: input, shape index: {}]   ;;  %s7431_s6 = inlined_call_operand.vmem [shape: bf16[16,64], index: 6, kind: input, shape index: {}]   ;;  %s7432_s7 = inlined_call_operand.vmem [shape: bf16[64,256], index: 7, kind: input, shape index: {}]   ;;  %s7433_s8 = inlined_call_operand.hbm [shape: bf16[8,45], index: 8, kind: input, shape index: {}]   ;;  %s7434_s9 = inlined_call_operand.hbm [shape: bf16[8,72], index: 9, kind: input, shape index: {}]   ;;  %s7435_s10 = inlined_call_operand.hbm [shape: bf16[16,72], index: 10, kind: input, shape index: {}]   ;;  %s7436_s11 = inlined_call_operand.vmem [shape: bf16[16,144], index: 11, kind: input, shape index: {}]   ;;  %s7437_s12 = inlined_call_operand.hbm [shape: bf16[32,144], index: 12, kind: input, shape index: {}]   ;;  %s7438_s13 = inlined_call_operand.vmem [shape: bf16[32,288], index: 13, kind: input, shape index: {}]   ;;  %s7439_s14 = inlined_call_operand.vmem [shape: bf16[64,32], index: 14, kind: input, shape index: {}]   ;;  %s7440_s15 = inlined_call_operand.hbm [shape: bf16[16,288], index: 15, kind: input, shape index: {}]   ;;  %s7441_s16 = inlined_call_operand.hbm [shape: bf16[16,144], index: 16, kind: input, shape index: {}]   ;;  %s7442_s17 = inlined_call_operand.vmem [shape: bf16[32,16], index: 17, kind: input, shape index: {}]   ;;  %s7443_s18 = inlined_call_operand.hbm [shape: bf16[8,144], index: 18, kind: input, shape index: {}]   ;;  %s7444_s19 = inlined_call_operand.hbm [shape: bf16[8,72], index: 19, kind: input, shape index: {}]   ;;  %s7445_s20 = inlined_call_operand.vmem [shape: bf16[3,8], index: 20, kind: input, shape index: {}]   ;;  %s7446_s21 = inlined_call_operand.vmem [shape: f32[3,1], index: 21, kind: input, shape index: {}]   ;;  %s7447_s22 = inlined_call_operand.vmem [shape: f32[2,3,256], index: 22, kind: output, shape index: {}]  }
   0x1   :  { %7573 = sst [smem:[#allocation70_spill]] %s7425_s0 }
   0x2   :  { %7574 = sst [smem:[#allocation71_spill]] %s7426_s1 }
   0x3   :  { %7575 = sst [smem:[#allocation72_spill]] %s7427_s2 }
   0x4   :  { %7576 = sst [smem:[#allocation73_spill]] %s7428_s3 }
   0x5   :  { %7577 = sst [smem:[#allocation74_spill]] %s7429_s4 }
   0x6   :  { %7578 = sst [smem:[#allocation75_spill]] %s7430_s5 }
   0x7   :  { %7579 = sst [smem:[#allocation76_spill]] %s7431_s6 }
   0x8   :  { %7580 = sst [smem:[#allocation77_spill]] %s7434_s9 }
   0x9   :  { %7581 = sst [smem:[#allocation78_spill]] %s7437_s12 }
   0xa   :  { %7582 = sst [smem:[#allocation79_spill]] %s7445_s20 }
   0xb   :  { %7583 = sst [smem:[#allocation80_spill]] %s7446_s21 }
   0xc   :  { %7584 = sst [smem:[#allocation81_spill]] %s7447_s22 }
   0xd   :  { %27 = vsyncpa [#allocation3], 0 }
   0xe   :  { %28 = vsyncpa [#allocation5], 0 }
   0xf   :  { %29 = vsyncpa [#allocation8], 0 }
  0x10   :  { %30 = vsyncpa [#allocation11], 0 }
  0x11   :  { %31 = vsyncpa [#allocation14], 0 }
  0x12   :  { %32 = vsyncpa [#allocation17], 0 }
  0x13   :  { %33 = vsyncpa [#allocation20], 0  ;;  %s5421_s3 = smov 0  }
  0x14 LB: > { %7585 = sst [smem:[#allocation28_spill]] %s5245_s3  ;;  %s5430_s0 = sadd.s32 4294967295, %s5245_s3   ;;  %s5245_s3 = sphi %s5421_s3, %s39_s3  }
  0x15   : > { %s7586_s30 = sld [smem:[#allocation72_spill]]  ;;  %p4273_p0 = scmp.ge.s32.totalorder %s5245_s3, 1 }
  0x16   : > { %p537_p1 = scmp.lt.s32.totalorder %s5245_s3, 3  ;;  %p4691_p2 = scmp.eq.s32.totalorder %s5430_s0, 0 }
  0x17   : > { %s5247_s1 = smov [#allocation4]   ;;  %s7588_s25 = sld [smem:[#allocation75_spill]] }
  0x18   : > { %p5435_p3 = pnand %p4273_p0, %p537_p1  ;;  %s564_s5 = sshll.u32 %s5247_s1, 4  ;;  %s565_s5 = int_to_ptr.vmem [resolvable:$true] %s564_s5 }
  0x19   : > { %s5248_s27 = smov [#allocation7]   ;;  %s7450_s29 = smov 128  }
  0x1a   : > { %p4654_p4 = pneg %p5435_p3  ;;  %s595_s28 = sshll.u32 %s5248_s27, 4  ;;  %s596_s28 = int_to_ptr.vmem [resolvable:$true] %s595_s28 }
  0x1b   : > { %s562_s4 = sshll.u32 %s7586_s30, 4  ;;  %s7452_s30 = smov 8   ;;  %s563_s4 = int_to_ptr.hbm [resolvable:$true] %s562_s4 }
  0x1c   : > { %p5446_p5 = pnand %p4691_p2, %p4654_p4  ;;  %s7590_s9 = sld [smem:[#allocation77_spill]] }
  0x1d   : > { %s593_s26 = sshll.u32 %s7588_s25, 4  ;;  %s7454_s25 = smov 64   ;;  %s594_s26 = int_to_ptr.hbm [resolvable:$true] %s593_s26 }
  0x1e   : > { %4660 = dma.hbm_to_vmem [thread:$0]  (!%p5446_p5), %s563_s4, 256, %s565_s5, [#allocation5], %s7450_s29, %s7450_s29, %s7452_s30  }
  0x1f   : > { %s7455_s3 = smov 4   ;;  %s5253_s27 = smov [#allocation10]  }
  0x20   : > { %4666 = dma.hbm_to_vmem [thread:$0]  (!%p5446_p5), %s594_s26, 512, %s596_s28, [#allocation8], %s7454_s25, %s7454_s25, %s7455_s3  }
  0x21   : > { %s628_s22 = sshll.u32 %s5253_s27, 4  ;;  %s7591_s12 = sld [smem:[#allocation78_spill]]  ;;  %s629_s22 = int_to_ptr.vmem [resolvable:$true] %s628_s22 }
  0x22   : > { %s626_s6 = sshll.u32 %s7590_s9, 4  ;;  %s688_s24 = sshll.u32 %s7441_s16, 4  ;;  %s627_s6 = int_to_ptr.hbm [resolvable:$true] %s626_s6  ;;  %s689_s24 = int_to_ptr.hbm [resolvable:$true] %s688_s24 }
  0x23   : > { %4672 = dma.hbm_to_vmem [thread:$0]  (!%p5446_p5), %s627_s6, 64, %s629_s22, [#allocation11]  }
  0x24   : > { %s5254_s29 = smov [#allocation13]   ;;  %s7592_s26 = smov 8  }
  0x25   : > { %s656_s30 = sshll.u32 %s5254_s29, 4  ;;  %s7593_s28 = smov 128   ;;  %s657_s30 = int_to_ptr.vmem [resolvable:$true] %s656_s30 }
  0x26   : > { %s5255_s20 = smov [#allocation16]   ;;  %s7594_s3 = sld [smem:[#allocation71_spill]] }
  0x27   : > { %s654_s4 = sshll.u32 %s7591_s12, 4  ;;  %s690_s21 = sshll.u32 %s5255_s20, 4  ;;  %s655_s4 = int_to_ptr.hbm [resolvable:$true] %s654_s4  ;;  %s691_s21 = int_to_ptr.vmem [resolvable:$true] %s690_s21 }
  0x28   : > { %4678 = dma.hbm_to_vmem [thread:$0]  (!%p5446_p5), %s655_s4, 512, %s657_s30, [#allocation14], %s7593_s28, %s7593_s28, %s7592_s26  }
  0x29   : > { %4684 = dma.hbm_to_vmem [thread:$0]  (!%p5446_p5), %s689_s24, 256, %s691_s21, [#allocation17], %s7593_s28, %s7593_s28, %s7592_s26  }
  0x2a   : > { %s5256_s29 = smov [#allocation2]   ;;  %s7595_s30 = sld [smem:[#allocation73_spill]] }
  0x2b   : > { %s550_s6 = sshll.u32 %s5256_s29, 4  ;;  %s5257_s20 = smov 256   ;;  %s551_s6 = int_to_ptr.vmem [resolvable:$true] %s550_s6 }
  0x2c   : > { %s548_s22 = sshll.u32 %s7594_s3, 4  ;;  %s5258_s9 = smov 16   ;;  %s549_s22 = int_to_ptr.hbm [resolvable:$true] %s548_s22 }
  0x2d   : > { %4657 = dma.hbm_to_vmem [thread:$0]  (!%p5446_p5), %s549_s22, 512, %s551_s6, [#allocation3], %s5257_s20, %s5257_s20, %s5258_s9  }
  0x2e   : > { %s5259_s3 = smov [#allocation6]   ;;  %s614_s24 = sshll.u32 %s7433_s8, 4  ;;  %s615_s24 = int_to_ptr.hbm [resolvable:$true] %s614_s24 }
  0x2f   : > { %s578_s25 = sshll.u32 %s5259_s3, 4  ;;  %s637_s5 = sshll.u32 %s7435_s10, 4  ;;  %s579_s25 = int_to_ptr.vmem [resolvable:$true] %s578_s25  ;;  %s638_s5 = int_to_ptr.hbm [resolvable:$true] %s637_s5 }
  0x30   : > { %s576_s4 = sshll.u32 %s7595_s30, 4  ;;  %s5260_s9 = smov [#allocation9]   ;;  %s577_s4 = int_to_ptr.hbm [resolvable:$true] %s576_s4 }
  0x31   : > { %4663 = dma.hbm_to_vmem [thread:$0]  (!%p5446_p5), %s577_s4, 256, %s579_s25, [#allocation5], %s7593_s28, %s7593_s28, %s7592_s26  }
  0x32   : > { %s616_s22 = sshll.u32 %s5260_s9, 4  ;;  %s5261_s12 = smov [#allocation12]   ;;  %s617_s22 = int_to_ptr.vmem [resolvable:$true] %s616_s22 }
  0x33   : > { %4669 = dma.hbm_to_vmem [thread:$0]  (!%p5446_p5), %s615_s24, 64, %s617_s22, [#allocation8]  }
  0x34   : > { %s639_s6 = sshll.u32 %s5261_s12, 4  ;;  %s674_s20 = sshll.u32 %s7440_s15, 4  ;;  %s640_s6 = int_to_ptr.vmem [resolvable:$true] %s639_s6  ;;  %s675_s20 = int_to_ptr.hbm [resolvable:$true] %s674_s20 }
  0x35   : > { %s7596_s26 = smov 4   ;;  %s7597_s28 = smov 64  }
  0x36   : > { %4675 = dma.hbm_to_vmem [thread:$0]  (!%p5446_p5), %s638_s5, 128, %s640_s6, [#allocation11], %s7597_s28, %s7597_s28, %s7596_s26  }
  0x37   : > { %s5262_s4 = smov [#allocation15]   ;;  %s706_s24 = sshll.u32 %s7443_s18, 4  ;;  %s707_s24 = int_to_ptr.hbm [resolvable:$true] %s706_s24 }
  0x38   : > { %s676_s3 = sshll.u32 %s5262_s4, 4  ;;  %s5263_s21 = smov 192   ;;  %s677_s3 = int_to_ptr.vmem [resolvable:$true] %s676_s3 }
  0x39   : > { %s5264_s29 = smov 12   ;;  %s5265_s9 = smov [#allocation18]  }
  0x3a   : > { %4681 = dma.hbm_to_vmem [thread:$0]  (!%p5446_p5), %s675_s20, 384, %s677_s3, [#allocation14], %s5263_s21, %s5263_s21, %s5264_s29  }
  0x3b   : > { %s708_s22 = sshll.u32 %s5265_s9, 4  ;;  %s718_s30 = sshll.u32 %s7444_s19, 4  ;;  %s709_s22 = int_to_ptr.vmem [resolvable:$true] %s708_s22  ;;  %s719_s30 = int_to_ptr.hbm [resolvable:$true] %s718_s30 }
  0x3c   : > { %4687 = dma.hbm_to_vmem [thread:$0]  (!%p5446_p5), %s707_s24, 128, %s709_s22, [#allocation17]  }
  0x3d   : > { %s5266_s5 = smov [#allocation19]   ;;  %747 = sbr.rel (%p5435_p3) target bundleno = 7886 (0x1ece), region = 108 }
  0x3e   : > { %s720_s6 = sshll.u32 %s5266_s5, 4  ;;  %s721_s6 = int_to_ptr.vmem [resolvable:$true] %s720_s6 }
  0x3f   : > { %4690 = dma.hbm_to_vmem [thread:$0]  (!%p5446_p5), %s719_s30, 64, %s721_s6, [#allocation20]  }
  0x42   : > { %5216 = dma.done.wait (%p4691_p2), [#allocation3], 512  }
  0x43   : > { %5218 = vsyncadd (%p4691_p2), [#allocation3], 4294966784 }
  0x44   : > { %5220 = dma.done.wait (%p4691_p2), [#allocation5], 512  }
  0x45   : > { %5222 = vsyncadd (%p4691_p2), [#allocation5], 4294966784 }
  0x46   : > { %5224 = dma.done.wait (%p4691_p2), [#allocation8], 576  }
  0x47   : > { %5226 = vsyncadd (%p4691_p2), [#allocation8], 4294966720 }
  0x48   : > { %5228 = dma.done.wait (%p4691_p2), [#allocation11], 192  }
  0x49   : > { %5230 = vsyncadd (%p4691_p2), [#allocation11], 4294967104 }
  0x4a   : > { %5232 = dma.done.wait (%p4691_p2), [#allocation14], 896  }
  0x4b   : > { %5234 = vsyncadd (%p4691_p2), [#allocation14], 4294966400 }
  0x4c   : > { %5236 = dma.done.wait (%p4691_p2), [#allocation17], 384  }
  0x4d   : > { %5238 = vsyncadd (%p4691_p2), [#allocation17], 4294966912 }
  0x4e   : > { %5240 = dma.done.wait (%p4691_p2), [#allocation20], 64  }
  0x4f   : > { %5242 = vsyncadd (%p4691_p2), [#allocation20], 4294967232  ;;  %p865_p6 = scmp.lt.s32.totalorder %s5430_s0, 1  ;;  %s7598_s26 = sld [smem:[#allocation70_spill]]  ;;  %v890_v3 = vlaneseq  ;;  %v5598_v7 = vld [vmem:[#allocation2] sm:$0xff]  ;;  %v5600_v8 = vld [vmem:[#allocation2 + $0x8] sm:$0xff] }
  0x50   : > { %s7460_s4 = smov 112   ;;  %s7571_s3 = smov 113   ;;  %v5604_v10 = vperm.slane %v5598_v7, 7  ;;  %v5607_v11 = vperm.slane %v5600_v8, 7  ;;  %v5612_v12 = vperm.slane %v5598_v7, 6  ;;  %v5615_v13 = vperm.slane %v5600_v8, 6 }
  0x51   : > { %s7802_s0 = smov (!%p865_p6, %s5430_s0), 1  ;;  %s7456_s25 = smov 111   ;;  %v5596_v6 = vand.u32 127, %v890_v3  ;;  %vm1033_vm3 = vcmask 1045504   ;;  %v5629_v22 = vld [vmem:[#allocation2 + $0x10] ss:$0 sm:$0xff] }
  0x52   : > { %s4551_s23 = sshll.u32 %s7802_s0, 4  ;;  %s5270_s27 = smov 127   ;;  %7600 = vst [vmem:[#allocation30_spill] sm:$0xff] %v5604_v10  ;;  %v5631_v23 = vld [vmem:[#allocation2 + $0x18] ss:$0 sm:$0xff]  ;;  %vm1024_vm4 = vcmask 1046528  }
  0x53   : > { %s5271_s24 = smov 1   ;;  %s7462_s21 = smov 16   ;;  %7599 = vst [vmem:[#allocation29_spill] sm:$0xff] %v5596_v6  ;;  %vm7465_vm0 = vcmp.lt.s32.totalorder %v5596_v6, 111  ;;  %vm7470_vm1 = vcmp.lt.s32.totalorder %v5596_v6, 112  ;;  %vm7469_vm2 = vcmp.lt.s32.totalorder %v5596_v6, 113 }
  0x54   : > { %s7569_s29 = smov 15   ;;  %s7458_s9 = smov 17   ;;  %7601 = vst [vmem:[#allocation31_spill] sm:$0xff] %v5607_v11  ;;  %vm1036_vm5 = vcmask 1042432   ;;  %v5275_v28 = vmov 65535   ;;  %vm7467_vm6 = vcmp.lt.s32.totalorder %v5596_v6, 127 }
  0x55   : > { %s869_s28 = scalar_lea.vmem %s7598_s26, %s4551_s23  ;;  %7602 = vst [vmem:[#allocation32_spill] sm:$0xff] %v5612_v12  ;;  %v1050_v29 = vsel %vm1033_vm3, 4294967295, %v5275_v28  ;;  %v5643_v39 = vperm.slane %v5598_v7, 5  ;;  %v5646_v40 = vperm.slane %v5600_v8, 5  ;;  %vm7481_vm7 = vcmp.lt.s32.totalorder %v5596_v6, 1  ;;  %s7617_s1 = sld [smem:[#allocation74_spill]] }
  0x56   : > { %v5560_v0 = vld [vmem:[%s869_s28] sm:$0x1f]  ;;  %v5568_v1 = vld [vmem:[%s869_s28 + $0x8] sm:$0x1f]  ;;  %7603 = vst [vmem:[#allocation33_spill] sm:$0xff] %v5615_v13  ;;  %v1051_v37 = vsel %vm1024_vm4, %v1050_v29, 0 }
  0x57   : > { %954 = vrot.lane.b32.xlu1 %v5560_v0, %s7460_s4  ;;  %943 = vrot.lane.b32.xlu0 %v5560_v0, %s7571_s3  ;;  %7604 = vst [vmem:[#allocation34_spill] sm:$0xff] %v5643_v39  ;;  %v5656_v52 = vperm.slane %v5598_v7, 3  ;;  %v5659_v53 = vperm.slane %v5600_v8, 3  ;;  %v996_v56 = vrot.slane %v5560_v0, 4  ;;  %v997_v57 = vrot.slane %v5568_v1, 4  ;;  %s7477_s30 = smov 57  }
  0x58   : > { %965 = vrot.lane.b32.xlu2 %v5560_v0, %s7456_s25  ;;  %7605 = vst [vmem:[#allocation35_spill] sm:$0xff] %v5646_v40  ;;  %vm1030_vm8 = vcmask 1040384   ;;  %vm7464_vm9 = vcmask 1043456   ;;  %vm7480_vm10 = vcmp.lt.s32.totalorder %v5596_v6, 16  ;;  %vm7466_vm11 = vcmp.lt.s32.totalorder %v5596_v6, 15  ;;  %s7489_s5 = smov 121  }
  0x59   : > { %7606 = vst [vmem:[#allocation36_spill] sm:$0xff] %v5656_v52  ;;  %vm7479_vm12 = vcmp.lt.s32.totalorder %v5596_v6, 17  ;;  %vm1021_vm13 = vcmask 1041408   ;;  %vm1018_vm14 = vcmask 1044480   ;;  %vm1046_vm15 = vcmask 367616   ;;  %s7473_s6 = smov 119  }
  0x5a   : > { %7607 = vst [vmem:[#allocation37_spill] sm:$0xff] %v5659_v53  ;;  %s5280_s23 = smov 71   ;;  %s7483_s2 = smov 63  }
  0x5b   : > { %s7471_s20 = smov 55   ;;  %s5283_s26 = smov 65  }
  0x5c   : > { %s7493_s28 = smov 120   ;;  %s7487_s22 = smov 72  }
  0x5d   : > { %s7475_s12 = smov 9  }
  0x5f   : > { %956 = vrot.lane.b32.xlu1 %v5568_v1, %s7460_s4  ;;  %945 = vrot.lane.b32.xlu0 %v5568_v1, %s7571_s3 }
  0x60   : > { %967 = vrot.lane.b32.xlu2 %v5568_v1, %s7456_s25 }
  0x67   : > { %934 = vrot.lane.b32.xlu1 %v5568_v1, %s5270_s27  ;;  %932 = vrot.lane.b32.xlu0 %v5560_v0, %s5270_s27 }
  0x68   : > { %921 = vrot.lane.b32.xlu2 %v5560_v0, %s5271_s24 }
  0x6f   : > { %899 = vrot.lane.b32.xlu1 %v5560_v0, %s7462_s21  ;;  %923 = vrot.lane.b32.xlu0 %v5568_v1, %s5271_s24 }
  0x70   : > { %901 = vrot.lane.b32.xlu2 %v5568_v1, %s7462_s21 }
  0x77   : > { %912 = vrot.lane.b32.xlu1 %v5568_v1, %s7569_s29  ;;  %910 = vrot.lane.b32.xlu0 %v5560_v0, %s7569_s29 }
  0x78   : > { %886 = vrot.lane.b32.xlu2 %v5560_v0, %s7458_s9 }
  0x7f   : > { %888 = vrot.lane.b32.xlu0 %v5568_v1, %s7458_s9 }
  0xb2   : > { %v966_v2 = vpop.permute.xlu2 %965 }
  0xba   : > { %v968_v9 = vpop.permute.xlu2 %967 }
  0xbb   : > { %v970_v14 = vsel %vm7465_vm0, %v966_v2, %v968_v9  ;;  %v971_v15 = vsel %vm7465_vm0, %v968_v9, %v966_v2  ;;  %v5675_v9 = vperm.slane %v5600_v8, 2 }
  0xbc   : > { %v974_v34 = vmul.f32 %v5629_v22, %v970_v14  ;;  %v975_v35 = vmul.f32 %v5631_v23, %v971_v15 }
  0xbd   : > { %7609 = vst [vmem:[#allocation39_spill] sm:$0xff] %v5675_v9 }
  0xc2   : > { %v922_v51 = vpop.permute.xlu2 %921 }
  0xc9   : > { %v955_v4 = vpop.permute.xlu1 %954  ;;  %v944_v5 = vpop.permute.xlu0 %943 }
  0xca   : > { %v902_v1 = vpop.permute.xlu2 %901 }
  0xd1   : > { %v957_v16 = vpop.permute.xlu1 %956  ;;  %v946_v17 = vpop.permute.xlu0 %945 }
  0xd2   : > { %v959_v18 = vsel %vm7470_vm1, %v955_v4, %v957_v16  ;;  %v960_v19 = vsel %vm7470_vm1, %v957_v16, %v955_v4  ;;  %v948_v20 = vsel %vm7469_vm2, %v944_v5, %v946_v17  ;;  %v949_v21 = vsel %vm7469_vm2, %v946_v17, %v944_v5 }
  0xd3   : > { %v963_v24 = vmul.f32 %v5604_v10, %v959_v18  ;;  %v964_v25 = vmul.f32 %v5607_v11, %v960_v19  ;;  %v952_v26 = vmul.f32 %v5612_v12, %v948_v20  ;;  %v953_v27 = vmul.f32 %v5615_v13, %v949_v21 }
  0xd4   : > { %v5672_v5 = vperm.slane %v5598_v7, 2  ;;  %v5682_v18 = vperm.slane %v5598_v7, 1  ;;  %v5685_v19 = vperm.slane %v5600_v8, 1 }
  0xd5   : > { %v1014_v30 = vrot.slane %v963_v24, 5  ;;  %v1015_v31 = vrot.slane %v964_v25, 5  ;;  %v1008_v32 = vrot.slane %v952_v26, 2  ;;  %v1009_v33 = vrot.slane %v953_v27, 2 }
  0xd6   : > { %7608 = vst [vmem:[#allocation38_spill] sm:$0xff] %v5672_v5 }
  0xd7   : > { %v1037_v36 = vsel %vm1036_vm5, %v1008_v32, %v1014_v30  ;;  %v1038_v38 = vsel %vm1036_vm5, %v1009_v33, %v1015_v31  ;;  %7610 = vst [vmem:[#allocation40_spill] sm:$0xff] %v5682_v18 }
  0xd8   : > { %v1043_v41 = vpack.c.bf16 %v974_v34, %v1037_v36  ;;  %v1044_v42 = vpack.c.bf16 %v975_v35, %v1038_v38  ;;  %7611 = vst [vmem:[#allocation41_spill] sm:$0xff] %v5685_v19  ;;  %v887_v36 = vpop.permute.xlu2 %886  ;;  %v5704_v38 = vperm.slane %v5600_v8, 0 }
  0xd9   : > { %v935_v43 = vpop.permute.xlu1 %934  ;;  %v933_v44 = vpop.permute.xlu0 %932 }
  0xda   : > { %v937_v45 = vsel %vm7467_vm6, %v933_v44, %v935_v43  ;;  %v938_v46 = vsel %vm7467_vm6, %v935_v43, %v933_v44  ;;  %v1053_v47 = vand.u32 %v1051_v37, %v1043_v41  ;;  %v1056_v48 = vand.u32 %v1051_v37, %v1044_v42  ;;  %7613 = vst [vmem:[#allocation43_spill] sm:$0xff] %v5704_v38 }
  0xdb   : > { %v941_v49 = vmul.f32 %v5643_v39, %v937_v45  ;;  %v942_v50 = vmul.f32 %v5646_v40, %v938_v46  ;;  %v5701_v37 = vperm.slane %v5598_v7, 0 }
  0xdc   : > { %1063 = vmatpush.bf16.msra.mxu0 %v1053_v47  ;;  %1076 = vmatpush.bf16.msra.mxu1 %v1056_v48 }
  0xdd   : > { %v1002_v54 = vrot.slane %v941_v49, 7  ;;  %v1003_v55 = vrot.slane %v942_v50, 7  ;;  %7612 = vst [vmem:[#allocation42_spill] sm:$0xff] %v5701_v37 }
  0xdf   : > { %v1031_v2 = vsel %vm1030_vm8, %v996_v56, %v1002_v54  ;;  %v1032_v3 = vsel %vm1030_vm8, %v997_v57, %v1003_v55 }
  0xe0   : > { %v1034_v15 = vsel %vm1033_vm3, %v1031_v2, %v1008_v32  ;;  %v1035_v17 = vsel %vm1033_vm3, %v1032_v3, %v1009_v33 }
  0xe1   : > { %v900_v58 = vpop.permute.xlu1 %899  ;;  %v924_v59 = vpop.permute.xlu0 %923 }
  0xe2   : > { %v926_v60 = vsel %vm7481_vm7, %v922_v51, %v924_v59  ;;  %v927_v61 = vsel %vm7481_vm7, %v924_v59, %v922_v51  ;;  %v904_v24 = vsel %vm7480_vm10, %v900_v58, %v902_v1  ;;  %v905_v25 = vsel %vm7480_vm10, %v902_v1, %v900_v58 }
  0xe3   : > { %v930_v62 = vmul.f32 %v5656_v52, %v927_v61  ;;  %v931_v63 = vmul.f32 %v5659_v53, %v926_v60  ;;  %v908_v32 = vmul.f32 %v5682_v18, %v905_v25  ;;  %v909_v33 = vmul.f32 %v5685_v19, %v904_v24 }
  0xe5   : > { %v990_v4 = vrot.slane %v930_v62, 1  ;;  %v991_v0 = vrot.slane %v931_v63, 1  ;;  %v978_v41 = vrot.slane %v908_v32, 3  ;;  %v979_v42 = vrot.slane %v909_v33, 3 }
  0xe6   : > { %v5276_v62 = vmov 256.0  }
  0xe7   : > { %v1028_v14 = vsel %vm7464_vm9, %v990_v4, %v996_v56  ;;  %v1029_v16 = vsel %vm7464_vm9, %v991_v0, %v997_v57  ;;  %v1045_v56 = vld [vmem:[#allocation9] sm:$0xf]  ;;  %4802 = vrcp.f32 %v5276_v62 }
  0xe8   : > { %v1041_v20 = vpack.c.bf16 %v1034_v15, %v1028_v14  ;;  %v1042_v21 = vpack.c.bf16 %v1035_v17, %v1029_v16 }
  0xe9   : > { %v913_v26 = vpop.permute.xlu1 %912  ;;  %v911_v27 = vpop.permute.xlu0 %910 }
  0xea   : > { %v915_v28 = vsel %vm7466_vm11, %v911_v27, %v913_v26  ;;  %v916_v29 = vsel %vm7466_vm11, %v913_v26, %v911_v27  ;;  %1064 = vmatpush.bf16.msra.mxu0 %v1041_v20  ;;  %1077 = vmatpush.bf16.msra.mxu1 %v1042_v21 }
  0xeb   : > { %v919_v30 = vmul.f32 %v5672_v5, %v916_v29  ;;  %v920_v31 = vmul.f32 %v5675_v9, %v915_v28 }
  0xed   : > { %v984_v34 = vrot.slane %v919_v30, 6  ;;  %v985_v35 = vrot.slane %v920_v31, 6  ;;  %v4803_v63 = vpop.eup %4802 }
  0xee   : > { %v1088_v2 = vmul.f32 256.0, %v4803_v63  ;;  %vm1092_vm3 = vweird.f32 %v4803_v63 }
  0xef   : > { %v1022_v46 = vsel %vm1021_vm13, %v978_v41, %v984_v34  ;;  %v1023_v47 = vsel %vm1021_vm13, %v979_v42, %v985_v35 }
  0xf0   : > { %v1025_v8 = vsel %vm1024_vm4, %v1022_v46, %v990_v4  ;;  %v1026_v51 = vsel %vm1024_vm4, %v1023_v47, %v991_v0  ;;  %v1089_v3 = vsub.f32 1.0, %v1088_v2 }
  0xf1   : > { %v889_v43 = vpop.permute.xlu0 %888 }
  0xf2   : > { %v893_v44 = vsel %vm7479_vm12, %v887_v36, %v889_v43  ;;  %v894_v45 = vsel %vm7479_vm12, %v889_v43, %v887_v36  ;;  %v1090_v4 = vmul.f32 %v4803_v63, %v1089_v3 }
  0xf3   : > { %v897_v48 = vmul.f32 %v5701_v37, %v894_v45  ;;  %v898_v7 = vmul.f32 %v5704_v38, %v893_v44 }
  0xf4   : > { %v1091_v0 = vadd.f32 %v4803_v63, %v1090_v4 }
  0xf5   : > { %v1019_v49 = vsel %vm1018_vm14, %v897_v48, %v978_v41  ;;  %v1020_v50 = vsel %vm1018_vm14, %v898_v7, %v979_v42 }
  0xf6   : > { %v1039_v54 = vpack.c.bf16 %v1025_v8, %v1019_v49  ;;  %v1040_v55 = vpack.c.bf16 %v1026_v51, %v1020_v50  ;;  %v5714_v1 = vsel %vm1092_vm3, %v4803_v63, %v1091_v0 }
  0xf7   : > { %7614 = vst [vmem:[#allocation44_spill] sm:$0xff] %v5714_v1 }
  0xf8   : > { %1065 = vmatpush.bf16.msra.mxu0 %v1039_v54  ;;  %1078 = vmatpush.bf16.msra.mxu1 %v1040_v55 }
  0xfb   : > { %4304 = vmatmul.msk.bf16.vlgmr.msra.gmra.mxu0 %vm1046_vm15, %v1045_v56  ;;  %4305 = vmatmul.msk.bf16.vlgmr.msra.gmra.mxu1 %vm1046_vm15, %v1045_v56  ;;  %vm7468_vm15 = vcmask 588800  }
 0x178   : > { %v1067_v57 = vpop.f32.mrf.mxu0  ;;  %v1080_v58 = vpop.f32.mrf.mxu1 }
 0x179   : > { %v1084_v59 = vadd.f32 %v1080_v58, %v1067_v57 }
 0x17b   : > { %1085 = vadd.xlane.f32.xlu1 %v1084_v59 }
 0x180   : > { %v1069_v60 = vpop.f32.mrf.mxu0  ;;  %v1082_v61 = vpop.f32.mrf.mxu1 }
 0x1ee   : > { %v1086_v14 = vpop.xlane.xlu1 %1085 }
 0x1ef   : > { %v1094_v15 = vmul.f32 %v5714_v1, %v1086_v14 }
 0x1f1   : > { %v1095_v16 = vsub.f32 %v1067_v57, %v1094_v15  ;;  %v1096_v17 = vsub.f32 %v1080_v58, %v1094_v15 }
 0x1f3   : > { %v1097_v20 = vmul.f32 %v1095_v16, %v1095_v16  ;;  %v1098_v21 = vmul.f32 %v1096_v17, %v1096_v17 }
 0x1f5   : > { %v1099_v24 = vadd.f32 %v1098_v21, %v1097_v20 }
 0x1f7   : > { %1100 = vadd.xlane.f32.xlu2 %v1099_v24 }
 0x26a   : > { %v1101_v25 = vpop.xlane.xlu2 %1100 }
 0x26b   : > { %v1102_v26 = vmul.f32 %v1101_v25, %v5714_v1 }
 0x26d   : > { %v1103_v27 = vadd.f32 1e-05, %v1102_v26 }
 0x26f   : > { %4804 = vrsqrt.f32 %v1103_v27  ;;  %vm1110_vm5 = vweird.f32 %v1103_v27 }
 0x275   : > { %v4805_v28 = vpop.eup %4804 }
 0x276   : > { %v1105_v29 = vmul.f32 %v4805_v28, %v1103_v27  ;;  %vm1111_vm4 = vweird.f32 %v4805_v28 }
 0x277   : > { %vm1112_vm8 = vmor %vm1110_vm5, %vm1111_vm4 }
 0x278   : > { %v1106_v30 = vmul.f32 %v4805_v28, %v1105_v29 }
 0x27a   : > { %v1107_v31 = vmul.f32 0.5, %v1106_v30 }
 0x27c   : > { %v1108_v32 = vsub.f32 1.5, %v1107_v31 }
 0x27e   : > { %v1109_v33 = vmul.f32 %v4805_v28, %v1108_v32 }
 0x280   : > { %v1113_v34 = vsel %vm1112_vm8, %v4805_v28, %v1109_v33 }
 0x281   : > { %v1114_v35 = vmul.f32 %v1113_v34, %v1095_v16  ;;  %v1115_v36 = vmul.f32 %v1113_v34, %v1096_v17 }
 0x283   : > { %vm1116_vm13 = vcmp.ge.f32.partialorder %v1114_v35, 0.0  ;;  %vm1117_vm14 = vcmp.ge.f32.partialorder %v1115_v36, 0.0  ;;  %v1118_v41 = vmul.f32 0.2, %v1114_v35  ;;  %v1119_v42 = vmul.f32 0.2, %v1115_v36 }
 0x285   : > { %v1120_v43 = vsel %vm1116_vm13, %v1114_v35, %v1118_v41  ;;  %v1121_v44 = vsel %vm1117_vm14, %v1115_v36, %v1119_v42  ;;  %vm7482_vm14 = vcmask 449536  }
 0x286   : > { %1172 = vrot.lane.b32.xlu2 %v1121_v44, %s7460_s4  ;;  %1154 = vrot.lane.b32.xlu1 %v1120_v43, %s5270_s27 }
 0x287   : > { %1178 = vrot.lane.b32.xlu0 %v1120_v43, %s7456_s25 }
 0x28e   : > { %1146 = vrot.lane.b32.xlu2 %v1120_v43, %s5271_s24  ;;  %1148 = vrot.lane.b32.xlu1 %v1121_v44, %s5271_s24 }
 0x28f   : > { %1180 = vrot.lane.b32.xlu0 %v1121_v44, %s7456_s25  ;;  %s7495_s25 = smov 56  }
 0x296   : > { %1124 = vrot.lane.b32.xlu2 %v1121_v44, %s7458_s9  ;;  %1130 = vrot.lane.b32.xlu1 %v1120_v43, %s7462_s21 }
 0x297   : > { %1162 = vrot.lane.b32.xlu0 %v1120_v43, %s7571_s3 }
 0x29f   : > { %1164 = vrot.lane.b32.xlu0 %v1121_v44, %s7571_s3 }
 0x2a7   : > { %1170 = vrot.lane.b32.xlu0 %v1120_v43, %s7460_s4 }
 0x2af   : > { %1156 = vrot.lane.b32.xlu0 %v1121_v44, %s5270_s27 }
 0x2b7   : > { %1138 = vrot.lane.b32.xlu0 %v1120_v43, %s7569_s29 }
 0x2bf   : > { %1140 = vrot.lane.b32.xlu0 %v1121_v44, %s7569_s29 }
 0x2c7   : > { %1122 = vrot.lane.b32.xlu0 %v1120_v43, %s7458_s9  ;;  %s7497_s9 = smov 7  }
 0x2cf   : > { %1132 = vrot.lane.b32.xlu0 %v1121_v44, %s7462_s21  ;;  %s7491_s21 = smov 8  }
 0x2e0   : > { %v1173_v59 = vpop.permute.xlu2 %1172 }
 0x2e8   : > { %v1147_v27 = vpop.permute.xlu2 %1146 }
 0x2f8   : > { %v1155_v0 = vpop.permute.xlu1 %1154 }
 0x2f9   : > { %v1179_v45 = vpop.permute.xlu0 %1178 }
 0x300   : > { %v1149_v26 = vpop.permute.xlu1 %1148 }
 0x301   : > { %v1181_v46 = vpop.permute.xlu0 %1180  ;;  %v1150_v28 = vsel %vm7481_vm7, %v1147_v27, %v1149_v26  ;;  %v1151_v29 = vsel %vm7481_vm7, %v1149_v26, %v1147_v27 }
 0x302   : > { %v1182_v47 = vsel %vm7465_vm0, %v1179_v45, %v1181_v46  ;;  %v1183_v48 = vsel %vm7465_vm0, %v1181_v46, %v1179_v45  ;;  %v1152_v34 = vmul.f32 %v1151_v29, %v5656_v52  ;;  %v1153_v36 = vmul.f32 %v1150_v28, %v5659_v53 }
 0x303   : > { %v1184_v7 = vmul.f32 %v5629_v22, %v1182_v47  ;;  %v1185_v49 = vmul.f32 %v5631_v23, %v1183_v48  ;;  %vm1453_vm0 = vcmask 64512  }
 0x305   : > { %v1194_v8 = vpack.c.bf16 %v1184_v7, %v1184_v7  ;;  %v1195_v50 = vpack.c.bf16 %v1185_v49, %v1185_v49 }
 0x307   : > { %v1202_v51 = vsel %vm7464_vm9, %v1194_v8, 0  ;;  %v1205_v54 = vsel %vm7464_vm9, %v1195_v50, 0 }
 0x308   : > { %1210 = vmatpush.bf16.msra.mxu2 %v1202_v51  ;;  %1223 = vmatpush.bf16.msra.mxu3 %v1205_v54  ;;  %v1131_v47 = vpop.permute.xlu1 %1130 }
 0x309   : > { %v1163_v55 = vpop.permute.xlu0 %1162 }
 0x311   : > { %v1165_v56 = vpop.permute.xlu0 %1164 }
 0x312   : > { %v1166_v57 = vsel %vm7469_vm2, %v1163_v55, %v1165_v56  ;;  %v1167_v58 = vsel %vm7469_vm2, %v1165_v56, %v1163_v55 }
 0x313   : > { %v1168_v61 = vmul.f32 %v1166_v57, %v5612_v12  ;;  %v1169_v63 = vmul.f32 %v1167_v58, %v5615_v13  ;;  %v1196_v57 = vld [vmem:[#allocation10] sm:$0xf] }
 0x319   : > { %v1171_v22 = vpop.permute.xlu0 %1170 }
 0x31a   : > { %v1174_v23 = vsel %vm7470_vm1, %v1171_v22, %v1173_v59  ;;  %v1175_v60 = vsel %vm7470_vm1, %v1173_v59, %v1171_v22 }
 0x31b   : > { %v1176_v62 = vmul.f32 %v1174_v23, %v5604_v10  ;;  %v1177_v2 = vmul.f32 %v1175_v60, %v5607_v11 }
 0x31d   : > { %v1192_v3 = vpack.c.bf16 %v1176_v62, %v1168_v61  ;;  %v1193_v4 = vpack.c.bf16 %v1177_v2, %v1169_v63 }
 0x31f   : > { %1211 = vmatpush.bf16.msra.mxu2 %v1192_v3  ;;  %1224 = vmatpush.bf16.msra.mxu3 %v1193_v4 }
 0x321   : > { %v1157_v14 = vpop.permute.xlu0 %1156 }
 0x322   : > { %v1158_v15 = vsel %vm7467_vm6, %v1155_v0, %v1157_v14  ;;  %v1159_v16 = vsel %vm7467_vm6, %v1157_v14, %v1155_v0 }
 0x323   : > { %v1160_v17 = vmul.f32 %v1158_v15, %v5643_v39  ;;  %v1161_v20 = vmul.f32 %v1159_v16, %v5646_v40 }
 0x325   : > { %v1190_v21 = vpack.c.bf16 %v1160_v17, %v1120_v43  ;;  %v1191_v24 = vpack.c.bf16 %v1161_v20, %v1121_v44  ;;  %v1125_v44 = vpop.permute.xlu2 %1124 }
 0x327   : > { %1212 = vmatpush.bf16.msra.mxu2 %v1190_v21  ;;  %1225 = vmatpush.bf16.msra.mxu3 %v1191_v24 }
 0x329   : > { %v1139_v25 = vpop.permute.xlu0 %1138 }
 0x331   : > { %v1141_v30 = vpop.permute.xlu0 %1140 }
 0x332   : > { %v1142_v31 = vsel %vm7466_vm11, %v1139_v25, %v1141_v30  ;;  %v1143_v32 = vsel %vm7466_vm11, %v1141_v30, %v1139_v25  ;;  %vm7501_vm11 = vcmask 523264  }
 0x333   : > { %v1144_v33 = vmul.f32 %v1143_v32, %v5672_v5  ;;  %v1145_v35 = vmul.f32 %v1142_v31, %v5675_v9 }
 0x335   : > { %v1188_v41 = vpack.c.bf16 %v1152_v34, %v1144_v33  ;;  %v1189_v42 = vpack.c.bf16 %v1153_v36, %v1145_v35  ;;  %v4560_v34 = vld [vmem:[%s7617_s1 + $0x38] sm:$0xff]  ;;  %v4559_v36 = vld [vmem:[%s7617_s1 + $0x30] sm:$0xff] }
 0x336   : > { %v4568_v35 = vld [vmem:[%s7617_s1 + $0x78] sm:$0xff]  ;;  %1410 = vmatpush.bf16.msrb.mxu0 %v4560_v34 }
 0x337   : > { %1213 = vmatpush.bf16.msra.mxu2 %v1188_v41  ;;  %1226 = vmatpush.bf16.msra.mxu3 %v1189_v42  ;;  %v4567_v41 = vld [vmem:[%s7617_s1 + $0x70] sm:$0xff]  ;;  %v4558_v42 = vld [vmem:[%s7617_s1 + $0x28] sm:$0xff] }
 0x338   : > { %1423 = vmatpush.bf16.msrb.mxu1 %v4568_v35  ;;  %v882_v35 = vld [vmem:[#allocation4] sm:$0xff] }
 0x339   : > { %v1123_v43 = vpop.permute.xlu0 %1122 }
 0x33a   : > { %v1126_v45 = vsel %vm7479_vm12, %v1123_v43, %v1125_v44  ;;  %v1127_v46 = vsel %vm7479_vm12, %v1125_v44, %v1123_v43  ;;  %1411 = vmatpush.bf16.msrb.mxu0 %v4559_v36  ;;  %v4566_v43 = vld [vmem:[%s7617_s1 + $0x68] sm:$0xff]  ;;  %v4557_v44 = vld [vmem:[%s7617_s1 + $0x20] sm:$0xff]  ;;  %v5900_v36 = vperm.slane %v882_v35, 6 }
 0x33b   : > { %v1128_v8 = vmul.f32 %v1127_v46, %v5701_v37  ;;  %v1129_v51 = vmul.f32 %v1126_v45, %v5704_v38  ;;  %v4565_v45 = vld [vmem:[%s7617_s1 + $0x60] sm:$0xff]  ;;  %v4556_v46 = vld [vmem:[%s7617_s1 + $0x18] sm:$0xff] }
 0x33c   : > { %1424 = vmatpush.bf16.msrb.mxu1 %v4567_v41  ;;  %7620 = vst [vmem:[#allocation49_spill] sm:$0xff] %v5900_v36  ;;  %v5902_v41 = vperm.slane %v882_v35, 7 }
 0x33e   : > { %1412 = vmatpush.bf16.msrb.mxu0 %v4558_v42  ;;  %7621 = vst [vmem:[#allocation50_spill] sm:$0xff] %v5902_v41 }
 0x340   : > { %1425 = vmatpush.bf16.msrb.mxu1 %v4566_v43 }
 0x341   : > { %v1133_v48 = vpop.permute.xlu0 %1132 }
 0x342   : > { %v1134_v7 = vsel %vm7480_vm10, %v1131_v47, %v1133_v48  ;;  %v1135_v49 = vsel %vm7480_vm10, %v1133_v48, %v1131_v47  ;;  %1413 = vmatpush.bf16.msrb.mxu0 %v4557_v44  ;;  %v4564_v47 = vld [vmem:[%s7617_s1 + $0x58] sm:$0xff] }
 0x343   : > { %v1136_v50 = vmul.f32 %v1135_v49, %v5682_v18  ;;  %v1137_v54 = vmul.f32 %v1134_v7, %v5685_v19  ;;  %v4555_v7 = vld [vmem:[%s7617_s1 + $0x10] sm:$0xff] }
 0x344   : > { %1426 = vmatpush.bf16.msrb.mxu1 %v4565_v45  ;;  %v4563_v49 = vld [vmem:[%s7617_s1 + $0x50] sm:$0xff] }
 0x345   : > { %v1186_v55 = vpack.c.bf16 %v1136_v50, %v1128_v8  ;;  %v1187_v56 = vpack.c.bf16 %v1137_v54, %v1129_v51 }
 0x346   : > { %1414 = vmatpush.bf16.msrb.mxu0 %v4556_v46 }
 0x347   : > { %1214 = vmatpush.bf16.msra.mxu2 %v1186_v55  ;;  %1227 = vmatpush.bf16.msra.mxu3 %v1187_v56 }
 0x348   : > { %1427 = vmatpush.bf16.msrb.mxu1 %v4564_v47 }
 0x34a   : > { %4306 = vmatmul.msk.bf16.vlgmr.msra.gmra.mxu2 %vm7468_vm15, %v1196_v57  ;;  %4307 = vmatmul.msk.bf16.vlgmr.msra.gmra.mxu3 %vm7468_vm15, %v1196_v57  ;;  %v4554_v57 = vld [vmem:[%s7617_s1 + $0x8] sm:$0xff] }
 0x34b   : > { %1415 = vmatpush.bf16.msrb.mxu0 %v4555_v7 }
 0x34c   : > { %1428 = vmatpush.bf16.msrb.mxu1 %v4563_v49  ;;  %v5908_v49 = vperm.slane %v882_v35, 5 }
 0x34e   : > { %7622 = vst [vmem:[#allocation51_spill] sm:$0xff] %v5908_v49 }
 0x34f   : > { %1416 = vmatpush.bf16.msrb.mxu0 %v4554_v57 }
 0x3cd   : > { %v1216_v58 = vpop.f32.mrf.mxu2  ;;  %v1229_v59 = vpop.f32.mrf.mxu3 }
 0x3ce   : > { %v1233_v22 = vadd.f32 %v1229_v59, %v1216_v58 }
 0x3d0   : > { %1234 = vadd.xlane.f32.xlu2 %v1233_v22  ;;  %v4561_v22 = vld [vmem:[%s7617_s1 + $0x40] sm:$0xff] }
 0x3d5   : > { %v1218_v23 = vpop.f32.mrf.mxu2  ;;  %v1231_v60 = vpop.f32.mrf.mxu3 }
 0x443   : > { %v1235_v61 = vpop.xlane.xlu2 %1234 }
 0x444   : > { %v1236_v62 = vmul.f32 %v1235_v61, %v5714_v1 }
 0x446   : > { %v1237_v63 = vsub.f32 %v1216_v58, %v1236_v62  ;;  %v1238_v2 = vsub.f32 %v1229_v59, %v1236_v62  ;;  %v4562_v58 = vld [vmem:[%s7617_s1 + $0x48] sm:$0xff]  ;;  %v4553_v59 = vld [vmem:[%s7617_s1] sm:$0xff] }
 0x447   : > { %1429 = vmatpush.bf16.msrb.mxu1 %v4562_v58  ;;  %1417 = vmatpush.bf16.msrb.mxu0 %v4553_v59  ;;  %v5913_v59 = vperm.slane %v882_v35, 3 }
 0x448   : > { %v1239_v3 = vmul.f32 %v1237_v63, %v1237_v63  ;;  %v1240_v4 = vmul.f32 %v1238_v2, %v1238_v2 }
 0x449   : > { %7623 = vst [vmem:[#allocation52_spill] sm:$0xff] %v5913_v59 }
 0x44a   : > { %v1241_v0 = vadd.f32 %v1240_v4, %v1239_v3 }
 0x44b   : > { %1430 = vmatpush.bf16.msrb.mxu1 %v4561_v22  ;;  %v5915_v22 = vperm.slane %v882_v35, 2 }
 0x44c   : > { %1242 = vadd.xlane.f32.xlu1 %v1241_v0 }
 0x44d   : > { %7624 = vst [vmem:[#allocation53_spill] sm:$0xff] %v5915_v22 }
 0x4bf   : > { %v1243_v14 = vpop.xlane.xlu1 %1242 }
 0x4c0   : > { %v1244_v15 = vmul.f32 %v1243_v14, %v5714_v1 }
 0x4c2   : > { %v1245_v16 = vadd.f32 1e-05, %v1244_v15 }
 0x4c4   : > { %4806 = vrsqrt.f32 %v1245_v16  ;;  %vm1252_vm4 = vweird.f32 %v1245_v16 }
 0x4ca   : > { %v4807_v17 = vpop.eup %4806 }
 0x4cb   : > { %v1247_v20 = vmul.f32 %v4807_v17, %v1245_v16  ;;  %vm1253_vm3 = vweird.f32 %v4807_v17 }
 0x4cc   : > { %vm1254_vm5 = vmor %vm1252_vm4, %vm1253_vm3  ;;  %vm1493_vm3 = vcmask 465920   ;;  %vm7503_vm4 = vcmask 457728  }
 0x4cd   : > { %v1248_v21 = vmul.f32 %v4807_v17, %v1247_v20 }
 0x4cf   : > { %v1249_v24 = vmul.f32 0.5, %v1248_v21 }
 0x4d1   : > { %v1250_v25 = vsub.f32 1.5, %v1249_v24  ;;  %v5895_v24 = vld [vmem:[#allocation4 + $0x8] ss:$0 sm:$0xff] }
 0x4d3   : > { %v1251_v26 = vmul.f32 %v4807_v17, %v1250_v25 }
 0x4d5   : > { %v1255_v27 = vsel %vm1254_vm5, %v4807_v17, %v1251_v26  ;;  %vm7502_vm5 = vcmask 515072  }
 0x4d6   : > { %v1256_v28 = vmul.f32 %v1255_v27, %v1237_v63  ;;  %v1257_v30 = vmul.f32 %v1255_v27, %v1238_v2 }
 0x4d8   : > { %vm1258_vm8 = vcmp.ge.f32.partialorder %v1256_v28, 0.0  ;;  %v1260_v29 = vmul.f32 0.2, %v1256_v28  ;;  %v1261_v32 = vmul.f32 0.2, %v1257_v30  ;;  %vm1259_vm13 = vcmp.ge.f32.partialorder %v1257_v30, 0.0 }
 0x4da   : > { %v5788_v31 = vsel %vm1258_vm8, %v1256_v28, %v1260_v29  ;;  %v5792_v33 = vsel %vm1259_vm13, %v1257_v30, %v1261_v32  ;;  %vm1473_vm8 = vcmask 7168   ;;  %vm7504_vm13 = vcmask 56320  }
 0x4db   : > { %7615 = vst [vmem:[#allocation45_spill] sm:$0xff] %v5788_v31  ;;  %1264 = vrot.lane.b32.xlu0 %v5788_v31, %s5270_s27 }
 0x4dc   : > { %7616 = vst [vmem:[#allocation46_spill] sm:$0xff] %v5792_v33 }
 0x4e3   : > { %1266 = vrot.lane.b32.xlu0 %v5792_v33, %s5270_s27 }
 0x54d   : > { %v1265_v48 = vpop.permute.xlu0 %1264 }
 0x555   : > { %v1267_v8 = vpop.permute.xlu0 %1266 }
 0x556   : > { %v5834_v50 = vsel %vm7467_vm6, %v1265_v48, %v1267_v8  ;;  %v5838_v51 = vsel %vm7467_vm6, %v1267_v8, %v1265_v48 }
 0x557   : > { %7618 = vst [vmem:[#allocation47_spill] sm:$0xff] %v5834_v50  ;;  %v1270_v54 = vmax.f32 %v5788_v31, %v5834_v50  ;;  %v1271_v55 = vmax.f32 %v5792_v33, %v5838_v51 }
 0x558   : > { %7619 = vst [vmem:[#allocation48_spill] sm:$0xff] %v5838_v51 }
 0x559   : > { %v4782_v56 = vpack.i.bf16 %v1271_v55, %v1270_v54 }
 0x55b   : > { %4783 = vrot.lane.b32.xlu0 %v4782_v56, %s7460_s4  ;;  %s7485_s4 = smov 73  }
 0x5cd   : > { %v4784_v23 = vpop.permute.xlu0 %4783 }
 0x5ce   : > { %v4786_v60 = vunpack.i.h.bf16 %v4784_v23  ;;  %v4785_v61 = vunpack.i.l.bf16 %v4784_v23 }
 0x5d0   : > { %v1276_v62 = vsel %vm7470_vm1, %v4785_v61, %v4786_v60  ;;  %v1277_v63 = vsel %vm7470_vm1, %v4786_v60, %v4785_v61 }
 0x5d1   : > { %v1278_v2 = vmax.f32 %v1270_v54, %v1276_v62  ;;  %v1279_v3 = vmax.f32 %v1271_v55, %v1277_v63 }
 0x5d3   : > { %v1280_v4 = vpack.c.bf16 %v1278_v2, %v1278_v2  ;;  %v1281_v0 = vpack.c.bf16 %v1279_v3, %v1279_v3 }
 0x5d5   : > { %1418 = vmatmul.bf16.vlgmr.msrb.gmra.mxu0 %v1280_v4  ;;  %1431 = vmatmul.bf16.vlgmr.msrb.gmra.mxu1 %v1281_v0  ;;  %v5921_v0 = vperm.slane %v882_v35, 0 }
 0x5d7   : > { %7625 = vst [vmem:[#allocation54_spill] sm:$0xff] %v5921_v0 }
 0x652   : > { %v1419_v14 = vpop.f32.mrf.mxu0  ;;  %v1432_v15 = vpop.f32.mrf.mxu1 }
 0x653   : > { %v5861_v16 = vadd.f32 %v1432_v15, %v1419_v14  ;;  %v5923_v14 = vperm.slane %v882_v35, 1 }
 0x655   : > { %1490 = vrot.lane.b32.xlu1 %v5861_v16, %s7477_s30  ;;  %1487 = vrot.lane.b32.xlu2 %v5861_v16, %s7489_s5  ;;  %7626 = vst [vmem:[#allocation55_spill] sm:$0xff] %v5923_v14 }
 0x656   : > { %1507 = vrot.lane.b32.xlu0 %v5861_v16, %s7473_s6 }
 0x65a   : > { %v1421_v17 = vpop.f32.mrf.mxu0  ;;  %v1434_v20 = vpop.f32.mrf.mxu1 }
 0x65d   : > { %1457 = vrot.lane.b32.xlu1 %v5861_v16, %s5280_s23  ;;  %1480 = vrot.lane.b32.xlu2 %v5861_v16, %s7483_s2 }
 0x65e   : > { %1510 = vrot.lane.b32.xlu0 %v5861_v16, %s7471_s20 }
 0x665   : > { %1470 = vrot.lane.b32.xlu1 %v5861_v16, %s5271_s24  ;;  %1467 = vrot.lane.b32.xlu2 %v5861_v16, %s5283_s26 }
 0x666   : > { %1497 = vrot.lane.b32.xlu0 %v5861_v16, %s7493_s28 }
 0x66d   : > { %1447 = vrot.lane.b32.xlu1 %v5861_v16, %s7487_s22  ;;  %1440 = vrot.lane.b32.xlu2 %v5861_v16, %s7475_s12 }
 0x66e   : > { %1500 = vrot.lane.b32.xlu0 %v5861_v16, %s7495_s25 }
 0x676   : > { %1477 = vrot.lane.b32.xlu0 %v5861_v16, %s5270_s27 }
 0x67e   : > { %1460 = vrot.lane.b32.xlu0 %v5861_v16, %s7497_s9 }
 0x686   : > { %1437 = vrot.lane.b32.xlu0 %v5861_v16, %s7485_s4 }
 0x68e   : > { %1450 = vrot.lane.b32.xlu0 %v5861_v16, %s7491_s21 }
 0x6af   : > { %v1488_v34 = vpop.permute.xlu2 %1487 }
 0x6b7   : > { %v1481_v48 = vpop.permute.xlu2 %1480 }
 0x6bf   : > { %v1468_v58 = vpop.permute.xlu2 %1467 }
 0x6c7   : > { %v1491_v30 = vpop.permute.xlu1 %1490  ;;  %v1441_v4 = vpop.permute.xlu2 %1440 }
 0x6c8   : > { %v1508_v21 = vpop.permute.xlu0 %1507  ;;  %v1494_v42 = vsel %vm1493_vm3, %v1488_v34, %v1491_v30  ;;  %v5291_v34 = vmov 64.0  }
 0x6c9   : > { %v1496_v45 = vmul.f32 %v5900_v36, %v1494_v42  ;;  %4808 = vrcp.f32 %v5291_v34 }
 0x6cf   : > { %v1458_v46 = vpop.permute.xlu1 %1457  ;;  %v4809_v35 = vpop.eup %4808 }
 0x6d0   : > { %v1511_v25 = vpop.permute.xlu0 %1510  ;;  %v1557_v42 = vmul.f32 64.0, %v4809_v35  ;;  %vm1561_vm6 = vweird.f32 %v4809_v35 }
 0x6d1   : > { %v1514_v26 = vsel %vm7482_vm14, %v1508_v21, %v1511_v25 }
 0x6d2   : > { %v1516_v27 = vmul.f32 %v5895_v24, %v1514_v26 }
 0x6d4   : > { %v1521_v28 = vpack.c.bf16 %v1516_v27, %v1516_v27  ;;  %v4569_v27 = vld [vmem:[#allocation12] sm:$0xff] }
 0x6d6   : > { %v1533_v29 = vsel %vm7464_vm9, %v1521_v28, 0  ;;  %vm1443_vm9 = vcmask 72704  }
 0x6d7   : > { %1538 = vmatpush.bf16.msrb.mxu2 %v1533_v29  ;;  %v1471_v56 = vpop.permute.xlu1 %1470 }
 0x6d8   : > { %v1498_v32 = vpop.permute.xlu0 %1497  ;;  %v1474_v23 = vsel %vm1473_vm8, %v1468_v58, %v1471_v56 }
 0x6d9   : > { %v1476_v62 = vmul.f32 %v5913_v59, %v1474_v23 }
 0x6e0   : > { %v1501_v43 = vpop.permute.xlu0 %1500 }
 0x6e1   : > { %v1504_v44 = vsel %vm7503_vm4, %v1498_v32, %v1501_v43  ;;  %v1558_v43 = vsub.f32 1.0, %v1557_v42 }
 0x6e2   : > { %v1506_v47 = vmul.f32 %v5902_v41, %v1504_v44 }
 0x6e3   : > { %v1559_v44 = vmul.f32 %v4809_v35, %v1558_v43 }
 0x6e4   : > { %v1520_v7 = vpack.c.bf16 %v1506_v47, %v1496_v45 }
 0x6e5   : > { %v1560_v45 = vadd.f32 %v4809_v35, %v1559_v44 }
 0x6e6   : > { %1539 = vmatpush.bf16.msrb.mxu2 %v1520_v7 }
 0x6e8   : > { %v1478_v8 = vpop.permute.xlu0 %1477 }
 0x6e9   : > { %v1484_v54 = vsel %vm7502_vm5, %v1478_v8, %v1481_v48 }
 0x6ea   : > { %v1486_v55 = vmul.f32 %v5908_v49, %v1484_v54 }
 0x6ec   : > { %v1519_v57 = vpack.c.bf16 %v1486_v55, %v5861_v16  ;;  %v1448_v16 = vpop.permute.xlu1 %1447 }
 0x6ee   : > { %1540 = vmatpush.bf16.msrb.mxu2 %v1519_v57 }
 0x6f0   : > { %v1461_v60 = vpop.permute.xlu0 %1460 }
 0x6f1   : > { %v1464_v61 = vsel %vm7504_vm13, %v1458_v46, %v1461_v60  ;;  %v5932_v46 = vsel %vm1561_vm6, %v4809_v35, %v1560_v45 }
 0x6f2   : > { %v1466_v63 = vmul.f32 %v5915_v22, %v1464_v61  ;;  %7627 = vst [vmem:[#allocation56_spill] sm:$0xff] %v5932_v46 }
 0x6f4   : > { %v1518_v2 = vpack.c.bf16 %v1476_v62, %v1466_v63 }
 0x6f6   : > { %1541 = vmatpush.bf16.msrb.mxu2 %v1518_v2 }
 0x6f8   : > { %v1438_v3 = vpop.permute.xlu0 %1437 }
 0x6f9   : > { %v1444_v15 = vsel %vm1443_vm9, %v1438_v3, %v1441_v4 }
 0x6fa   : > { %v1446_v21 = vmul.f32 %v5921_v0, %v1444_v15 }
 0x700   : > { %v1451_v17 = vpop.permute.xlu0 %1450 }
 0x701   : > { %v1454_v20 = vsel %vm1453_vm0, %v1448_v16, %v1451_v17 }
 0x702   : > { %v1456_v25 = vmul.f32 %v5923_v14, %v1454_v20 }
 0x704   : > { %v1517_v26 = vpack.c.bf16 %v1456_v25, %v1446_v21 }
 0x706   : > { %1542 = vmatpush.bf16.msrb.mxu2 %v1517_v26 }
 0x709   : > { %4376 = vmatmul.msk.bf16.vlgmr.msrb.gmra.mxu2 %vm7468_vm15, %v4569_v27 }
 0x78c   : > { %v1544_v28 = vpop.f32.mrf.mxu2 }
 0x78d   : > { %v1550_v29 = vsel %vm7501_vm11, %v1544_v28, 0.0 }
 0x78e   : > { %1551 = vadd.xlane.f32.xlu2 %v1550_v29 }
 0x794   : > { %v1546_v30 = vpop.f32.mrf.mxu2 }
 0x795   : > { %v1553_v32 = vsel %vm7501_vm11, %v1546_v30, 0.0 }
 0x796   : > { %1554 = vadd.xlane.f32.xlu1 %v1553_v32 }
 0x801   : > { %v1552_v47 = vpop.xlane.xlu2 %1551 }
 0x802   : > { %v1563_v48 = vmul.f32 %v5932_v46, %v1552_v47 }
 0x804   : > { %v1565_v7 = vsub.f32 %v1544_v28, %v1563_v48 }
 0x806   : > { %v1567_v8 = vmul.f32 %v1565_v7, %v1565_v7 }
 0x808   : > { %v1569_v54 = vsel %vm7501_vm11, %v1567_v8, 0.0 }
 0x809   : > { %1570 = vadd.xlane.f32.xlu0 %v1569_v54  ;;  %v1555_v55 = vpop.xlane.xlu1 %1554 }
 0x80a   : > { %v1564_v56 = vmul.f32 %v5932_v46, %v1555_v55 }
 0x80c   : > { %v1566_v57 = vsub.f32 %v1546_v30, %v1564_v56 }
 0x80e   : > { %v1568_v58 = vmul.f32 %v1566_v57, %v1566_v57 }
 0x810   : > { %v1572_v23 = vsel %vm7501_vm11, %v1568_v58, 0.0 }
 0x811   : > { %1573 = vadd.xlane.f32.xlu2 %v1572_v23 }
 0x87c   : > { %v1571_v60 = vpop.xlane.xlu0 %1570 }
 0x87d   : > { %v1575_v61 = vmul.f32 %v1571_v60, %v5932_v46 }
 0x87f   : > { %v1577_v62 = vadd.f32 1e-05, %v1575_v61 }
 0x881   : > { %4810 = vrsqrt.f32 %v1577_v62  ;;  %vm1585_vm15 = vweird.f32 %v1577_v62 }
 0x884   : > { %v1574_v63 = vpop.xlane.xlu2 %1573 }
 0x885   : > { %v1576_v3 = vmul.f32 %v1574_v63, %v5932_v46 }
 0x887   : > { %v4811_v2 = vpop.eup %4810  ;;  %v1578_v16 = vadd.f32 1e-05, %v1576_v3 }
 0x888   : > { %v1580_v4 = vmul.f32 %v4811_v2, %v1577_v62  ;;  %vm1586_vm6 = vweird.f32 %v4811_v2 }
 0x889   : > { %4812 = vrsqrt.f32 %v1578_v16  ;;  %vm1587_vm2 = vmor %vm1585_vm15, %vm1586_vm6 }
 0x88a   : > { %v1581_v15 = vmul.f32 %v4811_v2, %v1580_v4 }
 0x88c   : > { %v1582_v17 = vmul.f32 0.5, %v1581_v15 }
 0x88e   : > { %v1583_v20 = vsub.f32 1.5, %v1582_v17 }
 0x88f   : > { %v4813_v27 = vpop.eup %4812 }
 0x890   : > { %v1584_v21 = vmul.f32 %v4811_v2, %v1583_v20  ;;  %v1590_v30 = vmul.f32 %v4813_v27, %v1578_v16 }
 0x892   : > { %v1588_v25 = vsel %vm1587_vm2, %v4811_v2, %v1584_v21  ;;  %v1591_v32 = vmul.f32 %v4813_v27, %v1590_v30  ;;  %vm1595_vm2 = vweird.f32 %v1578_v16 }
 0x893   : > { %v1599_v26 = vmul.f32 %v1588_v25, %v1565_v7 }
 0x894   : > { %v1592_v34 = vmul.f32 0.5, %v1591_v32 }
 0x895   : > { %vm1601_vm1 = vcmp.ge.f32.partialorder %v1599_v26, 0.0  ;;  %v1603_v28 = vmul.f32 0.2, %v1599_v26 }
 0x896   : > { %v1593_v35 = vsub.f32 1.5, %v1592_v34 }
 0x897   : > { %v5940_v29 = vsel %vm1601_vm1, %v1599_v26, %v1603_v28  ;;  %vm1596_vm1 = vweird.f32 %v4813_v27 }
 0x898   : > { %1695 = vrot.lane.b32.xlu0 %v5940_v29, %s7477_s30  ;;  %1705 = vrot.lane.b32.xlu1 %v5940_v29, %s7493_s28  ;;  %v1594_v42 = vmul.f32 %v4813_v27, %v1593_v35  ;;  %vm1597_vm15 = vmor %vm1595_vm2, %vm1596_vm1  ;;  %vm1757_vm1 = vcmask 130048  }
 0x899   : > { %1711 = vrot.lane.b32.xlu2 %v5940_v29, %s7495_s25 }
 0x89a   : > { %v1598_v43 = vsel %vm1597_vm15, %v4813_v27, %v1594_v42 }
 0x89b   : > { %v1600_v44 = vmul.f32 %v1598_v43, %v1566_v57 }
 0x89d   : > { %v1604_v45 = vmul.f32 0.2, %v1600_v44  ;;  %vm1602_vm6 = vcmp.ge.f32.partialorder %v1600_v44, 0.0 }
 0x89f   : > { %v5966_v47 = vsel %vm1602_vm6, %v1600_v44, %v1604_v45 }
 0x8a0   : > { %1657 = vrot.lane.b32.xlu0 %v5940_v29, %s5283_s26  ;;  %1689 = vrot.lane.b32.xlu1 %v5940_v29, %s7489_s5 }
 0x8a1   : > { %1673 = vrot.lane.b32.xlu2 %v5940_v29, %s5270_s27 }
 0x8a8   : > { %1647 = vrot.lane.b32.xlu0 %v5940_v29, %s7497_s9  ;;  %1679 = vrot.lane.b32.xlu1 %v5940_v29, %s7483_s2 }
 0x8a9   : > { %1663 = vrot.lane.b32.xlu2 %v5940_v29, %s5271_s24 }
 0x8b0   : > { %1609 = vrot.lane.b32.xlu0 %v5940_v29, %s7485_s4  ;;  %1641 = vrot.lane.b32.xlu1 %v5940_v29, %s5280_s23 }
 0x8b1   : > { %1625 = vrot.lane.b32.xlu2 %v5940_v29, %s7487_s22 }
 0x8b8   : > { %1631 = vrot.lane.b32.xlu1 %v5940_v29, %s7491_s21  ;;  %1707 = vrot.lane.b32.xlu0 %v5966_v47, %s7493_s28 }
 0x8b9   : > { %1615 = vrot.lane.b32.xlu2 %v5940_v29, %s7475_s12 }
 0x8c0   : > { %1721 = vrot.lane.b32.xlu1 %v5940_v29, %s7473_s6  ;;  %1713 = vrot.lane.b32.xlu0 %v5966_v47, %s7495_s25 }
 0x8c1   : > { %1691 = vrot.lane.b32.xlu2 %v5966_v47, %s7489_s5  ;;  %s5299_s5 = smov 3  }
 0x8c8   : > { %1697 = vrot.lane.b32.xlu1 %v5966_v47, %s7477_s30  ;;  %1675 = vrot.lane.b32.xlu0 %v5966_v47, %s5270_s27  ;;  %s5294_s30 = smov 124  }
 0x8c9   : > { %1681 = vrot.lane.b32.xlu2 %v5966_v47, %s7483_s2 }
 0x8d0   : > { %1659 = vrot.lane.b32.xlu1 %v5966_v47, %s5283_s26  ;;  %1665 = vrot.lane.b32.xlu0 %v5966_v47, %s5271_s24 }
 0x8d1   : > { %1643 = vrot.lane.b32.xlu2 %v5966_v47, %s5280_s23 }
 0x8d8   : > { %1649 = vrot.lane.b32.xlu1 %v5966_v47, %s7497_s9  ;;  %1627 = vrot.lane.b32.xlu0 %v5966_v47, %s7487_s22  ;;  %s5298_s22 = smov 123   ;;  %s5303_s9 = smov 5  }
 0x8d9   : > { %1633 = vrot.lane.b32.xlu2 %v5966_v47, %s7491_s21  ;;  %s5300_s21 = smov 117  }
 0x8e0   : > { %1611 = vrot.lane.b32.xlu1 %v5966_v47, %s7485_s4  ;;  %1617 = vrot.lane.b32.xlu0 %v5966_v47, %s7475_s12  ;;  %s5295_s12 = smov 13   ;;  %s5297_s4 = smov 11  }
 0x8e1   : > { %1723 = vrot.lane.b32.xlu2 %v5966_v47, %s7473_s6  ;;  %s5292_s6 = smov 125  }
 0x8e8   : > { %1729 = vrot.lane.b32.xlu1 %v5966_v47, %s7471_s20  ;;  %1727 = vrot.lane.b32.xlu0 %v5940_v29, %s7471_s20  ;;  %s5293_s20 = smov 12  }
 0x8f3   : > { %v1712_v48 = vpop.permute.xlu2 %1711 }
 0x8fb   : > { %v1674_v7 = vpop.permute.xlu2 %1673 }
 0x903   : > { %v1664_v55 = vpop.permute.xlu2 %1663 }
 0x90a   : > { %v1696_v8 = vpop.permute.xlu0 %1695  ;;  %v1706_v54 = vpop.permute.xlu1 %1705 }
 0x90b   : > { %v1626_v58 = vpop.permute.xlu2 %1625  ;;  %v1717_v15 = vsel %vm7503_vm4, %v1706_v54, %v1712_v48 }
 0x90c   : > { %v1719_v21 = vmul.f32 %v1717_v15, %v5902_v41 }
 0x912   : > { %v1658_v56 = vpop.permute.xlu0 %1657  ;;  %v1690_v57 = vpop.permute.xlu1 %1689 }
 0x913   : > { %v1616_v61 = vpop.permute.xlu2 %1615  ;;  %v1701_v28 = vsel %vm1493_vm3, %v1690_v57, %v1696_v8 }
 0x914   : > { %v1703_v42 = vmul.f32 %v1701_v28, %v5900_v36 }
 0x91a   : > { %v1648_v23 = vpop.permute.xlu0 %1647  ;;  %v1680_v60 = vpop.permute.xlu1 %1679 }
 0x91b   : > { %v1692_v4 = vpop.permute.xlu2 %1691  ;;  %v1685_v44 = vsel %vm7502_vm5, %v1674_v7, %v1680_v60  ;;  %v1741_v7 = vpack.c.bf16 %v5966_v47, %v5940_v29 }
 0x922   : > { %v1610_v62 = vpop.permute.xlu0 %1609  ;;  %v1642_v63 = vpop.permute.xlu1 %1641 }
 0x923   : > { %v1682_v26 = vpop.permute.xlu2 %1681 }
 0x92a   : > { %v1708_v2 = vpop.permute.xlu0 %1707  ;;  %v1632_v3 = vpop.permute.xlu1 %1631 }
 0x92b   : > { %v1644_v54 = vpop.permute.xlu2 %1643  ;;  %v1637_v29 = vsel %vm1453_vm0, %v1626_v58, %v1632_v3  ;;  %v4379_v58 = vld [vmem:[%s7436_s11] sm:$0xf]  ;;  %v4571_v3 = vld [vmem:[%s7436_s11 + $0x4] sm:$0xf0] }
 0x932   : > { %v1714_v16 = vpop.permute.xlu0 %1713  ;;  %v1722_v17 = vpop.permute.xlu1 %1721 }
 0x933   : > { %v1718_v20 = vsel %vm7503_vm4, %v1708_v2, %v1714_v16  ;;  %v1687_v2 = vmul.f32 %v1685_v44, %v5908_v49 }
 0x934   : > { %v1720_v25 = vmul.f32 %v1718_v20, %v5902_v41 }
 0x936   : > { %v1744_v27 = vpack.c.bf16 %v1720_v25, %v1719_v21  ;;  %v1653_v21 = vsel %vm7504_vm13, %v1642_v63, %v1648_v23  ;;  %v1634_v25 = vpop.permute.xlu2 %1633  ;;  %v1639_v23 = vmul.f32 %v1637_v29, %v5923_v14  ;;  %v1621_v63 = vsel %vm1443_vm9, %v1610_v62, %v1616_v61 }
 0x937   : > { %v4380_v61 = vor.u32 %v4571_v3, %v4379_v58 }
 0x938   : > { %1761 = vmatpush.bf16.msrb.mxu3 %v1744_v27 }
 0x93a   : > { %v1676_v30 = vpop.permute.xlu0 %1675  ;;  %v1698_v32 = vpop.permute.xlu1 %1697 }
 0x93b   : > { %v1686_v34 = vsel %vm7502_vm5, %v1676_v30, %v1682_v26  ;;  %v1702_v35 = vsel %vm1493_vm3, %v1692_v4, %v1698_v32  ;;  %v1669_v4 = vsel %vm1473_vm8, %v1658_v56, %v1664_v55  ;;  %v1655_v55 = vmul.f32 %v1653_v21, %v5915_v22 }
 0x93c   : > { %v1704_v43 = vmul.f32 %v1702_v35, %v5900_v36  ;;  %v1688_v45 = vmul.f32 %v1686_v34, %v5908_v49  ;;  %v1671_v60 = vmul.f32 %v1669_v4, %v5913_v59 }
 0x93e   : > { %v1743_v48 = vpack.c.bf16 %v1704_v43, %v1703_v42  ;;  %v1742_v15 = vpack.c.bf16 %v1688_v45, %v1687_v2  ;;  %v1623_v45 = vmul.f32 %v1621_v63, %v5921_v0  ;;  %v1724_v62 = vpop.permute.xlu2 %1723 }
 0x940   : > { %1762 = vmatpush.bf16.msrb.mxu3 %v1743_v48 }
 0x942   : > { %v1666_v8 = vpop.permute.xlu0 %1665  ;;  %v1660_v57 = vpop.permute.xlu1 %1659 }
 0x943   : > { %v1670_v16 = vsel %vm1473_vm8, %v1660_v57, %v1666_v8 }
 0x944   : > { %1763 = vmatpush.bf16.msrb.mxu3 %v1742_v15  ;;  %v1672_v20 = vmul.f32 %v1670_v16, %v5913_v59 }
 0x946   : > { %v1740_v28 = vpack.c.bf16 %v1672_v20, %v1671_v60  ;;  %v4570_v20 = vld [vmem:[%s7436_s11 + $0x4] sm:$0xf] }
 0x948   : > { %1764 = vmatpush.bf16.msrb.mxu3 %v1741_v7  ;;  %v4381_v7 = vld [vmem:[%s7436_s11 + $0x8] sm:$0xf0] }
 0x949   : > { %v4384_v21 = vor.u32 %v4570_v20, %v4381_v7 }
 0x94a   : > { %v1628_v26 = vpop.permute.xlu0 %1627  ;;  %v1650_v27 = vpop.permute.xlu1 %1649 }
 0x94b   : > { %v1638_v30 = vsel %vm1453_vm0, %v1628_v26, %v1634_v25  ;;  %v1654_v32 = vsel %vm7504_vm13, %v1644_v54, %v1650_v27 }
 0x94c   : > { %v1656_v56 = vmul.f32 %v1654_v32, %v5915_v22  ;;  %1765 = vmatpush.bf16.msrb.mxu3 %v1740_v28  ;;  %v1640_v47 = vmul.f32 %v1638_v30, %v5923_v14 }
 0x94e   : > { %v1739_v34 = vpack.c.bf16 %v1656_v56, %v1655_v55  ;;  %v1738_v43 = vpack.c.bf16 %v1640_v47, %v1639_v23 }
 0x950   : > { %1766 = vmatpush.bf16.msrb.mxu3 %v1739_v34 }
 0x952   : > { %v1618_v35 = vpop.permute.xlu0 %1617  ;;  %v1612_v42 = vpop.permute.xlu1 %1611 }
 0x953   : > { %v1622_v44 = vsel %vm1443_vm9, %v1612_v42, %v1618_v35 }
 0x954   : > { %v1624_v48 = vmul.f32 %v1622_v44, %v5921_v0  ;;  %1767 = vmatpush.bf16.msrb.mxu3 %v1738_v43 }
 0x956   : > { %v1737_v54 = vpack.c.bf16 %v1624_v48, %v1623_v45 }
 0x958   : > { %1768 = vmatpush.bf16.msrb.mxu3 %v1737_v54 }
 0x95a   : > { %v1728_v2 = vpop.permute.xlu0 %1727  ;;  %v1730_v8 = vpop.permute.xlu1 %1729 }
 0x95b   : > { %v1733_v57 = vsel %vm7482_vm14, %v1722_v17, %v1728_v2  ;;  %v1734_v15 = vsel %vm7482_vm14, %v1724_v62, %v1730_v8  ;;  %1769 = vmatmul.bf16.vlgmr.msrb.gmra.mxu3 %v4380_v61 }
 0x95c   : > { %v1735_v16 = vmul.f32 %v5895_v24, %v1733_v57  ;;  %v1736_v4 = vmul.f32 %v5895_v24, %v1734_v15 }
 0x95e   : > { %v1745_v60 = vpack.c.bf16 %v1736_v4, %v1735_v16 }
 0x960   : > { %1782 = vmatpush.bf16.msra.mxu2 %v1745_v60 }
 0x963   : > { %4385 = vmatmul.msk.bf16.vlgmr.msra.gmra.mxu2 %vm1757_vm1, %v4384_v21 }
 0x9de   : > { %v1770_v17 = vpop.f32.mrf.mxu3 }
 0x9e6   : > { %v1784_v25 = vpop.f32.mrf.mxu2  ;;  %v1772_v24 = vpop.f32.mrf.mxu3 }
 0x9e7   : > { %v1785_v26 = vadd.f32 %v1784_v25, %v1770_v17 }
 0x9e9   : > { %v1789_v27 = vsel %vm7501_vm11, %v1785_v26, 0.0 }
 0x9ea   : > { %1790 = vadd.xlane.f32.xlu2 %v1789_v27 }
 0x9ee   : > { %v1786_v28 = vpop.f32.mrf.mxu2 }
 0x9ef   : > { %v1787_v30 = vadd.f32 %v1786_v28, %v1772_v24 }
 0x9f1   : > { %v1792_v32 = vsel %vm7501_vm11, %v1787_v30, 0.0 }
 0x9f2   : > { %1793 = vadd.xlane.f32.xlu0 %v1792_v32 }
 0xa5d   : > { %v1791_v55 = vpop.xlane.xlu2 %1790 }
 0xa5e   : > { %v1795_v56 = vmul.f32 %v1791_v55, %v5932_v46  ;;  %v4575_v55 = vld [vmem:[#allocation7 + $0x18] sm:$0xff] }
 0xa5f   : > { %1915 = vmatpush.bf16.msra.mxu0 %v4575_v55 }
 0xa60   : > { %v1797_v29 = vsub.f32 %v1785_v26, %v1795_v56  ;;  %v4574_v56 = vld [vmem:[#allocation7 + $0x10] sm:$0xff] }
 0xa62   : > { %v1799_v47 = vmul.f32 %v1797_v29, %v1797_v29 }
 0xa63   : > { %1916 = vmatpush.bf16.msra.mxu0 %v4574_v56 }
 0xa64   : > { %v1801_v34 = vsel %vm7501_vm11, %v1799_v47, 0.0 }
 0xa65   : > { %v1794_v23 = vpop.xlane.xlu0 %1793  ;;  %1802 = vadd.xlane.f32.xlu1 %v1801_v34 }
 0xa66   : > { %v1796_v63 = vmul.f32 %v1794_v23, %v5932_v46 }
 0xa68   : > { %v1798_v35 = vsub.f32 %v1787_v30, %v1796_v63 }
 0xa6a   : > { %v1800_v42 = vmul.f32 %v1798_v35, %v1798_v35 }
 0xa6c   : > { %v1804_v43 = vsel %vm7501_vm11, %v1800_v42, 0.0 }
 0xa6d   : > { %1805 = vadd.xlane.f32.xlu2 %v1804_v43 }
 0xad8   : > { %v1803_v44 = vpop.xlane.xlu1 %1802 }
 0xad9   : > { %v1807_v45 = vmul.f32 %v1803_v44, %v5932_v46 }
 0xadb   : > { %v1809_v48 = vadd.f32 1e-05, %v1807_v45 }
 0xadd   : > { %4814 = vrsqrt.f32 %v1809_v48  ;;  %vm1817_vm15 = vweird.f32 %v1809_v48 }
 0xae0   : > { %v1806_v58 = vpop.xlane.xlu2 %1805 }
 0xae1   : > { %v1808_v3 = vmul.f32 %v1806_v58, %v5932_v46 }
 0xae3   : > { %v4815_v54 = vpop.eup %4814  ;;  %v1810_v61 = vadd.f32 1e-05, %v1808_v3  ;;  %v4573_v3 = vld [vmem:[#allocation7 + $0x8] sm:$0xff] }
 0xae4   : > { %v1812_v62 = vmul.f32 %v4815_v54, %v1809_v48  ;;  %vm1818_vm2 = vweird.f32 %v4815_v54  ;;  %1917 = vmatpush.bf16.msra.mxu0 %v4573_v3  ;;  %v6166_v3 = vld [vmem:[#allocation6] sm:$0xff] }
 0xae5   : > { %4816 = vrsqrt.f32 %v1810_v61  ;;  %vm1819_vm6 = vmor %vm1817_vm15, %vm1818_vm2  ;;  %vm1827_vm7 = vweird.f32 %v1810_v61  ;;  %vm2064_vm15 = vcmask 89088  }
 0xae6   : > { %v1813_v2 = vmul.f32 %v4815_v54, %v1812_v62 }
 0xae8   : > { %v1814_v8 = vmul.f32 0.5, %v1813_v2 }
 0xaea   : > { %v1815_v57 = vsub.f32 1.5, %v1814_v8 }
 0xaeb   : > { %v4817_v15 = vpop.eup %4816 }
 0xaec   : > { %v1816_v16 = vmul.f32 %v4815_v54, %v1815_v57  ;;  %v1822_v4 = vmul.f32 %v4817_v15, %v1810_v61  ;;  %vm1828_vm10 = vweird.f32 %v4817_v15 }
 0xaed   : > { %vm1829_vm14 = vmor %vm1827_vm7, %vm1828_vm10  ;;  %vm2046_vm7 = vcmask 97280   ;;  %vm2028_vm10 = vcmask 105472  }
 0xaee   : > { %v1820_v20 = vsel %vm1819_vm6, %v4815_v54, %v1816_v16  ;;  %v1823_v7 = vmul.f32 %v4817_v15, %v1822_v4  ;;  %v4572_v54 = vld [vmem:[#allocation7] sm:$0xff]  ;;  %vm1957_vm6 = vcmask 31744  }
 0xaef   : > { %v1831_v60 = vmul.f32 %v1820_v20, %v1797_v29  ;;  %1918 = vmatpush.bf16.msra.mxu0 %v4572_v54 }
 0xaf0   : > { %v1824_v21 = vmul.f32 0.5, %v1823_v7 }
 0xaf1   : > { %vm1833_vm12 = vcmp.ge.f32.partialorder %v1831_v60, 0.0  ;;  %v1835_v17 = vmul.f32 0.2, %v1831_v60 }
 0xaf2   : > { %v1825_v25 = vsub.f32 1.5, %v1824_v21 }
 0xaf3   : > { %v6063_v26 = vsel %vm1833_vm12, %v1831_v60, %v1835_v17  ;;  %vm2010_vm12 = vcmask 121856  }
 0xaf4   : > { %7628 = vst [vmem:[#allocation57_spill] sm:$0xff] %v6063_v26  ;;  %v1826_v27 = vmul.f32 %v4817_v15, %v1825_v25  ;;  %1847 = vrot.lane.b32.xlu2 %v6063_v26, %s7483_s2  ;;  %1841 = vrot.lane.b32.xlu0 %v6063_v26, %s5270_s27 }
 0xaf6   : > { %v1830_v24 = vsel %vm1829_vm14, %v4817_v15, %v1826_v27  ;;  %vm1975_vm14 = vcmask 23552  }
 0xaf7   : > { %v1832_v28 = vmul.f32 %v1830_v24, %v1798_v35 }
 0xaf9   : > { %vm1834_vm2 = vcmp.ge.f32.partialorder %v1832_v28, 0.0  ;;  %v1836_v30 = vmul.f32 0.2, %v1832_v28 }
 0xafb   : > { %v6069_v32 = vsel %vm1834_vm2, %v1832_v28, %v1836_v30  ;;  %vm1939_vm2 = vcmask 39936  }
 0xafc   : > { %7629 = vst [vmem:[#allocation58_spill] sm:$0xff] %v6069_v32  ;;  %1849 = vrot.lane.b32.xlu0 %v6069_v32, %s7483_s2  ;;  %1843 = vrot.lane.b32.xlu1 %v6069_v32, %s5270_s27  ;;  %s5296_s2 = smov 115  }
 0xb4e   : > { %v1848_v47 = vpop.permute.xlu2 %1847 }
 0xb66   : > { %v1842_v29 = vpop.permute.xlu0 %1841 }
 0xb67   : > { %v1853_v34 = vsel %vm7502_vm5, %v1842_v29, %v1848_v47 }
 0xb68   : > { %v1855_v42 = vmax.f32 %v6063_v26, %v1853_v34  ;;  %v6079_v43 = vmul.f32 %v1853_v34, %v5908_v49 }
 0xb6a   : > { %7630 = vst [vmem:[#allocation59_spill] sm:$0xff] %v6079_v43 }
 0xb6e   : > { %v1850_v23 = vpop.permute.xlu0 %1849  ;;  %v1844_v63 = vpop.permute.xlu1 %1843 }
 0xb6f   : > { %v1854_v35 = vsel %vm7502_vm5, %v1844_v63, %v1850_v23 }
 0xb70   : > { %v1856_v44 = vmax.f32 %v6069_v32, %v1854_v35  ;;  %v6083_v45 = vmul.f32 %v1854_v35, %v5908_v49 }
 0xb72   : > { %7631 = vst [vmem:[#allocation60_spill] sm:$0xff] %v6083_v45  ;;  %v4792_v48 = vpack.i.bf16 %v1856_v44, %v1855_v42 }
 0xb74   : > { %4793 = vrot.lane.b32.xlu1 %v4792_v48, %s7495_s25  ;;  %4788 = vrot.lane.b32.xlu0 %v4792_v48, %s7493_s28  ;;  %s5301_s28 = smov 4   ;;  %s5302_s25 = smov 116  }
 0xbe6   : > { %v4794_v61 = vpop.permute.xlu1 %4793  ;;  %v4789_v62 = vpop.permute.xlu0 %4788 }
 0xbe7   : > { %v4796_v2 = vunpack.i.h.bf16 %v4794_v61  ;;  %v4795_v8 = vunpack.i.l.bf16 %v4794_v61  ;;  %v4791_v57 = vunpack.i.h.bf16 %v4789_v62  ;;  %v4790_v15 = vunpack.i.l.bf16 %v4789_v62 }
 0xbe8   : > { %v6169_v61 = vperm.slane %v6166_v3, 7 }
 0xbe9   : > { %v1872_v16 = vsel %vm7503_vm4, %v4791_v57, %v4796_v2  ;;  %v1871_v4 = vsel %vm7503_vm4, %v4790_v15, %v4795_v8 }
 0xbea   : > { %v1874_v20 = vmax.f32 %v1856_v44, %v1872_v16  ;;  %v1873_v7 = vmax.f32 %v1855_v42, %v1871_v4 }
 0xbec   : > { %v1875_v60 = vpack.c.bf16 %v1874_v20, %v1873_v7  ;;  %v6176_v7 = vperm.slane %v6166_v3, 6 }
 0xbee   : > { %4402 = vmatmul.msk.bf16.vlgmr.msra.gmra.mxu0 %vm7501_vm11, %v1875_v60 }
 0xc6b   : > { %v6092_v21 = vpop.f32.mrf.mxu0 }
 0xc6c   : > { %2016 = vrot.lane.b32.xlu0 %v6092_v21, %s5292_s6  ;;  %2040 = vrot.lane.b32.xlu1 %v6092_v21, %s5293_s20 }
 0xc6d   : > { %2034 = vrot.lane.b32.xlu2 %v6092_v21, %s5294_s30 }
 0xc73   : > { %v6124_v17 = vpop.f32.mrf.mxu0 }
 0xc74   : > { %2004 = vrot.lane.b32.xlu0 %v6092_v21, %s7569_s29  ;;  %1998 = vrot.lane.b32.xlu1 %v6092_v21, %s5270_s27 }
 0xc75   : > { %2022 = vrot.lane.b32.xlu2 %v6092_v21, %s5295_s12 }
 0xc7c   : > { %1963 = vrot.lane.b32.xlu0 %v6092_v21, %s5296_s2  ;;  %1987 = vrot.lane.b32.xlu1 %v6092_v21, %s5271_s24 }
 0xc7d   : > { %1981 = vrot.lane.b32.xlu2 %v6092_v21, %s7571_s3 }
 0xc84   : > { %2058 = vrot.lane.b32.xlu0 %v6092_v21, %s5297_s4  ;;  %2052 = vrot.lane.b32.xlu1 %v6092_v21, %s5298_s22 }
 0xc85   : > { %1969 = vrot.lane.b32.xlu2 %v6092_v21, %s5299_s5 }
 0xc8c   : > { %1927 = vrot.lane.b32.xlu0 %v6092_v21, %s5300_s21  ;;  %1951 = vrot.lane.b32.xlu1 %v6092_v21, %s5301_s28 }
 0xc8d   : > { %1945 = vrot.lane.b32.xlu2 %v6092_v21, %s5302_s25 }
 0xc94   : > { %2018 = vrot.lane.b32.xlu1 %v6124_v17, %s5292_s6  ;;  %2036 = vrot.lane.b32.xlu0 %v6124_v17, %s5294_s30 }
 0xc95   : > { %2042 = vrot.lane.b32.xlu2 %v6124_v17, %s5293_s20 }
 0xc9c   : > { %2006 = vrot.lane.b32.xlu1 %v6124_v17, %s7569_s29  ;;  %2024 = vrot.lane.b32.xlu0 %v6124_v17, %s5295_s12 }
 0xc9d   : > { %2000 = vrot.lane.b32.xlu2 %v6124_v17, %s5270_s27 }
 0xca4   : > { %1965 = vrot.lane.b32.xlu1 %v6124_v17, %s5296_s2  ;;  %1983 = vrot.lane.b32.xlu0 %v6124_v17, %s7571_s3 }
 0xca5   : > { %1989 = vrot.lane.b32.xlu2 %v6124_v17, %s5271_s24 }
 0xcac   : > { %2060 = vrot.lane.b32.xlu1 %v6124_v17, %s5297_s4  ;;  %1971 = vrot.lane.b32.xlu0 %v6124_v17, %s5299_s5 }
 0xcad   : > { %2054 = vrot.lane.b32.xlu2 %v6124_v17, %s5298_s22 }
 0xcb4   : > { %1929 = vrot.lane.b32.xlu1 %v6124_v17, %s5300_s21  ;;  %1947 = vrot.lane.b32.xlu0 %v6124_v17, %s5302_s25 }
 0xcb5   : > { %1953 = vrot.lane.b32.xlu2 %v6124_v17, %s5301_s28 }
 0xcbc   : > { %1935 = vrot.lane.b32.xlu0 %v6124_v17, %s5303_s9 }
 0xcbd   : > { %1933 = vrot.lane.b32.xlu2 %v6092_v21, %s5303_s9 }
 0xcc7   : > { %v2035_v25 = vpop.permute.xlu2 %2034 }
 0xccf   : > { %v2023_v27 = vpop.permute.xlu2 %2022 }
 0xcd7   : > { %v1982_v24 = vpop.permute.xlu2 %1981 }
 0xcde   : > { %v2017_v28 = vpop.permute.xlu0 %2016  ;;  %v2041_v30 = vpop.permute.xlu1 %2040 }
 0xcdf   : > { %v1970_v55 = vpop.permute.xlu2 %1969  ;;  %v2047_v62 = vsel %vm2046_vm7, %v2035_v25, %v2041_v30  ;;  %v2029_v60 = vsel %vm2028_vm10, %v2017_v28, %v2023_v27 }
 0xce0   : > { %v2050_v15 = vmul.f32 %v6169_v61, %v2047_v62  ;;  %v2032_v62 = vmul.f32 %v6176_v7, %v2029_v60  ;;  %v6191_v60 = vperm.slane %v6166_v3, 3 }
 0xce6   : > { %v2005_v56 = vpop.permute.xlu0 %2004  ;;  %v1999_v29 = vpop.permute.xlu1 %1998 }
 0xce7   : > { %v6160_v47 = vpop.permute.xlu2 %1945 }
 0xcee   : > { %v1964_v34 = vpop.permute.xlu0 %1963  ;;  %v1988_v23 = vpop.permute.xlu1 %1987 }
 0xcef   : > { %v2043_v42 = vpop.permute.xlu2 %2042 }
 0xcf6   : > { %v2059_v63 = vpop.permute.xlu0 %2058  ;;  %v2053_v35 = vpop.permute.xlu1 %2052 }
 0xcf7   : > { %v2001_v54 = vpop.permute.xlu2 %2000 }
 0xcfe   : > { %v6162_v44 = vpop.permute.xlu0 %1927  ;;  %v6164_v48 = vpop.permute.xlu1 %1951 }
 0xcff   : > { %v1990_v20 = vpop.permute.xlu2 %1989 }
 0xd06   : > { %v2019_v2 = vpop.permute.xlu1 %2018  ;;  %v2037_v8 = vpop.permute.xlu0 %2036 }
 0xd07   : > { %v2048_v57 = vsel %vm2046_vm7, %v2037_v8, %v2043_v42  ;;  %v6183_v8 = vperm.slane %v6166_v3, 5  ;;  %v2055_v28 = vpop.permute.xlu2 %2054 }
 0xd08   : > { %v2051_v16 = vmul.f32 %v6169_v61, %v2048_v57 }
 0xd0a   : > { %v2077_v4 = vpack.c.bf16 %v2051_v16, %v2050_v15  ;;  %v2011_v15 = vsel %vm2010_vm12, %v1999_v29, %v2005_v56  ;;  %v2074_v29 = vpack.c.bf16 %v6124_v17, %v6092_v21 }
 0xd0b   : > { %v2014_v27 = vmul.f32 %v6183_v8, %v2011_v15 }
 0xd0c   : > { %2107 = vmatpush.bf16.msra.mxu1 %v2077_v4 }
 0xd0e   : > { %v2007_v58 = vpop.permute.xlu1 %2006  ;;  %v2025_v25 = vpop.permute.xlu0 %2024 }
 0xd0f   : > { %v2012_v30 = vsel %vm2010_vm12, %v2001_v54, %v2007_v58  ;;  %v2030_v42 = vsel %vm2028_vm10, %v2019_v2, %v2025_v25  ;;  %v1993_v25 = vsel %vm1473_vm8, %v1982_v24, %v1988_v23 }
 0xd10   : > { %v2033_v57 = vmul.f32 %v6176_v7, %v2030_v42  ;;  %v2015_v16 = vmul.f32 %v6183_v8, %v2012_v30  ;;  %v6198_v30 = vperm.slane %v6166_v3, 2  ;;  %v1996_v42 = vmul.f32 %v6191_v60, %v1993_v25 }
 0xd12   : > { %v2076_v4 = vpack.c.bf16 %v2033_v57, %v2032_v62  ;;  %v2075_v54 = vpack.c.bf16 %v2015_v16, %v2014_v27  ;;  %v6201_v62 = vld [vmem:[#allocation6 + $0x8] ss:$0 sm:$0xff]  ;;  %v2065_v57 = vsel %vm2064_vm15, %v2053_v35, %v2059_v63  ;;  %v1954_v27 = vpop.permute.xlu2 %1953 }
 0xd13   : > { %v2068_v17 = vmul.f32 %v6201_v62, %v2065_v57 }
 0xd14   : > { %2108 = vmatpush.bf16.msra.mxu1 %v2076_v4 }
 0xd16   : > { %v1966_v1 = vpop.permute.xlu1 %1965  ;;  %v1984_v58 = vpop.permute.xlu0 %1983 }
 0xd17   : > { %v1994_v2 = vsel %vm1473_vm8, %v1984_v58, %v1990_v20  ;;  %v1976_v20 = vsel %vm1975_vm14, %v1964_v34, %v1970_v55  ;;  %v4576_v55 = vld [vmem:[#allocation13 + $0x4] sm:$0xf]  ;;  %v4407_v34 = vld [vmem:[#allocation13 + $0x8] sm:$0xf0] }
 0xd18   : > { %2109 = vmatpush.bf16.msra.mxu1 %v2075_v54  ;;  %v1997_v56 = vmul.f32 %v6191_v60, %v1994_v2  ;;  %v1979_v21 = vmul.f32 %v6198_v30, %v1976_v20  ;;  %v4410_v2 = vor.u32 %v4576_v55, %v4407_v34  ;;  %v4579_v34 = vld [vmem:[#allocation13 + $0x14] sm:$0xf0] }
 0xd1a   : > { %v2073_v15 = vpack.c.bf16 %v1997_v56, %v1996_v42  ;;  %v1934_v20 = vpop.permute.xlu2 %1933 }
 0xd1c   : > { %2110 = vmatpush.bf16.msra.mxu1 %v2074_v29 }
 0xd1e   : > { %v2061_v24 = vpop.permute.xlu1 %2060  ;;  %v1972_v23 = vpop.permute.xlu0 %1971 }
 0xd1f   : > { %v2066_v16 = vsel %vm2064_vm15, %v2055_v28, %v2061_v24  ;;  %v1977_v4 = vsel %vm1975_vm14, %v1966_v1, %v1972_v23  ;;  %v6212_v28 = vperm.slane %v6166_v3, 1  ;;  %v1958_v1 = vsel %vm1957_vm6, %v6160_v47, %v6164_v48 }
 0xd20   : > { %v2069_v58 = vmul.f32 %v6201_v62, %v2066_v16  ;;  %v1980_v54 = vmul.f32 %v6198_v30, %v1977_v4  ;;  %2111 = vmatpush.bf16.msra.mxu1 %v2073_v15  ;;  %v6222_v24 = vperm.slane %v6166_v3, 0  ;;  %v1940_v23 = vsel %vm1939_vm2, %v6162_v44, %v1934_v20  ;;  %v4405_v16 = vld [vmem:[#allocation13] sm:$0xf]  ;;  %v4413_v44 = vld [vmem:[#allocation13 + $0x10] sm:$0xf] }
 0xd21   : > { %v1961_v29 = vmul.f32 %v6212_v28, %v1958_v1 }
 0xd22   : > { %v2078_v63 = vpack.c.bf16 %v2069_v58, %v2068_v17  ;;  %v2072_v35 = vpack.c.bf16 %v1980_v54, %v1979_v21  ;;  %v1943_v4 = vmul.f32 %v6222_v24, %v1940_v23  ;;  %v4577_v17 = vld [vmem:[#allocation13 + $0x4] sm:$0xf0]  ;;  %v4415_v58 = vld [vmem:[#allocation13 + $0x18] sm:$0xf0] }
 0xd23   : > { %v4406_v55 = vor.u32 %v4577_v17, %v4405_v16  ;;  %v5304_v17 = vmov 16.0  }
 0xd24   : > { %2112 = vmatpush.bf16.msra.mxu1 %v2072_v35  ;;  %2133 = vmatpush.bf16.msra.mxu3 %v2078_v63  ;;  %v4414_v63 = vor.u32 %v4579_v34, %v4413_v44  ;;  %4818 = vrcp.f32 %v5304_v17 }
 0xd26   : > { %v1948_v25 = vpop.permute.xlu0 %1947  ;;  %v1930_v47 = vpop.permute.xlu1 %1929 }
 0xd27   : > { %v1959_v56 = vsel %vm1957_vm6, %v1948_v25, %v1954_v27  ;;  %4419 = vmatmul.msk.bf16.vlgmr.msra.gmra.mxu3 %vm1757_vm1, %v4410_v2  ;;  %v4578_v27 = vld [vmem:[#allocation13 + $0x14] sm:$0xf] }
 0xd28   : > { %v1962_v42 = vmul.f32 %v6212_v28, %v1959_v56  ;;  %v4418_v3 = vor.u32 %v4578_v27, %v4415_v58 }
 0xd2a   : > { %v2071_v57 = vpack.c.bf16 %v1962_v42, %v1961_v29  ;;  %v4819_v27 = vpop.eup %4818 }
 0xd2b   : > { %v2158_v58 = vmul.f32 16.0, %v4819_v27  ;;  %vm2162_vm11 = vweird.f32 %v4819_v27 }
 0xd2c   : > { %2113 = vmatpush.bf16.msra.mxu1 %v2071_v57 }
 0xd2e   : > { %v1936_v48 = vpop.permute.xlu0 %1935 }
 0xd2f   : > { %v1941_v15 = vsel %vm1939_vm2, %v1930_v47, %v1936_v48 }
 0xd30   : > { %v1944_v21 = vmul.f32 %v6222_v24, %v1941_v15 }
 0xd32   : > { %v2070_v54 = vpack.c.bf16 %v1944_v21, %v1943_v4 }
 0xd34   : > { %2114 = vmatpush.bf16.msra.mxu1 %v2070_v54  ;;  %v2159_v54 = vsub.f32 1.0, %v2158_v58 }
 0xd37   : > { %2115 = vmatmul.bf16.vlgmr.msra.gmra.mxu1 %v4406_v55  ;;  %4420 = vmatmul.msk.bf16.gmra.mxu3 %vm1757_vm1, %v4418_v3  ;;  %v2160_v55 = vmul.f32 %v4819_v27, %v2159_v54 }
 0xd39   : > { %v2161_v3 = vadd.f32 %v4819_v27, %v2160_v55 }
 0xd3b   : > { %v6234_v44 = vsel %vm2162_vm11, %v4819_v27, %v2161_v3 }
 0xd3c   : > { %7632 = vst [vmem:[#allocation61_spill] sm:$0xff] %v6234_v44 }
 0xd47   : > { %2120 = vmatmul.bf16.gmra.mxu1 %v4414_v63 }
 0xdaa   : > { %v2135_v35 = vpop.f32.mrf.mxu3 }
 0xdb2   : > { %v2137_v56 = vpop.f32.mrf.mxu3 }
 0xdb4   : > { %v2116_v2 = vpop.f32.mrf.mxu1 }
 0xdb5   : > { %v2136_v1 = vadd.f32 %v2135_v35, %v2116_v2 }
 0xdb7   : > { %v2145_v25 = vsel %vm1757_vm1, %v2136_v1, 0.0 }
 0xdb8   : > { %2146 = vadd.xlane.f32.xlu0 %v2145_v25 }
 0xdba   : > { %v2140_v57 = vpop.f32.mrf.mxu3 }
 0xdbc   : > { %v2118_v29 = vpop.f32.mrf.mxu1 }
 0xdbd   : > { %v2138_v42 = vadd.f32 %v2137_v56, %v2118_v29 }
 0xdbf   : > { %v2148_v20 = vsel %vm1757_vm1, %v2138_v42, 0.0 }
 0xdc0   : > { %2149 = vadd.xlane.f32.xlu2 %v2148_v20 }
 0xdc2   : > { %v2142_v15 = vpop.f32.mrf.mxu3 }
 0xdc4   : > { %v2121_v23 = vpop.f32.mrf.mxu1 }
 0xdc5   : > { %v2141_v47 = vadd.f32 %v2140_v57, %v2121_v23 }
 0xdc7   : > { %v2151_v48 = vsel %vm1757_vm1, %v2141_v47, 0.0 }
 0xdc8   : > { %2152 = vadd.xlane.f32.xlu1 %v2151_v48 }
 0xdcc   : > { %v2123_v16 = vpop.f32.mrf.mxu1 }
 0xdcd   : > { %v2143_v4 = vadd.f32 %v2142_v15, %v2123_v16 }
 0xdcf   : > { %v2154_v21 = vsel %vm1757_vm1, %v2143_v4, 0.0 }
 0xdd0   : > { %2155 = vadd.xlane.f32.xlu2 %v2154_v21 }
 0xe2b   : > { %v2147_v34 = vpop.xlane.xlu0 %2146 }
 0xe2c   : > { %v2164_v63 = vmul.f32 %v6234_v44, %v2147_v34 }
 0xe2e   : > { %v2168_v35 = vsub.f32 %v2136_v1, %v2164_v63 }
 0xe30   : > { %v2172_v2 = vmul.f32 %v2168_v35, %v2168_v35 }
 0xe32   : > { %v2176_v25 = vsel %vm1757_vm1, %v2172_v2, 0.0 }
 0xe33   : > { %2177 = vadd.xlane.f32.xlu0 %v2176_v25  ;;  %v2150_v56 = vpop.xlane.xlu2 %2149 }
 0xe34   : > { %v2165_v29 = vmul.f32 %v6234_v44, %v2150_v56 }
 0xe36   : > { %v6239_v20 = vsub.f32 %v2138_v42, %v2165_v29 }
 0xe38   : > { %v2173_v57 = vmul.f32 %v6239_v20, %v6239_v20 }
 0xe3a   : > { %v2179_v23 = vsel %vm1757_vm1, %v2173_v57, 0.0 }
 0xe3b   : > { %2180 = vadd.xlane.f32.xlu1 %v2179_v23  ;;  %v2153_v48 = vpop.xlane.xlu1 %2152 }
 0xe3c   : > { %v2166_v15 = vmul.f32 %v6234_v44, %v2153_v48 }
 0xe3e   : > { %v6245_v16 = vsub.f32 %v2141_v47, %v2166_v15 }
 0xe40   : > { %v2174_v1 = vmul.f32 %v6245_v16, %v6245_v16 }
 0xe42   : > { %v2182_v21 = vsel %vm1757_vm1, %v2174_v1, 0.0 }
 0xe43   : > { %2183 = vadd.xlane.f32.xlu1 %v2182_v21  ;;  %v2156_v17 = vpop.xlane.xlu2 %2155 }
 0xe44   : > { %v2167_v42 = vmul.f32 %v6234_v44, %v2156_v17 }
 0xe46   : > { %v6251_v27 = vsub.f32 %v2143_v4, %v2167_v42 }
 0xe48   : > { %v2175_v58 = vmul.f32 %v6251_v27, %v6251_v27 }
 0xe4a   : > { %v2185_v54 = vsel %vm1757_vm1, %v2175_v58, 0.0 }
 0xe4b   : > { %2186 = vadd.xlane.f32.xlu2 %v2185_v54 }
 0xea6   : > { %v2178_v55 = vpop.xlane.xlu0 %2177 }
 0xea7   : > { %v2188_v47 = vmul.f32 %v2178_v55, %v6234_v44 }
 0xea9   : > { %v2192_v3 = vadd.f32 1e-05, %v2188_v47 }
 0xeab   : > { %4820 = vrsqrt.f32 %v2192_v3  ;;  %vm2202_vm5 = vweird.f32 %v2192_v3 }
 0xeae   : > { %v2181_v56 = vpop.xlane.xlu1 %2180 }
 0xeaf   : > { %v2189_v4 = vmul.f32 %v2181_v56, %v6234_v44 }
 0xeb1   : > { %v4821_v34 = vpop.eup %4820  ;;  %v2193_v15 = vadd.f32 1e-05, %v2189_v4 }
 0xeb2   : > { %v2197_v63 = vmul.f32 %v4821_v34, %v2192_v3  ;;  %vm2203_vm11 = vweird.f32 %v4821_v34 }
 0xeb3   : > { %vm2204_vm4 = vmor %vm2202_vm5, %vm2203_vm11  ;;  %4822 = vrsqrt.f32 %v2193_v15  ;;  %vm2212_vm5 = vweird.f32 %v2193_v15 }
 0xeb4   : > { %v2198_v2 = vmul.f32 %v4821_v34, %v2197_v63 }
 0xeb6   : > { %v2199_v25 = vmul.f32 0.5, %v2198_v2  ;;  %v2184_v55 = vpop.xlane.xlu1 %2183 }
 0xeb7   : > { %v2190_v3 = vmul.f32 %v2184_v55, %v6234_v44 }
 0xeb8   : > { %v2200_v29 = vsub.f32 1.5, %v2199_v25 }
 0xeb9   : > { %v4823_v17 = vpop.eup %4822  ;;  %v2194_v63 = vadd.f32 1e-05, %v2190_v3 }
 0xeba   : > { %v2201_v57 = vmul.f32 %v4821_v34, %v2200_v29  ;;  %v2207_v42 = vmul.f32 %v4823_v17, %v2193_v15 }
 0xebb   : > { %4824 = vrsqrt.f32 %v2194_v63 }
 0xebc   : > { %v2205_v23 = vsel %vm2204_vm4, %v4821_v34, %v2201_v57  ;;  %vm2213_vm4 = vweird.f32 %v4823_v17 }
 0xebd   : > { %v2236_v48 = vmul.f32 %v2205_v23, %v2168_v35  ;;  %v2208_v35 = vmul.f32 %v4823_v17, %v2207_v42 }
 0xebe   : > { %v2187_v42 = vpop.xlane.xlu2 %2186 }
 0xebf   : > { %vm2240_vm13 = vcmp.ge.f32.partialorder %v2236_v48, 0.0  ;;  %v2244_v1 = vmul.f32 0.2, %v2236_v48  ;;  %v2209_v58 = vmul.f32 0.5, %v2208_v35  ;;  %v2191_v35 = vmul.f32 %v2187_v42, %v6234_v44 }
 0xec1   : > { %v6258_v21 = vsel %vm2240_vm13, %v2236_v48, %v2244_v1  ;;  %v2210_v54 = vsub.f32 1.5, %v2209_v58  ;;  %vm2214_vm13 = vmor %vm2212_vm5, %vm2213_vm4  ;;  %v4825_v56 = vpop.eup %4824  ;;  %vm2222_vm5 = vweird.f32 %v2194_v63 }
 0xec2   : > { %7633 = vst [vmem:[#allocation62_spill] sm:$0xff] %v6258_v21  ;;  %2364 = vrot.lane.b32.xlu0 %v6258_v21, %s5271_s24  ;;  %2320 = vrot.lane.b32.xlu1 %v6258_v21, %s5296_s2  ;;  %vm2223_vm4 = vweird.f32 %v4825_v56 }
 0xec3   : > { %2352 = vrot.lane.b32.xlu2 %v6258_v21, %s7571_s3  ;;  %v2211_v47 = vmul.f32 %v4823_v17, %v2210_v54 }
 0xec5   : > { %v2215_v34 = vsel %vm2214_vm13, %v4823_v17, %v2211_v47  ;;  %vm2224_vm13 = vmor %vm2222_vm5, %vm2223_vm4 }
 0xec6   : > { %v2237_v2 = vmul.f32 %v2215_v34, %v6239_v20  ;;  %v2217_v20 = vmul.f32 %v4825_v56, %v2194_v63 }
 0xec8   : > { %v2245_v25 = vmul.f32 0.2, %v2237_v2  ;;  %vm2241_vm11 = vcmp.ge.f32.partialorder %v2237_v2, 0.0  ;;  %v2218_v4 = vmul.f32 %v4825_v56, %v2217_v20 }
 0xeca   : > { %2460 = vrot.lane.b32.xlu0 %v6258_v21, %s5293_s20  ;;  %2416 = vrot.lane.b32.xlu1 %v6258_v21, %s5292_s6  ;;  %v6292_v29 = vsel %vm2241_vm11, %v2237_v2, %v2245_v25  ;;  %v2219_v57 = vmul.f32 0.5, %v2218_v4 }
 0xecb   : > { %2448 = vrot.lane.b32.xlu2 %v6258_v21, %s5294_s30  ;;  %7634 = vst [vmem:[#allocation63_spill] sm:$0xff] %v6292_v29 }
 0xecc   : > { %v2220_v23 = vsub.f32 1.5, %v2219_v57 }
 0xece   : > { %v2221_v48 = vmul.f32 %v4825_v56, %v2220_v23 }
 0xed0   : > { %v2225_v15 = vsel %vm2224_vm13, %v4825_v56, %v2221_v48 }
 0xed1   : > { %v2238_v1 = vmul.f32 %v2225_v15, %v6245_v16  ;;  %v2195_v16 = vadd.f32 1e-05, %v2191_v35 }
 0xed2   : > { %2288 = vrot.lane.b32.xlu0 %v6258_v21, %s5302_s25  ;;  %2300 = vrot.lane.b32.xlu1 %v6258_v21, %s5301_s28 }
 0xed3   : > { %2332 = vrot.lane.b32.xlu2 %v6258_v21, %s5299_s5  ;;  %v2246_v17 = vmul.f32 0.2, %v2238_v1  ;;  %vm2242_vm11 = vcmp.ge.f32.partialorder %v2238_v1, 0.0  ;;  %4826 = vrsqrt.f32 %v2195_v16  ;;  %vm2232_vm5 = vweird.f32 %v2195_v16 }
 0xed5   : > { %v6320_v58 = vsel %vm2242_vm11, %v2238_v1, %v2246_v17 }
 0xed6   : > { %7635 = vst [vmem:[#allocation64_spill] sm:$0xff] %v6320_v58 }
 0xed9   : > { %v4827_v54 = vpop.eup %4826 }
 0xeda   : > { %2384 = vrot.lane.b32.xlu0 %v6258_v21, %s5270_s27  ;;  %2396 = vrot.lane.b32.xlu1 %v6258_v21, %s7569_s29  ;;  %v2227_v55 = vmul.f32 %v4827_v54, %v2195_v16  ;;  %vm2233_vm4 = vweird.f32 %v4827_v54 }
 0xedb   : > { %2428 = vrot.lane.b32.xlu2 %v6258_v21, %s5295_s12  ;;  %vm2234_vm13 = vmor %vm2232_vm5, %vm2233_vm4 }
 0xedc   : > { %v2228_v3 = vmul.f32 %v4827_v54, %v2227_v55 }
 0xede   : > { %v2229_v34 = vmul.f32 0.5, %v2228_v3 }
 0xee0   : > { %v2230_v2 = vsub.f32 1.5, %v2229_v34 }
 0xee2   : > { %2480 = vrot.lane.b32.xlu0 %v6258_v21, %s5298_s22  ;;  %2256 = vrot.lane.b32.xlu1 %v6258_v21, %s5300_s21  ;;  %v2231_v25 = vmul.f32 %v4827_v54, %v2230_v2 }
 0xee3   : > { %2268 = vrot.lane.b32.xlu2 %v6258_v21, %s5303_s9 }
 0xee4   : > { %v2235_v20 = vsel %vm2234_vm13, %v4827_v54, %v2231_v25 }
 0xee5   : > { %v2239_v4 = vmul.f32 %v2235_v20, %v6251_v27 }
 0xee7   : > { %v2247_v48 = vmul.f32 0.2, %v2239_v4  ;;  %vm2243_vm11 = vcmp.ge.f32.partialorder %v2239_v4, 0.0 }
 0xee9   : > { %v6371_v1 = vsel %vm2243_vm11, %v2239_v4, %v2247_v48 }
 0xeea   : > { %2322 = vrot.lane.b32.xlu0 %v6292_v29, %s5296_s2  ;;  %2354 = vrot.lane.b32.xlu1 %v6292_v29, %s7571_s3  ;;  %7636 = vst [vmem:[#allocation65_spill] sm:$0xff] %v6371_v1 }
 0xeeb   : > { %2366 = vrot.lane.b32.xlu2 %v6292_v29, %s5271_s24 }
 0xef2   : > { %2418 = vrot.lane.b32.xlu0 %v6292_v29, %s5292_s6  ;;  %2450 = vrot.lane.b32.xlu1 %v6292_v29, %s5294_s30 }
 0xef3   : > { %2462 = vrot.lane.b32.xlu2 %v6292_v29, %s5293_s20 }
 0xefa   : > { %2302 = vrot.lane.b32.xlu0 %v6292_v29, %s5301_s28  ;;  %2334 = vrot.lane.b32.xlu1 %v6292_v29, %s5299_s5 }
 0xefb   : > { %2290 = vrot.lane.b32.xlu2 %v6292_v29, %s5302_s25 }
 0xf02   : > { %2398 = vrot.lane.b32.xlu0 %v6292_v29, %s7569_s29  ;;  %2430 = vrot.lane.b32.xlu1 %v6292_v29, %s5295_s12 }
 0xf03   : > { %2386 = vrot.lane.b32.xlu2 %v6292_v29, %s5270_s27 }
 0xf0a   : > { %2258 = vrot.lane.b32.xlu0 %v6292_v29, %s5300_s21  ;;  %2270 = vrot.lane.b32.xlu1 %v6292_v29, %s5303_s9 }
 0xf0b   : > { %2356 = vrot.lane.b32.xlu2 %v6320_v58, %s7571_s3 }
 0xf12   : > { %2324 = vrot.lane.b32.xlu0 %v6320_v58, %s5296_s2  ;;  %2368 = vrot.lane.b32.xlu1 %v6320_v58, %s5271_s24 }
 0xf13   : > { %2464 = vrot.lane.b32.xlu2 %v6320_v58, %s5293_s20 }
 0xf1a   : > { %2420 = vrot.lane.b32.xlu0 %v6320_v58, %s5292_s6  ;;  %2452 = vrot.lane.b32.xlu1 %v6320_v58, %s5294_s30 }
 0xf1b   : > { %2292 = vrot.lane.b32.xlu2 %v6320_v58, %s5302_s25 }
 0xf1d   : > { %v6340_v47 = vpop.permute.xlu2 %2352 }
 0xf22   : > { %2304 = vrot.lane.b32.xlu0 %v6320_v58, %s5301_s28  ;;  %2336 = vrot.lane.b32.xlu1 %v6320_v58, %s5299_s5 }
 0xf23   : > { %2388 = vrot.lane.b32.xlu2 %v6320_v58, %s5270_s27 }
 0xf25   : > { %v6348_v63 = vpop.permute.xlu2 %2448 }
 0xf2a   : > { %2400 = vrot.lane.b32.xlu0 %v6320_v58, %s7569_s29  ;;  %2432 = vrot.lane.b32.xlu1 %v6320_v58, %s5295_s12 }
 0xf2b   : > { %2272 = vrot.lane.b32.xlu2 %v6320_v58, %s5303_s9 }
 0xf2d   : > { %v6356_v56 = vpop.permute.xlu2 %2332 }
 0xf32   : > { %2496 = vrot.lane.b32.xlu0 %v6320_v58, %s5297_s4  ;;  %2260 = vrot.lane.b32.xlu1 %v6320_v58, %s5300_s21 }
 0xf33   : > { %2484 = vrot.lane.b32.xlu2 %v6320_v58, %s5298_s22 }
 0xf34   : > { %v6365_v57 = vpop.permute.xlu0 %2364  ;;  %v6367_v23 = vpop.permute.xlu1 %2320 }
 0xf35   : > { %v6369_v15 = vpop.permute.xlu2 %2428 }
 0xf3a   : > { %2466 = vrot.lane.b32.xlu1 %v6371_v1, %s5293_s20  ;;  %2358 = vrot.lane.b32.xlu0 %v6371_v1, %s7571_s3  ;;  %s7664_s3 = sld [smem:[#allocation76_spill]] }
 0xf3b   : > { %2326 = vrot.lane.b32.xlu2 %v6371_v1, %s5296_s2  ;;  %s7657_s2 = smov 72  }
 0xf3c   : > { %v6379_v27 = vpop.permute.xlu0 %2460  ;;  %v6381_v17 = vpop.permute.xlu1 %2416 }
 0xf3d   : > { %v6383_v42 = vpop.permute.xlu2 %2268 }
 0xf3e   : > { %7637 = vst [vmem:[#allocation66_spill] sm:$0xff] %v6383_v42 }
 0xf42   : > { %2294 = vrot.lane.b32.xlu1 %v6371_v1, %s5302_s25  ;;  %2370 = vrot.lane.b32.xlu0 %v6371_v1, %s5271_s24  ;;  %s7653_s25 = smov 56  }
 0xf43   : > { %2422 = vrot.lane.b32.xlu2 %v6371_v1, %s5292_s6  ;;  %s7660_s6 = smov 9  }
 0xf44   : > { %v6391_v35 = vpop.permute.xlu0 %2288  ;;  %v6393_v16 = vpop.permute.xlu1 %2300 }
 0xf45   : > { %v2367_v54 = vpop.permute.xlu2 %2366 }
 0xf4a   : > { %2390 = vrot.lane.b32.xlu1 %v6371_v1, %s5270_s27  ;;  %2454 = vrot.lane.b32.xlu0 %v6371_v1, %s5294_s30 }
 0xf4b   : > { %2306 = vrot.lane.b32.xlu2 %v6371_v1, %s5301_s28  ;;  %s7658_s28 = smov 73  }
 0xf4c   : > { %v6401_v55 = vpop.permute.xlu0 %2384  ;;  %v6403_v3 = vpop.permute.xlu1 %2396 }
 0xf4d   : > { %7638 = vst [vmem:[#allocation67_spill] sm:$0xff] %v6401_v55  ;;  %v6405_v34 = vpop.permute.xlu2 %2462 }
 0xf52   : > { %2274 = vrot.lane.b32.xlu1 %v6371_v1, %s5303_s9  ;;  %2338 = vrot.lane.b32.xlu0 %v6371_v1, %s5299_s5  ;;  %s7655_s9 = smov 8   ;;  %s7656_s5 = smov 121  }
 0xf53   : > { %2402 = vrot.lane.b32.xlu2 %v6371_v1, %s7569_s29  ;;  %s7666_s29 = smov 119  }
 0xf54   : > { %v6413_v2 = vpop.permute.xlu0 %2480  ;;  %v6415_v25 = vpop.permute.xlu1 %2256 }
 0xf55   : > { %7639 = vst [vmem:[#allocation68_spill] sm:$0xff] %v6413_v2  ;;  %v6417_v20 = vpop.permute.xlu2 %2290  ;;  %v2376_v2 = vsel %vm1473_vm8, %v6340_v47, %v6365_v57 }
 0xf56   : > { %7640 = vst [vmem:[#allocation69_spill] sm:$0xff] %v6415_v25 }
 0xf5a   : > { %2486 = vrot.lane.b32.xlu1 %v6371_v1, %s5298_s22  ;;  %2434 = vrot.lane.b32.xlu0 %v6371_v1, %s5295_s12  ;;  %s7667_s12 = smov 55  }
 0xf5b   : > { %2498 = vrot.lane.b32.xlu2 %v6371_v1, %s5297_s4 }
 0xf5c   : > { %v6425_v4 = vpop.permute.xlu0 %2322  ;;  %v2355_v48 = vpop.permute.xlu1 %2354 }
 0xf5d   : > { %v6427_v38 = vpop.permute.xlu2 %2386 }
 0xf62   : > { %2492 = vrot.lane.b32.xlu1 %v6258_v21, %s5297_s4  ;;  %2262 = vrot.lane.b32.xlu0 %v6371_v1, %s5300_s21  ;;  %s7654_s21 = smov 120  }
 0xf63   : > { %2482 = vrot.lane.b32.xlu2 %v6292_v29, %s5298_s22  ;;  %s7659_s22 = smov 57  }
 0xf64   : > { %v6435_v37 = vpop.permute.xlu0 %2418  ;;  %v2451_v19 = vpop.permute.xlu1 %2450 }
 0xf65   : > { %v2357_v18 = vpop.permute.xlu2 %2356 }
 0xf6a   : > { %2494 = vrot.lane.b32.xlu0 %v6292_v29, %s5297_s4  ;;  %v2377_v29 = vsel %vm1473_vm8, %v2355_v48, %v2367_v54  ;;  %s7652_s4 = smov 7  }
 0xf6b   : > { %v2381_v42 = vmul.f32 %v2377_v29, %v6191_v60 }
 0xf6c   : > { %v6439_v9 = vpop.permute.xlu0 %2302  ;;  %v2335_v5 = vpop.permute.xlu1 %2334 }
 0xf6d   : > { %v2465_v53 = vpop.permute.xlu2 %2464 }
 0xf74   : > { %v6441_v52 = vpop.permute.xlu0 %2398  ;;  %v6443_v51 = vpop.permute.xlu1 %2430 }
 0xf75   : > { %v6445_v40 = vpop.permute.xlu2 %2292 }
 0xf7c   : > { %v6447_v50 = vpop.permute.xlu0 %2258  ;;  %v6449_v39 = vpop.permute.xlu1 %2270 }
 0xf7d   : > { %v6451_v11 = vpop.permute.xlu2 %2388 }
 0xf84   : > { %v2325_v13 = vpop.permute.xlu0 %2324  ;;  %v2369_v12 = vpop.permute.xlu1 %2368 }
 0xf85   : > { %v6453_v33 = vpop.permute.xlu2 %2272  ;;  %v2378_v32 = vsel %vm1473_vm8, %v2357_v18, %v2369_v12  ;;  %v2380_v12 = vmul.f32 %v2376_v2, %v6191_v60 }
 0xf86   : > { %v2382_v1 = vmul.f32 %v2378_v32, %v6191_v60  ;;  %v2473_v32 = vsel %vm2046_vm7, %v2451_v19, %v6405_v34 }
 0xf87   : > { %v2477_v29 = vmul.f32 %v2473_v32, %v6169_v61 }
 0xf8c   : > { %v2421_v10 = vpop.permute.xlu0 %2420  ;;  %v2453_v6 = vpop.permute.xlu1 %2452 }
 0xf8d   : > { %v2485_v43 = vpop.permute.xlu2 %2484  ;;  %v2474_v18 = vsel %vm2046_vm7, %v2453_v6, %v2465_v53 }
 0xf94   : > { %v2305_v31 = vpop.permute.xlu0 %2304  ;;  %v2337_v46 = vpop.permute.xlu1 %2336 }
 0xf95   : > { %v2327_v0 = vpop.permute.xlu2 %2326  ;;  %v2346_v19 = vsel %vm1975_vm14, %v2325_v13, %v2337_v46 }
 0xf96   : > { %v2350_v34 = vmul.f32 %v2346_v19, %v6198_v30 }
 0xf9c   : > { %v6455_v45 = vpop.permute.xlu0 %2400  ;;  %v2433_v49 = vpop.permute.xlu1 %2432 }
 0xf9d   : > { %v2423_v36 = vpop.permute.xlu2 %2422 }
 0xfa4   : > { %v2497_v14 = vpop.permute.xlu0 %2496  ;;  %v6457_v41 = vpop.permute.xlu1 %2260 }
 0xfa5   : > { %v2307_v25 = vpop.permute.xlu2 %2306 }
 0xfac   : > { %v2467_v22 = vpop.permute.xlu1 %2466  ;;  %v2359_v59 = vpop.permute.xlu0 %2358 }
 0xfad   : > { %v2403_v53 = vpop.permute.xlu2 %2402 }
 0xfb4   : > { %v2295_v26 = vpop.permute.xlu1 %2294  ;;  %v2371_v44 = vpop.permute.xlu0 %2370 }
 0xfb5   : > { %v2379_v21 = vsel %vm1473_vm8, %v2359_v59, %v2371_v44  ;;  %v2518_v59 = vpack.c.bf16 %v2381_v42, %v2380_v12  ;;  %v2345_v42 = vsel %vm1975_vm14, %v6425_v4, %v2335_v5  ;;  %v2315_v46 = vsel %vm1957_vm6, %v2295_v26, %v2307_v25  ;;  %v2499_v12 = vpop.permute.xlu2 %2498 }
 0xfb6   : > { %v2383_v58 = vmul.f32 %v2379_v21, %v6191_v60  ;;  %v2478_v21 = vmul.f32 %v2474_v18, %v6169_v61  ;;  %v2472_v60 = vsel %vm2046_vm7, %v6348_v63, %v6379_v27  ;;  %v2349_v27 = vmul.f32 %v2345_v42, %v6198_v30  ;;  %v4581_v42 = vld [vmem:[%s7438_s13 + $0x8] sm:$0xf0] }
 0xfb7   : > { %v2314_v5 = vsel %vm1957_vm6, %v6445_v40, %v2305_v31  ;;  %v2506_v4 = vsel %vm2064_vm15, %v2485_v43, %v2497_v14  ;;  %v2440_v25 = vsel %vm2028_vm10, %v6381_v17, %v6369_v15  ;;  %v2410_v15 = vsel %vm2010_vm12, %v6451_v11, %v6455_v45 }
 0xfb8   : > { %v2519_v55 = vpack.c.bf16 %v2383_v58, %v2382_v1  ;;  %v2476_v58 = vmul.f32 %v2472_v60, %v6169_v61  ;;  %v2318_v40 = vmul.f32 %v2314_v5, %v6212_v28  ;;  %v2510_v14 = vmul.f32 %v6201_v62, %v2506_v4  ;;  %v4431_v5 = vld [vmem:[%s7438_s13 + $0x8] sm:$0xf]  ;;  %v7645_v4 = vld [vmem:[#allocation64_spill] sm:$0xff] }
 0xfb9   : > { %v2282_v17 = vsel %vm1939_vm2, %v6457_v41, %v6453_v33  ;;  %v2414_v45 = vmul.f32 %v2410_v15, %v6183_v8 }
 0xfba   : > { %2575 = vmatpush.bf16.msrb.mxu2 %v2519_v55  ;;  %v2526_v1 = vpack.c.bf16 %v2477_v29, %v2476_v58  ;;  %v2286_v33 = vmul.f32 %v2282_v17, %v6222_v24  ;;  %v7641_v29 = vld [vmem:[#allocation67_spill] sm:$0xff] }
 0xfbc   : > { %v2391_v54 = vpop.permute.xlu1 %2390  ;;  %v2455_v48 = vpop.permute.xlu0 %2454 }
 0xfbd   : > { %v2475_v44 = vsel %vm2046_vm7, %v2455_v48, %v2467_v22  ;;  %vm2568_vm7 = vcmask 261120  }
 0xfbe   : > { %v2479_v47 = vmul.f32 %v2475_v44, %v6169_v61  ;;  %2576 = vmatpush.bf16.msrb.mxu2 %v2518_v59  ;;  %v2344_v61 = vsel %vm1975_vm14, %v6367_v23, %v6356_v56  ;;  %v2313_v56 = vsel %vm1957_vm6, %v6417_v20, %v6439_v9  ;;  %v2319_v23 = vmul.f32 %v2315_v46, %v6212_v28 }
 0xfbf   : > { %v2348_v2 = vmul.f32 %v2344_v61, %v6198_v30  ;;  %v2411_v44 = vsel %vm2010_vm12, %v2391_v54, %v2403_v53  ;;  %v7642_v53 = vld [vmem:[#allocation66_spill] sm:$0xff] }
 0xfc0   : > { %v2527_v6 = vpack.c.bf16 %v2479_v47, %v2478_v21  ;;  %v2515_v59 = vpack.c.bf16 %v2319_v23, %v2318_v40  ;;  %v2444_v21 = vmul.f32 %v2440_v25, %v6176_v7 }
 0xfc1   : > { %v2516_v26 = vpack.c.bf16 %v2349_v27, %v2348_v2 }
 0xfc2   : > { %2594 = vmatpush.bf16.msrb.mxu0 %v2527_v6  ;;  %v2408_v6 = vsel %vm2010_vm12, %v7641_v29, %v6403_v3  ;;  %v4423_v3 = vld [vmem:[%s7438_s13] sm:$0xf] }
 0xfc4   : > { %v2275_v57 = vpop.permute.xlu1 %2274  ;;  %v2339_v22 = vpop.permute.xlu0 %2338 }
 0xfc5   : > { %v2347_v55 = vsel %vm1975_vm14, %v2327_v0, %v2339_v22  ;;  %v2442_v0 = vsel %vm2028_vm10, %v2421_v10, %v2433_v49  ;;  %v2412_v22 = vmul.f32 %v2408_v6, %v6183_v8 }
 0xfc6   : > { %v2351_v63 = vmul.f32 %v2347_v55, %v6198_v30  ;;  %2595 = vmatpush.bf16.msrb.mxu0 %v2526_v1  ;;  %v2441_v30 = vsel %vm2028_vm10, %v6435_v37, %v6443_v51  ;;  %v2446_v49 = vmul.f32 %v2442_v0, %v6176_v7  ;;  %v2312_v37 = vsel %vm1957_vm6, %v6391_v35, %v6393_v16  ;;  %v7644_v55 = vld [vmem:[#allocation68_spill] sm:$0xff]  ;;  %v4582_v0 = vld [vmem:[%s7438_s13 + $0x10] sm:$0xf0] }
 0xfc7   : > { %v2317_v51 = vmul.f32 %v2313_v56, %v6212_v28  ;;  %v2316_v47 = vmul.f32 %v2312_v37, %v6212_v28  ;;  %v2415_v35 = vmul.f32 %v2411_v44, %v6183_v8  ;;  %v2281_v28 = vsel %vm1939_vm2, %v6447_v50, %v6449_v39  ;;  %v4583_v37 = vld [vmem:[%s7438_s13 + $0x1c] sm:$0xf] }
 0xfc8   : > { %v2517_v13 = vpack.c.bf16 %v2351_v63, %v2350_v34  ;;  %v2285_v50 = vmul.f32 %v2281_v28, %v6222_v24  ;;  %v2483_v63 = vpop.permute.xlu2 %2482 }
 0xfc9   : > { %v2514_v60 = vpack.c.bf16 %v2317_v51, %v2316_v47  ;;  %v4437_v51 = vld [vmem:[%s7438_s13 + $0x24] sm:$0xf0] }
 0xfca   : > { %2577 = vmatpush.bf16.msrb.mxu2 %v2517_v13 }
 0xfcc   : > { %v2487_v18 = vpop.permute.xlu1 %2486  ;;  %v2435_v48 = vpop.permute.xlu0 %2434 }
 0xfcd   : > { %v2507_v10 = vsel %vm2064_vm15, %v2487_v18, %v2499_v12  ;;  %v2443_v31 = vsel %vm2028_vm10, %v2423_v36, %v2435_v48  ;;  %v2445_v36 = vmul.f32 %v2441_v30, %v6176_v7  ;;  %v7646_v12 = vld [vmem:[#allocation65_spill] sm:$0xff]  ;;  %v4432_v18 = vor.u32 %v4582_v0, %v4431_v5  ;;  %v4425_v48 = vld [vmem:[%s7438_s13 + $0xc] sm:$0xf0]  ;;  %v7648_v30 = vld [vmem:[#allocation63_spill] sm:$0xff] }
 0xfce   : > { %v2511_v9 = vmul.f32 %v6201_v62, %v2507_v10  ;;  %v2447_v43 = vmul.f32 %v2443_v31, %v6176_v7  ;;  %2578 = vmatpush.bf16.msrb.mxu2 %v2516_v26  ;;  %v2409_v7 = vsel %vm2010_vm12, %v6427_v38, %v6441_v52  ;;  %v7643_v52 = vld [vmem:[#allocation69_spill] sm:$0xff]  ;;  %v2521_v56 = vpack.c.bf16 %v7646_v12, %v7645_v4  ;;  %v7647_v26 = vld [vmem:[#allocation62_spill] sm:$0xff]  ;;  %v4435_v31 = vld [vmem:[%s7438_s13 + $0x18] sm:$0xf] }
 0xfcf   : > { %v2524_v54 = vpack.c.bf16 %v2445_v36, %v2444_v21  ;;  %v2280_v38 = vsel %vm1939_vm2, %v7643_v52, %v7642_v53  ;;  %v2413_v39 = vmul.f32 %v2409_v7, %v6183_v8  ;;  %v2520_v40 = vpack.c.bf16 %v7648_v30, %v7647_v26  ;;  %v7650_v12 = vld [vmem:[#allocation57_spill] sm:$0xff] }
 0xfd0   : > { %v2529_v20 = vpack.c.bf16 %v2511_v9, %v2510_v14  ;;  %v2525_v32 = vpack.c.bf16 %v2447_v43, %v2446_v49  ;;  %v2284_v1 = vmul.f32 %v2280_v38, %v6222_v24  ;;  %v4584_v49 = vld [vmem:[%s7438_s13 + $0x20] sm:$0xf0]  ;;  %v4443_v9 = vld [vmem:[%s7438_s13 + $0x20] sm:$0xf]  ;;  %v4585_v43 = vld [vmem:[%s7438_s13 + $0x28] sm:$0xf0]  ;;  %v4440_v36 = vor.u32 %v4583_v37, %v4437_v51 }
 0xfd1   : > { %v2522_v13 = vpack.c.bf16 %v2413_v39, %v2412_v22  ;;  %v4436_v14 = vor.u32 %v4584_v49, %v4435_v31  ;;  %v4444_v25 = vor.u32 %v4585_v43, %v4443_v9 }
 0xfd2   : > { %2579 = vmatpush.bf16.msrb.mxu2 %v2515_v59  ;;  %2596 = vmatpush.bf16.msrb.mxu0 %v2525_v32  ;;  %v2512_v27 = vpack.c.bf16 %v2285_v50, %v2284_v1 }
 0xfd3   : > { %2619 = vmatpush.bf16.msrb.mxu3 %v2529_v20 }
 0xfd4   : > { %v2263_v16 = vpop.permute.xlu0 %2262  ;;  %v2493_v58 = vpop.permute.xlu1 %2492 }
 0xfd5   : > { %v2283_v11 = vsel %vm1939_vm2, %v2263_v16, %v2275_v57  ;;  %v2523_v57 = vpack.c.bf16 %v2415_v35, %v2414_v45  ;;  %v2504_v34 = vsel %vm2064_vm15, %v7644_v55, %v2493_v58  ;;  %v7649_v58 = vld [vmem:[#allocation61_spill] sm:$0xff] }
 0xfd6   : > { %v2287_v41 = vmul.f32 %v2283_v11, %v6222_v24  ;;  %2580 = vmatpush.bf16.msrb.mxu2 %v2514_v60  ;;  %2597 = vmatpush.bf16.msrb.mxu0 %v2524_v54  ;;  %v4424_v24 = vor.u32 %v4581_v42, %v4423_v3  ;;  %v2508_v46 = vmul.f32 %v6201_v62, %v2504_v34 }
 0xfd8   : > { %v2513_v19 = vpack.c.bf16 %v2287_v41, %v2286_v33 }
 0xfda   : > { %2581 = vmatpush.bf16.msrb.mxu2 %v2513_v19  ;;  %2598 = vmatpush.bf16.msrb.mxu0 %v2523_v57 }
 0xfdc   : > { %v2495_v61 = vpop.permute.xlu0 %2494 }
 0xfdd   : > { %v2505_v8 = vsel %vm2064_vm15, %v2483_v63, %v2495_v61 }
 0xfde   : > { %v2509_v2 = vmul.f32 %v6201_v62, %v2505_v8  ;;  %2582 = vmatpush.bf16.msrb.mxu2 %v2512_v27  ;;  %2599 = vmatpush.bf16.msrb.mxu0 %v2522_v13  ;;  %v4580_v62 = vld [vmem:[%s7438_s13 + $0x4] sm:$0xf] }
 0xfdf   : > { %v4428_v10 = vor.u32 %v4580_v62, %v4425_v48 }
 0xfe0   : > { %v2528_v23 = vpack.c.bf16 %v2509_v2, %v2508_v46 }
 0xfe1   : > { %2583 = vmatmul.bf16.vlgmr.msrb.gmra.mxu2 %v4424_v24 }
 0xfe2   : > { %2600 = vmatpush.bf16.msrb.mxu0 %v2521_v56  ;;  %2620 = vmatpush.bf16.msrb.mxu3 %v2528_v23  ;;  %v7651_v56 = vld [vmem:[#allocation58_spill] sm:$0xff] }
 0xfe5   : > { %4445 = vmatmul.msk.bf16.vlgmr.msrb.gmra.mxu3 %vm2568_vm7, %v4432_v18 }
 0xfe6   : > { %2601 = vmatpush.bf16.msrb.mxu0 %v2520_v40 }
 0xfe9   : > { %2602 = vmatmul.bf16.vlgmr.msrb.gmra.mxu0 %v4428_v10 }
 0xff1   : > { %2588 = vmatmul.bf16.gmra.mxu2 %v4436_v14 }
 0xff5   : > { %4446 = vmatmul.msk.bf16.gmra.mxu3 %vm2568_vm7, %v4444_v25 }
 0xff9   : > { %2607 = vmatmul.bf16.gmra.mxu0 %v4440_v36 }
0x1064   : > { %v2584_v20 = vpop.f32.mrf.mxu2 }
0x1066   : > { %v2603_v59 = vpop.f32.mrf.mxu0 }
0x1067   : > { %v2604_v32 = vadd.f32 %v2603_v59, %v2584_v20 }
0x1068   : > { %v2622_v44 = vpop.f32.mrf.mxu3 }
0x1069   : > { %v2623_v21 = vadd.f32 %v2622_v44, %v2604_v32 }
0x106b   : > { %v2632_v47 = vsel %vm1757_vm1, %v2623_v21, 0.0 }
0x106c   : > { %v2586_v15 = vpop.f32.mrf.mxu2  ;;  %2633 = vadd.xlane.f32.xlu0 %v2632_v47 }
0x106e   : > { %v2605_v17 = vpop.f32.mrf.mxu0 }
0x106f   : > { %v2606_v11 = vadd.f32 %v2605_v17, %v2586_v15 }
0x1070   : > { %v2624_v35 = vpop.f32.mrf.mxu3 }
0x1071   : > { %v2625_v29 = vadd.f32 %v2624_v35, %v2606_v11 }
0x1073   : > { %v2635_v39 = vsel %vm1757_vm1, %v2625_v29, 0.0 }
0x1074   : > { %v2589_v16 = vpop.f32.mrf.mxu2 }
0x1076   : > { %v2608_v60 = vpop.f32.mrf.mxu0 }
0x1077   : > { %v2609_v54 = vadd.f32 %v2608_v60, %v2589_v16 }
0x1078   : > { %v2627_v7 = vpop.f32.mrf.mxu3 }
0x1079   : > { %v2628_v28 = vadd.f32 %v2627_v7, %v2609_v54 }
0x107b   : > { %v2638_v45 = vsel %vm1757_vm1, %v2628_v28, 0.0 }
0x107c   : > { %2639 = vadd.xlane.f32.xlu2 %v2638_v45  ;;  %v2591_v33 = vpop.f32.mrf.mxu2 }
0x107e   : > { %v2610_v41 = vpop.f32.mrf.mxu0 }
0x107f   : > { %v2611_v6 = vadd.f32 %v2610_v41, %v2591_v33 }
0x1080   : > { %v2629_v53 = vpop.f32.mrf.mxu3 }
0x1081   : > { %v2630_v52 = vadd.f32 %v2629_v53, %v2611_v6 }
0x1083   : > { %v2641_v38 = vsel %vm1757_vm1, %v2630_v52, 0.0 }
0x1084   : > { %2642 = vadd.xlane.f32.xlu1 %v2641_v38  ;;  %2636 = vadd.xlane.f32.xlu2 %v2635_v39 }
0x10df   : > { %v2634_v50 = vpop.xlane.xlu0 %2633 }
0x10e0   : > { %v2644_v19 = vmul.f32 %v2634_v50, %v7649_v58 }
0x10e2   : > { %v6600_v57 = vsub.f32 %v2623_v21, %v2644_v19 }
0x10e4   : > { %v2652_v22 = vmul.f32 %v6600_v57, %v6600_v57 }
0x10e6   : > { %v2656_v1 = vsel %vm1757_vm1, %v2652_v22, 0.0 }
0x10e7   : > { %2657 = vadd.xlane.f32.xlu2 %v2656_v1 }
0x10ef   : > { %v2640_v3 = vpop.xlane.xlu2 %2639 }
0x10f0   : > { %v2646_v42 = vmul.f32 %v2640_v3, %v7649_v58 }
0x10f2   : > { %v6606_v55 = vsub.f32 %v2628_v28, %v2646_v42 }
0x10f4   : > { %v2654_v34 = vmul.f32 %v6606_v55, %v6606_v55 }
0x10f6   : > { %v2662_v63 = vsel %vm1757_vm1, %v2654_v34, 0.0 }
0x10f7   : > { %v2643_v61 = vpop.xlane.xlu1 %2642  ;;  %2663 = vadd.xlane.f32.xlu1 %v2662_v63  ;;  %v2637_v27 = vpop.xlane.xlu2 %2636 }
0x10f8   : > { %v2647_v13 = vmul.f32 %v2643_v61, %v7649_v58  ;;  %v2645_v8 = vmul.f32 %v2637_v27, %v7649_v58 }
0x10fa   : > { %v6613_v24 = vsub.f32 %v2630_v52, %v2647_v13  ;;  %v6615_v46 = vsub.f32 %v2625_v29, %v2645_v8 }
0x10fc   : > { %v2653_v2 = vmul.f32 %v6615_v46, %v6615_v46  ;;  %v2655_v5 = vmul.f32 %v6613_v24, %v6613_v24 }
0x10fe   : > { %v2659_v0 = vsel %vm1757_vm1, %v2653_v2, 0.0  ;;  %v2665_v4 = vsel %vm1757_vm1, %v2655_v5, 0.0 }
0x10ff   : > { %2660 = vadd.xlane.f32.xlu1 %v2659_v0  ;;  %2666 = vadd.xlane.f32.xlu0 %v2665_v4 }
0x1100   : > { %3008 = vrot.lane.b32.xlu2 %v7650_v12, %s5283_s26 }
0x1108   : > { %3022 = vrot.lane.b32.xlu2 %v7651_v56, %s5271_s24 }
0x1110   : > { %2976 = vrot.lane.b32.xlu2 %v7650_v12, %s5280_s23 }
0x1113   : > { %3010 = vrot.lane.b32.xlu0 %v7651_v56, %s5283_s26 }
0x1118   : > { %2990 = vrot.lane.b32.xlu2 %v7651_v56, %s7652_s4  ;;  %3020 = vrot.lane.b32.xlu1 %v7650_v12, %s5271_s24 }
0x111b   : > { %2978 = vrot.lane.b32.xlu0 %v7651_v56, %s5280_s23 }
0x1120   : > { %3102 = vrot.lane.b32.xlu2 %v7650_v12, %s7653_s25  ;;  %2988 = vrot.lane.b32.xlu1 %v7650_v12, %s7652_s4 }
0x1123   : > { %3090 = vrot.lane.b32.xlu0 %v7650_v12, %s7654_s21 }
0x1128   : > { %2956 = vrot.lane.b32.xlu2 %v7650_v12, %s7655_s9  ;;  %3092 = vrot.lane.b32.xlu1 %v7651_v56, %s7654_s21 }
0x112b   : > { %3104 = vrot.lane.b32.xlu0 %v7651_v56, %s7653_s25 }
0x1130   : > { %3060 = vrot.lane.b32.xlu2 %v7651_v56, %s7656_s5  ;;  %2946 = vrot.lane.b32.xlu1 %v7651_v56, %s7657_s2 }
0x1133   : > { %2944 = vrot.lane.b32.xlu0 %v7650_v12, %s7657_s2 }
0x1138   : > { %2914 = vrot.lane.b32.xlu2 %v7651_v56, %s7658_s28  ;;  %3058 = vrot.lane.b32.xlu1 %v7650_v12, %s7656_s5 }
0x113b   : > { %2958 = vrot.lane.b32.xlu0 %v7651_v56, %s7655_s9 }
0x1140   : > { %3072 = vrot.lane.b32.xlu1 %v7651_v56, %s7659_s22 }
0x1143   : > { %3070 = vrot.lane.b32.xlu0 %v7650_v12, %s7659_s22 }
0x1148   : > { %2912 = vrot.lane.b32.xlu1 %v7650_v12, %s7658_s28 }
0x114b   : > { %2924 = vrot.lane.b32.xlu0 %v7650_v12, %s7660_s6 }
0x115a   : > { %v2658_v23 = vpop.xlane.xlu2 %2657 }
0x115b   : > { %v2668_v18 = vmul.f32 %v2658_v23, %v7649_v58 }
0x115d   : > { %v2672_v62 = vadd.f32 1e-05, %v2668_v18 }
0x115f   : > { %4828 = vrsqrt.f32 %v2672_v62  ;;  %vm2682_vm2 = vweird.f32 %v2672_v62 }
0x1162   : > { %v6673_v37 = vpop.permute.xlu2 %3008 }
0x1165   : > { %v4829_v40 = vpop.eup %4828 }
0x1166   : > { %v2677_v31 = vmul.f32 %v4829_v40, %v2672_v62  ;;  %vm2683_vm15 = vweird.f32 %v4829_v40 }
0x1167   : > { %vm6679_vm5 = vmor %vm2682_vm2, %vm2683_vm15 }
0x1168   : > { %v2678_v20 = vmul.f32 %v4829_v40, %v2677_v31 }
0x116a   : > { %v2664_v48 = vpop.xlane.xlu1 %2663  ;;  %v2679_v44 = vmul.f32 0.5, %v2678_v20  ;;  %v6675_v54 = vpop.permute.xlu2 %3022 }
0x116b   : > { %v2670_v26 = vmul.f32 %v2664_v48, %v7649_v58 }
0x116c   : > { %v2680_v35 = vsub.f32 1.5, %v2679_v44 }
0x116d   : > { %v2674_v30 = vadd.f32 1e-05, %v2670_v26 }
0x116e   : > { %v2681_v45 = vmul.f32 %v4829_v40, %v2680_v35 }
0x116f   : > { %4830 = vrsqrt.f32 %v2674_v30  ;;  %vm2702_vm12 = vweird.f32 %v2674_v30 }
0x1170   : > { %v2685_v50 = vsel %vm6679_vm5, %v4829_v40, %v2681_v45 }
0x1171   : > { %v2716_v63 = vmul.f32 %v2685_v50, %v6600_v57  ;;  %v4586_v57 = vld [vmem:[%s7439_s14] sm:$0xff] }
0x1172   : > { %v2661_v10 = vpop.xlane.xlu1 %2660  ;;  %v2667_v14 = vpop.xlane.xlu0 %2666 }
0x1173   : > { %v2669_v49 = vmul.f32 %v2661_v10, %v7649_v58  ;;  %v2671_v9 = vmul.f32 %v2667_v14, %v7649_v58  ;;  %v6687_v3 = vpop.permute.xlu2 %2976  ;;  %v2724_v5 = vmul.f32 0.2, %v2716_v63  ;;  %vm2720_vm2 = vcmp.ge.f32.partialorder %v2716_v63, 0.0  ;;  %v4587_v10 = vld [vmem:[%s7439_s14 + $0x8] sm:$0xff] }
0x1175   : > { %v4831_v43 = vpop.eup %4830  ;;  %v2673_v25 = vadd.f32 1e-05, %v2669_v49  ;;  %v2675_v36 = vadd.f32 1e-05, %v2671_v9  ;;  %v2728_v4 = vsel %vm2720_vm2, %v2716_v63, %v2724_v5 }
0x1176   : > { %v2697_v51 = vmul.f32 %v4831_v43, %v2674_v30  ;;  %vm2703_vm10 = vweird.f32 %v4831_v43 }
0x1177   : > { %4832 = vrsqrt.f32 %v2673_v25  ;;  %vm2704_vm14 = vmor %vm2702_vm12, %vm2703_vm10  ;;  %vm2692_vm13 = vweird.f32 %v2673_v25  ;;  %vm2712_vm10 = vweird.f32 %v2675_v36 }
0x1178   : > { %v2698_v59 = vmul.f32 %v4831_v43, %v2697_v51  ;;  %4834 = vrsqrt.f32 %v2675_v36 }
0x117a   : > { %v2699_v32 = vmul.f32 0.5, %v2698_v59 }
0x117b   : > { %v6697_v18 = vpop.permute.xlu2 %2990 }
0x117c   : > { %v2700_v21 = vsub.f32 1.5, %v2699_v32  ;;  %v7663_v32 = vld [vmem:[#allocation49_spill] sm:$0xff] }
0x117d   : > { %v4833_v47 = vpop.eup %4832 }
0x117e   : > { %v4835_v15 = vpop.eup %4834  ;;  %v2687_v17 = vmul.f32 %v4833_v47, %v2673_v25  ;;  %v2701_v16 = vmul.f32 %v4831_v43, %v2700_v21  ;;  %vm2693_vm6 = vweird.f32 %v4833_v47 }
0x117f   : > { %v2707_v60 = vmul.f32 %v4835_v15, %v2675_v36  ;;  %vm2713_vm4 = vweird.f32 %v4835_v15  ;;  %vm2694_vm11 = vmor %vm2692_vm13, %vm2693_vm6  ;;  %v4588_v36 = vld [vmem:[%s7439_s14 + $0x10] sm:$0xff] }
0x1180   : > { %v2688_v7 = vmul.f32 %v4833_v47, %v2687_v17  ;;  %v2705_v33 = vsel %vm2704_vm14, %v4831_v43, %v2701_v16  ;;  %vm2714_vm12 = vmor %vm2712_vm10, %vm2713_vm4  ;;  %v4590_v17 = vld [vmem:[%s7664_s3] sm:$0xff]  ;;  %s7665_s3 = smov 63   ;;  %vm7669_vm4 = vcmask 56320   ;;  %vm7674_vm10 = vcmask 457728  }
0x1181   : > { %v2708_v28 = vmul.f32 %v4835_v15, %v2707_v60  ;;  %v2718_v38 = vmul.f32 %v2705_v33, %v6606_v55  ;;  %2834 = vmatpush.bf16.msra.mxu2 %v4590_v17  ;;  %vm7670_vm5 = vmmov %vm7669_vm4 }
0x1182   : > { %v2689_v11 = vmul.f32 0.5, %v2688_v7  ;;  %vm7671_vm13 = vmmov %vm7669_vm4 }
0x1183   : > { %v2709_v41 = vmul.f32 0.5, %v2708_v28  ;;  %v2726_v55 = vmul.f32 0.2, %v2718_v38  ;;  %vm2722_vm14 = vcmp.ge.f32.partialorder %v2718_v38, 0.0  ;;  %v6709_v30 = vpop.permute.xlu2 %3102 }
0x1184   : > { %v2690_v29 = vsub.f32 1.5, %v2689_v11 }
0x1185   : > { %v2710_v6 = vsub.f32 1.5, %v2709_v41  ;;  %v6677_v53 = vpop.permute.xlu0 %3010  ;;  %v2730_v8 = vsel %vm2722_vm14, %v2718_v38, %v2726_v55  ;;  %vm7676_vm14 = vmmov %vm7674_vm10 }
0x1186   : > { %v2691_v39 = vmul.f32 %v4833_v47, %v2690_v29 }
0x1187   : > { %v2711_v58 = vmul.f32 %v4835_v15, %v2710_v6 }
0x1188   : > { %v2695_v19 = vsel %vm2694_vm11, %v4833_v47, %v2691_v39  ;;  %vm7673_vm11 = vmmov %vm7669_vm4 }
0x1189   : > { %v2715_v22 = vsel %vm2714_vm12, %v4835_v15, %v2711_v58  ;;  %v2717_v1 = vmul.f32 %v2695_v19, %v6615_v46  ;;  %v4589_v15 = vld [vmem:[%s7439_s14 + $0x18] sm:$0xff]  ;;  %vm7675_vm12 = vmmov %vm7674_vm10 }
0x118a   : > { %v2719_v42 = vmul.f32 %v2715_v22, %v6613_v24  ;;  %v6690_v34 = vpop.permute.xlu1 %3020 }
0x118b   : > { %v2725_v27 = vmul.f32 0.2, %v2717_v1  ;;  %vm2721_vm6 = vcmp.ge.f32.partialorder %v2717_v1, 0.0  ;;  %v6718_v49 = vpop.permute.xlu2 %2956 }
0x118c   : > { %vm2723_vm15 = vcmp.ge.f32.partialorder %v2719_v42, 0.0  ;;  %v2727_v61 = vmul.f32 0.2, %v2719_v42 }
0x118d   : > { %v6693_v13 = vpop.permute.xlu0 %2978  ;;  %v2729_v0 = vsel %vm2721_vm6, %v2717_v1, %v2725_v27  ;;  %vm7680_vm6 = vcmask 515072  }
0x118e   : > { %v2731_v2 = vsel %vm2723_vm15, %v2719_v42, %v2727_v61  ;;  %v2740_v23 = vpack.c.bf16 %v2729_v0, %v2728_v4  ;;  %vm7678_vm15 = vmmov %vm7674_vm10 }
0x118f   : > { %v2741_v46 = vpack.c.bf16 %v2731_v2, %v2730_v8  ;;  %vm7682_vm2 = vmmov %vm7680_vm6 }
0x1191   : > { %2780 = vmatpush.bf16.msrb.mxu1 %v2741_v46 }
0x1192   : > { %v6695_v24 = vpop.permute.xlu1 %2988 }
0x1193   : > { %v3061_v43 = vpop.permute.xlu2 %3060 }
0x1195   : > { %2781 = vmatpush.bf16.msrb.mxu1 %v2740_v23  ;;  %v6702_v62 = vpop.permute.xlu0 %3090 }
0x1198   : > { %4463 = vmatmul.msk.bf16.vlgmr.msrb.gmra.mxu1 %vm2568_vm7, %v4586_v57 }
0x119a   : > { %v6705_v48 = vpop.permute.xlu1 %3092 }
0x119b   : > { %v6760_v55 = vpop.permute.xlu2 %2914 }
0x119d   : > { %v6707_v26 = vpop.permute.xlu0 %3104 }
0x11a2   : > { %v6711_v40 = vpop.permute.xlu1 %2946 }
0x11a5   : > { %v6716_v31 = vpop.permute.xlu0 %2944 }
0x11a8   : > { %4464 = vmatmul.msk.bf16.gmra.mxu1 %vm2568_vm7, %v4587_v10 }
0x11aa   : > { %v3059_v14 = vpop.permute.xlu1 %3058 }
0x11ad   : > { %v6721_v9 = vpop.permute.xlu0 %2958 }
0x11b2   : > { %v3073_v25 = vpop.permute.xlu1 %3072 }
0x11b3   : > { %v3083_v51 = vsel %vm1493_vm3, %v3061_v43, %v3073_v25 }
0x11b4   : > { %v6729_v44 = vmul.f32 %v3083_v51, %v7663_v32 }
0x11b5   : > { %v3071_v20 = vpop.permute.xlu0 %3070 }
0x11b6   : > { %v3082_v59 = vsel %vm1493_vm3, %v3059_v14, %v3071_v20 }
0x11b7   : > { %v6732_v21 = vmul.f32 %v3082_v59, %v7663_v32 }
0x11b8   : > { %4465 = vmatmul.msk.bf16.gmra.mxu1 %vm2568_vm7, %v4588_v36 }
0x11b9   : > { %v3166_v47 = vpack.c.bf16 %v6729_v44, %v6732_v21  ;;  %v4477_v21 = vld [vmem:[#allocation15] sm:$0xf] }
0x11ba   : > { %v6764_v8 = vpop.permute.xlu1 %2912 }
0x11bd   : > { %v6762_v63 = vpop.permute.xlu0 %2924 }
0x11c8   : > { %4466 = vmatmul.msk.bf16.gmra.mxu1 %vm2568_vm7, %v4589_v15 }
0x1215   : > { %v2783_v35 = vpop.f32.mrf.mxu1 }
0x121d   : > { %v2785_v16 = vpop.f32.mrf.mxu1 }
0x121e   : > { %v2803_v60 = vpack.c.bf16 %v2785_v16, %v2783_v35 }
0x1220   : > { %4471 = vmatmul.msk.bf16.vlgmr.msra.gmra.mxu2 %vm1757_vm1, %v2803_v60 }
0x1225   : > { %v2788_v7 = vpop.f32.mrf.mxu1 }
0x122d   : > { %v2790_v28 = vpop.f32.mrf.mxu1 }
0x122e   : > { %v2804_v11 = vpack.c.bf16 %v2790_v28, %v2788_v7 }
0x1230   : > { %4472 = vmatmul.msk.bf16.gmra.mxu2 %vm1757_vm1, %v2804_v11 }
0x1235   : > { %v2793_v45 = vpop.f32.mrf.mxu1 }
0x123d   : > { %v2795_v33 = vpop.f32.mrf.mxu1 }
0x123e   : > { %v2805_v41 = vpack.c.bf16 %v2795_v33, %v2793_v45 }
0x1240   : > { %4473 = vmatmul.msk.bf16.gmra.mxu2 %vm1757_vm1, %v2805_v41 }
0x1245   : > { %v2798_v29 = vpop.f32.mrf.mxu1 }
0x124d   : > { %v2800_v6 = vpop.f32.mrf.mxu1 }
0x124e   : > { %v2806_v52 = vpack.c.bf16 %v2800_v6, %v2798_v29 }
0x1250   : > { %4474 = vmatmul.msk.bf16.gmra.mxu2 %vm1757_vm1, %v2806_v52 }
0x12a3   : > { %v2836_v38 = vpop.f32.mrf.mxu2 }
0x12ab   : > { %v2838_v39 = vpop.f32.mrf.mxu2 }
0x12b3   : > { %v2841_v50 = vpop.f32.mrf.mxu2 }
0x12b4   : > { %2864 = vrot.lane.b32.xlu1 %v2841_v50, %s5271_s24  ;;  %2858 = vrot.lane.b32.xlu0 %v2841_v50, %s5283_s26 }
0x12bb   : > { %v2843_v58 = vpop.f32.mrf.mxu2 }
0x12bc   : > { %2866 = vrot.lane.b32.xlu0 %v2843_v58, %s5271_s24  ;;  %2860 = vrot.lane.b32.xlu2 %v2843_v58, %s5283_s26 }
0x12c3   : > { %v2846_v19 = vpop.f32.mrf.mxu2 }
0x12c4   : > { %2882 = vrot.lane.b32.xlu1 %v2846_v19, %s7655_s9  ;;  %2876 = vrot.lane.b32.xlu2 %v2846_v19, %s7657_s2 }
0x12cb   : > { %v2848_v22 = vpop.f32.mrf.mxu2 }
0x12cc   : > { %2884 = vrot.lane.b32.xlu2 %v2848_v22, %s7655_s9  ;;  %2878 = vrot.lane.b32.xlu0 %v2848_v22, %s7657_s2 }
0x12d3   : > { %v2851_v1 = vpop.f32.mrf.mxu2 }
0x12d4   : > { %2900 = vrot.lane.b32.xlu2 %v2851_v1, %s7660_s6  ;;  %2894 = vrot.lane.b32.xlu0 %v2851_v1, %s7658_s28 }
0x12db   : > { %v2853_v42 = vpop.f32.mrf.mxu2 }
0x12dc   : > { %2902 = vrot.lane.b32.xlu0 %v2853_v42, %s7660_s6  ;;  %2896 = vrot.lane.b32.xlu1 %v2853_v42, %s7658_s28 }
0x1316   : > { %v2861_v61 = vpop.permute.xlu2 %2860 }
0x131e   : > { %v2877_v2 = vpop.permute.xlu2 %2876 }
0x1326   : > { %v2859_v27 = vpop.permute.xlu0 %2858  ;;  %v2865_v46 = vpop.permute.xlu1 %2864 }
0x1327   : > { %v2885_v0 = vpop.permute.xlu2 %2884  ;;  %v2870_v57 = vsel %vm1473_vm8, %v2859_v27, %v2865_v46  ;;  %v3032_v46 = vsel %vm1473_vm8, %v6673_v37, %v6690_v34 }
0x1328   : > { %v2872_v14 = vadd.f32 %v2870_v57, %v2836_v38 }
0x132e   : > { %v2867_v5 = vpop.permute.xlu0 %2866 }
0x132f   : > { %v2901_v43 = vpop.permute.xlu2 %2900  ;;  %v2871_v59 = vsel %vm1473_vm8, %v2861_v61, %v2867_v5 }
0x1330   : > { %v2873_v16 = vadd.f32 %v2871_v59, %v2838_v39 }
0x1336   : > { %v2883_v23 = vpop.permute.xlu1 %2882 }
0x1337   : > { %v2888_v10 = vsel %vm1453_vm0, %v2877_v2, %v2883_v23 }
0x1338   : > { %v2890_v25 = vadd.f32 %v2888_v10, %v2872_v14  ;;  %v3033_v10 = vsel %vm1473_vm8, %v6677_v53, %v6675_v54 }
0x133e   : > { %v2879_v4 = vpop.permute.xlu0 %2878 }
0x133f   : > { %v2889_v35 = vsel %vm1453_vm0, %v2879_v4, %v2885_v0  ;;  %v7668_v4 = vld [vmem:[#allocation52_spill] sm:$0xff] }
0x1340   : > { %v2891_v7 = vadd.f32 %v2889_v35, %v2873_v16  ;;  %v7672_v35 = vld [vmem:[#allocation53_spill] sm:$0xff]  ;;  %v3001_v16 = vsel %vm7673_vm11, %v6693_v13, %v6697_v18 }
0x1346   : > { %v2895_v51 = vpop.permute.xlu0 %2894 }
0x1347   : > { %v2906_v36 = vsel %vm1443_vm9, %v2895_v51, %v2901_v43  ;;  %v3036_v43 = vmul.f32 %v3032_v46, %v7668_v4  ;;  %v3037_v51 = vmul.f32 %v3033_v10, %v7668_v4 }
0x1348   : > { %v6769_v20 = vadd.f32 %v2906_v36, %v2890_v25 }
0x1349   : > { %v3160_v59 = vpack.c.bf16 %v3037_v51, %v3036_v43  ;;  %v7679_v51 = vld [vmem:[#allocation55_spill] sm:$0xff] }
0x134a   : > { %2992 = vrot.lane.b32.xlu2 %v6769_v20, %s7652_s4  ;;  %3024 = vrot.lane.b32.xlu0 %v6769_v20, %s5271_s24 }
0x134b   : > { %3012 = vrot.lane.b32.xlu1 %v6769_v20, %s5283_s26 }
0x134e   : > { %v2897_v15 = vpop.permute.xlu1 %2896  ;;  %v2903_v17 = vpop.permute.xlu0 %2902 }
0x134f   : > { %v2907_v60 = vsel %vm1443_vm9, %v2897_v15, %v2903_v17  ;;  %v3000_v15 = vsel %vm7670_vm5, %v6687_v3, %v6695_v24 }
0x1350   : > { %v6798_v28 = vadd.f32 %v2907_v60, %v2891_v7  ;;  %v3004_v60 = vmul.f32 %v3000_v15, %v7672_v35 }
0x1352   : > { %3062 = vrot.lane.b32.xlu2 %v6769_v20, %s7656_s5  ;;  %2980 = vrot.lane.b32.xlu0 %v6769_v20, %s5280_s23 }
0x1353   : > { %3094 = vrot.lane.b32.xlu1 %v6769_v20, %s7654_s21 }
0x135a   : > { %2916 = vrot.lane.b32.xlu2 %v6769_v20, %s7658_s28  ;;  %3106 = vrot.lane.b32.xlu0 %v6769_v20, %s7653_s25 }
0x135b   : > { %2948 = vrot.lane.b32.xlu1 %v6769_v20, %s7657_s2 }
0x1362   : > { %3046 = vrot.lane.b32.xlu2 %v6769_v20, %s7665_s3  ;;  %2960 = vrot.lane.b32.xlu0 %v6769_v20, %s7655_s9 }
0x1363   : > { %3074 = vrot.lane.b32.xlu1 %v6769_v20, %s7659_s22 }
0x136a   : > { %3040 = vrot.lane.b32.xlu0 %v6769_v20, %s5270_s27  ;;  %3014 = vrot.lane.b32.xlu2 %v6798_v28, %s5283_s26 }
0x136b   : > { %2928 = vrot.lane.b32.xlu1 %v6769_v20, %s7660_s6 }
0x1372   : > { %2994 = vrot.lane.b32.xlu0 %v6798_v28, %s7652_s4  ;;  %3096 = vrot.lane.b32.xlu2 %v6798_v28, %s7654_s21 }
0x1373   : > { %3026 = vrot.lane.b32.xlu1 %v6798_v28, %s5271_s24 }
0x137a   : > { %3064 = vrot.lane.b32.xlu0 %v6798_v28, %s7656_s5  ;;  %2950 = vrot.lane.b32.xlu2 %v6798_v28, %s7657_s2 }
0x137b   : > { %2982 = vrot.lane.b32.xlu1 %v6798_v28, %s5280_s23 }
0x1382   : > { %2918 = vrot.lane.b32.xlu0 %v6798_v28, %s7658_s28  ;;  %3076 = vrot.lane.b32.xlu2 %v6798_v28, %s7659_s22 }
0x1383   : > { %3108 = vrot.lane.b32.xlu1 %v6798_v28, %s7653_s25 }
0x138a   : > { %3048 = vrot.lane.b32.xlu0 %v6798_v28, %s7665_s3  ;;  %2930 = vrot.lane.b32.xlu2 %v6798_v28, %s7660_s6 }
0x138b   : > { %2962 = vrot.lane.b32.xlu1 %v6798_v28, %s7655_s9 }
0x1392   : > { %3122 = vrot.lane.b32.xlu0 %v7650_v12, %s7666_s29  ;;  %3126 = vrot.lane.b32.xlu2 %v6769_v20, %s7666_s29 }
0x1393   : > { %3042 = vrot.lane.b32.xlu1 %v6798_v28, %s5270_s27 }
0x139a   : > { %3128 = vrot.lane.b32.xlu0 %v6798_v28, %s7666_s29  ;;  %3140 = vrot.lane.b32.xlu2 %v6798_v28, %s7667_s12 }
0x139b   : > { %2926 = vrot.lane.b32.xlu1 %v7651_v56, %s7660_s6 }
0x13a2   : > { %3136 = vrot.lane.b32.xlu0 %v7651_v56, %s7667_s12  ;;  %3134 = vrot.lane.b32.xlu2 %v7650_v12, %s7667_s12 }
0x13a3   : > { %3138 = vrot.lane.b32.xlu1 %v6769_v20, %s7667_s12 }
0x13a4   : > { %v2993_v11 = vpop.permute.xlu2 %2992 }
0x13ab   : > { %3124 = vrot.lane.b32.xlu1 %v7651_v56, %s7666_s29 }
0x13ac   : > { %v3063_v45 = vpop.permute.xlu2 %3062 }
0x13b4   : > { %v6850_v29 = vpop.permute.xlu2 %2916 }
0x13bc   : > { %v3025_v33 = vpop.permute.xlu0 %3024  ;;  %v6852_v38 = vpop.permute.xlu2 %3046 }
0x13bd   : > { %v3013_v41 = vpop.permute.xlu1 %3012 }
0x13be   : > { %v3034_v27 = vsel %vm1473_vm8, %v3013_v41, %v3025_v33  ;;  %v3005_v33 = vmul.f32 %v3001_v16, %v7672_v35 }
0x13bf   : > { %v3038_v23 = vmul.f32 %v3034_v27, %v7668_v4 }
0x13c4   : > { %v2981_v6 = vpop.permute.xlu0 %2980  ;;  %v3015_v58 = vpop.permute.xlu2 %3014 }
0x13c5   : > { %v3095_v52 = vpop.permute.xlu1 %3094  ;;  %v3002_v36 = vsel %vm7669_vm4, %v2981_v6, %v2993_v11  ;;  %v3158_v6 = vpack.c.bf16 %v3005_v33, %v3004_v60  ;;  %vm7687_vm4 = vcmask 449536  }
0x13c6   : > { %v3006_v54 = vmul.f32 %v3002_v36, %v7672_v35  ;;  %vm7688_vm5 = vmmov %vm7687_vm4 }
0x13c7   : > { %vm7690_vm11 = vmmov %vm7687_vm4 }
0x13cc   : > { %v3107_v39 = vpop.permute.xlu0 %3106  ;;  %v3097_v61 = vpop.permute.xlu2 %3096 }
0x13cd   : > { %v2949_v50 = vpop.permute.xlu1 %2948  ;;  %v3116_v3 = vsel %vm7674_vm10, %v3095_v52, %v3107_v39  ;;  %vm7691_vm10 = vcmask 523264  }
0x13d4   : > { %v2961_v19 = vpop.permute.xlu0 %2960  ;;  %v2951_v14 = vpop.permute.xlu2 %2950 }
0x13d5   : > { %v3075_v22 = vpop.permute.xlu1 %3074 }
0x13dc   : > { %v6854_v1 = vpop.permute.xlu0 %3040  ;;  %v3077_v11 = vpop.permute.xlu2 %3076 }
0x13dd   : > { %v6856_v42 = vpop.permute.xlu1 %2928 }
0x13e4   : > { %v2995_v2 = vpop.permute.xlu0 %2994 }
0x13e5   : > { %v3027_v5 = vpop.permute.xlu1 %3026 }
0x13e6   : > { %v3035_v0 = vsel %vm1473_vm8, %v3015_v58, %v3027_v5  ;;  %v3115_v58 = vsel %vm7675_vm12, %v6705_v48, %v6707_v26  ;;  %v3114_v5 = vsel %vm7678_vm15, %v6702_v62, %v6709_v30  ;;  %v3084_v48 = vsel %vm1493_vm3, %v3063_v45, %v3075_v22  ;;  %vm7692_vm12 = vmmov %vm7691_vm10 }
0x13e7   : > { %v3039_v57 = vmul.f32 %v3035_v0, %v7668_v4  ;;  %v2970_v26 = vsel %vm1453_vm0, %v2949_v50, %v2961_v19  ;;  %v2969_v62 = vsel %vm1453_vm0, %v6711_v40, %v6721_v9  ;;  %v2968_v50 = vsel %vm1453_vm0, %v6716_v31, %v6718_v49 }
0x13e8   : > { %v2974_v36 = vmul.f32 %v2970_v26, %v7679_v51  ;;  %v2973_v19 = vmul.f32 %v2969_v62, %v7679_v51  ;;  %v2972_v40 = vmul.f32 %v2968_v50, %v7679_v51  ;;  %v2938_v9 = vsel %vm1443_vm9, %v6850_v29, %v6856_v42  ;;  %v4485_v62 = vld [vmem:[#allocation15 + $0x8] sm:$0xf] }
0x13e9   : > { %v3161_v25 = vpack.c.bf16 %v3039_v57, %v3038_v23 }
0x13ea   : > { %v3156_v15 = vpack.c.bf16 %v2973_v19, %v2972_v40 }
0x13eb   : > { %3194 = vmatpush.bf16.msra.mxu0 %v3161_v25  ;;  %v3088_v25 = vmul.f32 %v3084_v48, %v7663_v32  ;;  %v6941_v48 = vld [vmem:[#allocation4 + $0x8] ss:$0 sm:$0xff] }
0x13ec   : > { %v3065_v37 = vpop.permute.xlu0 %3064 }
0x13ed   : > { %v2983_v34 = vpop.permute.xlu1 %2982  ;;  %v3085_v46 = vsel %vm1493_vm3, %v3065_v37, %v3077_v11 }
0x13ee   : > { %v3003_v17 = vsel %vm7671_vm13, %v2983_v34, %v2995_v2  ;;  %v7677_v2 = vld [vmem:[#allocation50_spill] sm:$0xff]  ;;  %v3089_v23 = vmul.f32 %v3085_v46, %v7663_v32  ;;  %vm7689_vm13 = vmmov %vm7687_vm4 }
0x13ef   : > { %v3007_v53 = vmul.f32 %v3003_v17, %v7672_v35  ;;  %3195 = vmatpush.bf16.msra.mxu0 %v3160_v59  ;;  %v3120_v13 = vmul.f32 %v3116_v3, %v7677_v2  ;;  %v3119_v52 = vmul.f32 %v3115_v58, %v7677_v2  ;;  %v3118_v0 = vmul.f32 %v3114_v5, %v7677_v2  ;;  %v7681_v59 = vld [vmem:[#allocation54_spill] sm:$0xff] }
0x13f0   : > { %v3167_v37 = vpack.c.bf16 %v3089_v23, %v3088_v25 }
0x13f1   : > { %v3159_v7 = vpack.c.bf16 %v3007_v53, %v3006_v54  ;;  %v3168_v43 = vpack.c.bf16 %v3119_v52, %v3118_v0  ;;  %v2942_v54 = vmul.f32 %v2938_v9, %v7681_v59  ;;  %v7683_v53 = vld [vmem:[#allocation51_spill] sm:$0xff] }
0x13f3   : > { %3196 = vmatpush.bf16.msra.mxu0 %v3159_v7 }
0x13f4   : > { %v2919_v24 = vpop.permute.xlu0 %2918 }
0x13f5   : > { %v3109_v41 = vpop.permute.xlu1 %3108 }
0x13f6   : > { %v3117_v27 = vsel %vm7676_vm14, %v3097_v61, %v3109_v41  ;;  %v2931_v61 = vpop.permute.xlu2 %2930  ;;  %v7684_v41 = vld [vmem:[#allocation60_spill] sm:$0xff] }
0x13f7   : > { %v3121_v18 = vmul.f32 %v3117_v27, %v7677_v2  ;;  %3197 = vmatpush.bf16.msra.mxu0 %v3158_v6  ;;  %v2939_v34 = vsel %vm1443_vm9, %v2919_v24, %v2931_v61  ;;  %v7685_v6 = vld [vmem:[#allocation59_spill] sm:$0xff] }
0x13f8   : > { %v2943_v31 = vmul.f32 %v2939_v34, %v7681_v59  ;;  %v7686_v44 = vpack.c.bf16 %v7684_v41, %v7685_v6 }
0x13f9   : > { %v3169_v39 = vpack.c.bf16 %v3121_v18, %v3120_v13  ;;  %v4479_v18 = vld [vmem:[#allocation15 + $0xc] sm:$0xf0] }
0x13fa   : > { %v3155_v29 = vpack.c.bf16 %v2943_v31, %v2942_v54  ;;  %v7693_v54 = vld [vmem:[#allocation56_spill] sm:$0xff] }
0x13fb   : > { %3208 = vmatpush.bf16.msra.mxu3 %v3169_v39  ;;  %v3162_v39 = vpack.c.bf16 %v7651_v56, %v7650_v12 }
0x13fc   : > { %v3049_v10 = vpop.permute.xlu0 %3048 }
0x13fd   : > { %v2963_v57 = vpop.permute.xlu1 %2962 }
0x13fe   : > { %v2971_v30 = vsel %vm1453_vm0, %v2951_v14, %v2963_v57  ;;  %v3052_v14 = vsel %vm7680_vm6, %v6854_v1, %v6852_v38  ;;  %v3127_v60 = vpop.permute.xlu2 %3126  ;;  %v2936_v1 = vsel %vm1443_vm9, %v6764_v8, %v6762_v63  ;;  %v3163_v63 = vpack.c.bf16 %v6798_v28, %v6769_v20 }
0x13ff   : > { %v2975_v45 = vmul.f32 %v2971_v30, %v7679_v51  ;;  %3209 = vmatpush.bf16.msra.mxu3 %v3168_v43  ;;  %v3056_v16 = vmul.f32 %v3052_v14, %v7683_v53  ;;  %v2940_v3 = vmul.f32 %v2936_v1, %v7681_v59  ;;  %v4593_v30 = vld [vmem:[#allocation15 + $0x10] sm:$0xf0] }
0x1401   : > { %v3157_v22 = vpack.c.bf16 %v2975_v45, %v2974_v36  ;;  %v4486_v36 = vor.u32 %v4593_v30, %v4485_v62 }
0x1403   : > { %3198 = vmatpush.bf16.msra.mxu0 %v3157_v22  ;;  %3210 = vmatpush.bf16.msra.mxu3 %v3167_v37 }
0x1404   : > { %v3123_v11 = vpop.permute.xlu0 %3122 }
0x1405   : > { %v3043_v49 = vpop.permute.xlu1 %3042 }
0x1406   : > { %v3053_v17 = vsel %vm7682_vm2, %v3043_v49, %v3049_v10  ;;  %v3141_v58 = vpop.permute.xlu2 %3140 }
0x1407   : > { %v3057_v7 = vmul.f32 %v3053_v17, %v7683_v53  ;;  %3199 = vmatpush.bf16.msra.mxu0 %v3156_v15  ;;  %3211 = vmatpush.bf16.msra.mxu3 %v3166_v47  ;;  %v4592_v47 = vld [vmem:[#allocation15 + $0x8] sm:$0xf0] }
0x1408   : > { %v4478_v8 = vor.u32 %v4592_v47, %v4477_v21 }
0x1409   : > { %v3165_v38 = vpack.c.bf16 %v3057_v7, %v3056_v16 }
0x140b   : > { %3200 = vmatpush.bf16.msra.mxu0 %v3155_v29  ;;  %3212 = vmatpush.bf16.msra.mxu3 %v3165_v38 }
0x140c   : > { %v3129_v27 = vpop.permute.xlu0 %3128 }
0x140d   : > { %v2927_v42 = vpop.permute.xlu1 %2926  ;;  %v3149_v5 = vsel %vm7687_vm4, %v3129_v27, %v3141_v58 }
0x140e   : > { %v2937_v33 = vsel %vm1443_vm9, %v6760_v55, %v2927_v42  ;;  %v4591_v55 = vld [vmem:[#allocation15 + $0x4] sm:$0xf]  ;;  %v3153_v26 = vmul.f32 %v6941_v48, %v3149_v5  ;;  %v3135_v61 = vpop.permute.xlu2 %3134 }
0x140f   : > { %v2941_v24 = vmul.f32 %v2937_v33, %v7681_v59  ;;  %3213 = vmatpush.bf16.msra.mxu3 %v7686_v44  ;;  %v4482_v0 = vor.u32 %v4591_v55, %v4479_v18  ;;  %v3146_v23 = vsel %vm7689_vm13, %v3123_v11, %v3135_v61 }
0x1410   : > { %v3150_v56 = vmul.f32 %v6941_v48, %v3146_v23 }
0x1411   : > { %v3154_v13 = vpack.c.bf16 %v2941_v24, %v2940_v3 }
0x1413   : > { %3201 = vmatpush.bf16.msra.mxu0 %v3154_v13  ;;  %3214 = vmatpush.bf16.msra.mxu3 %v3163_v63 }
0x1414   : > { %v3137_v57 = vpop.permute.xlu0 %3136 }
0x1415   : > { %v3139_v52 = vpop.permute.xlu1 %3138 }
0x1416   : > { %v3148_v46 = vsel %vm7688_vm5, %v3127_v60, %v3139_v52  ;;  %3202 = vmatmul.bf16.vlgmr.msra.gmra.mxu0 %v4478_v8 }
0x1417   : > { %v3152_v20 = vmul.f32 %v6941_v48, %v3148_v46  ;;  %3215 = vmatpush.bf16.msra.mxu3 %v3162_v39 }
0x1419   : > { %v3171_v28 = vpack.c.bf16 %v3153_v26, %v3152_v20 }
0x141a   : > { %3216 = vmatmul.bf16.vlgmr.msra.gmra.mxu3 %v4482_v0 }
0x141b   : > { %3228 = vmatpush.bf16.msrb.mxu0 %v3171_v28 }
0x141d   : > { %v3125_v10 = vpop.permute.xlu1 %3124 }
0x141e   : > { %v3147_v12 = vsel %vm7690_vm11, %v3125_v10, %v3137_v57 }
0x141f   : > { %v3151_v43 = vmul.f32 %v6941_v48, %v3147_v12 }
0x1421   : > { %v3170_v25 = vpack.c.bf16 %v3151_v43, %v3150_v56 }
0x1423   : > { %3229 = vmatpush.bf16.msrb.mxu0 %v3170_v25 }
0x1426   : > { %4487 = vmatmul.msk.bf16.vlgmr.msrb.gmra.mxu0 %vm2568_vm7, %v4486_v36  ;;  %vm7694_vm7 = vmmov %vm7691_vm10 }
0x1427   : > { %vm7695_vm14 = vmmov %vm7694_vm7 }
0x1493   : > { %v3203_v45 = vpop.f32.mrf.mxu0 }
0x149b   : > { %v3205_v50 = vpop.f32.mrf.mxu0 }
0x149d   : > { %v3217_v19 = vpop.f32.mrf.mxu3 }
0x149e   : > { %v3218_v22 = vadd.f32 %v3217_v19, %v3203_v45 }
0x14a3   : > { %v3231_v37 = vpop.f32.mrf.mxu0 }
0x14a4   : > { %v3232_v34 = vadd.f32 %v3231_v37, %v3218_v22 }
0x14a5   : > { %v3219_v9 = vpop.f32.mrf.mxu3 }
0x14a6   : > { %v3236_v40 = vsel %vm7691_vm10, %v3232_v34, 0.0  ;;  %v3220_v14 = vadd.f32 %v3219_v9, %v3205_v50 }
0x14a7   : > { %3237 = vadd.xlane.f32.xlu1 %v3236_v40 }
0x14ab   : > { %v3233_v31 = vpop.f32.mrf.mxu0 }
0x14ac   : > { %v3234_v49 = vadd.f32 %v3233_v31, %v3220_v14 }
0x14ae   : > { %v3239_v15 = vsel %vm7692_vm12, %v3234_v49, 0.0  ;;  %vm7696_vm12 = vcmask 457728  }
0x14af   : > { %3240 = vadd.xlane.f32.xlu2 %v3239_v15 }
0x151a   : > { %v3238_v17 = vpop.xlane.xlu1 %3237 }
0x151b   : > { %v3242_v16 = vmul.f32 %v3238_v17, %v7693_v54 }
0x151d   : > { %v3244_v60 = vsub.f32 %v3232_v34, %v3242_v16 }
0x151f   : > { %v3246_v7 = vmul.f32 %v3244_v60, %v3244_v60 }
0x1521   : > { %v3248_v11 = vsel %vm7694_vm7, %v3246_v7, 0.0  ;;  %vm7697_vm7 = vmmov %vm7696_vm12 }
0x1522   : > { %v3241_v29 = vpop.xlane.xlu2 %3240  ;;  %3249 = vadd.xlane.f32.xlu0 %v3248_v11 }
0x1523   : > { %v3243_v38 = vmul.f32 %v3241_v29, %v7693_v54 }
0x1525   : > { %v3245_v1 = vsub.f32 %v3234_v49, %v3243_v38 }
0x1527   : > { %v3247_v42 = vmul.f32 %v3245_v1, %v3245_v1 }
0x1529   : > { %v3251_v33 = vsel %vm7695_vm14, %v3247_v42, 0.0  ;;  %vm7698_vm14 = vcmask 515072  }
0x152a   : > { %3252 = vadd.xlane.f32.xlu1 %v3251_v33 }
0x1595   : > { %v3250_v3 = vpop.xlane.xlu0 %3249 }
0x1596   : > { %v3254_v24 = vmul.f32 %v3250_v3, %v7693_v54 }
0x1598   : > { %v3256_v41 = vadd.f32 1e-05, %v3254_v24 }
0x159a   : > { %4836 = vrsqrt.f32 %v3256_v41  ;;  %vm3264_vm6 = vweird.f32 %v3256_v41 }
0x159d   : > { %v3253_v6 = vpop.xlane.xlu1 %3252 }
0x159e   : > { %v3255_v21 = vmul.f32 %v3253_v6, %v7693_v54 }
0x15a0   : > { %v4837_v44 = vpop.eup %4836  ;;  %v3257_v27 = vadd.f32 1e-05, %v3255_v21 }
0x15a1   : > { %v3259_v47 = vmul.f32 %v4837_v44, %v3256_v41  ;;  %vm3265_vm15 = vweird.f32 %v4837_v44 }
0x15a2   : > { %4838 = vrsqrt.f32 %v3257_v27  ;;  %vm3266_vm2 = vmor %vm3264_vm6, %vm3265_vm15  ;;  %vm3274_vm13 = vweird.f32 %v3257_v27 }
0x15a3   : > { %v3260_v58 = vmul.f32 %v4837_v44, %v3259_v47  ;;  %vm7699_vm15 = vmmov %vm7698_vm14 }
0x15a5   : > { %v3261_v13 = vmul.f32 0.5, %v3260_v58 }
0x15a7   : > { %v3262_v63 = vsub.f32 1.5, %v3261_v13 }
0x15a8   : > { %v4839_v5 = vpop.eup %4838 }
0x15a9   : > { %v3263_v8 = vmul.f32 %v4837_v44, %v3262_v63  ;;  %v3269_v46 = vmul.f32 %v4839_v5, %v3257_v27  ;;  %vm3275_vm5 = vweird.f32 %v4839_v5 }
0x15aa   : > { %vm3276_vm11 = vmor %vm3274_vm13, %vm3275_vm5 }
0x15ab   : > { %v3267_v55 = vsel %vm3266_vm2, %v4837_v44, %v3263_v8  ;;  %v3270_v0 = vmul.f32 %v4839_v5, %v3269_v46 }
0x15ac   : > { %v3278_v18 = vmul.f32 %v3267_v55, %v3244_v60 }
0x15ad   : > { %v3271_v26 = vmul.f32 0.5, %v3270_v0 }
0x15ae   : > { %vm3280_vm4 = vcmp.ge.f32.partialorder %v3278_v18, 0.0  ;;  %v3282_v52 = vmul.f32 0.2, %v3278_v18 }
0x15af   : > { %v3272_v20 = vsub.f32 1.5, %v3271_v26 }
0x15b0   : > { %v6958_v39 = vsel %vm3280_vm4, %v3278_v18, %v3282_v52 }
0x15b1   : > { %3374 = vrot.lane.b32.xlu0 %v6958_v39, %s7659_s22  ;;  %3390 = vrot.lane.b32.xlu1 %v6958_v39, %s7653_s25  ;;  %v3273_v28 = vmul.f32 %v4839_v5, %v3272_v20 }
0x15b2   : > { %3384 = vrot.lane.b32.xlu2 %v6958_v39, %s7654_s21 }
0x15b3   : > { %v3277_v61 = vsel %vm3276_vm11, %v4839_v5, %v3273_v28 }
0x15b4   : > { %v3279_v23 = vmul.f32 %v3277_v61, %v3245_v1 }
0x15b6   : > { %v3283_v57 = vmul.f32 0.2, %v3279_v23  ;;  %vm3281_vm10 = vcmp.ge.f32.partialorder %v3279_v23, 0.0 }
0x15b8   : > { %v6984_v10 = vsel %vm3281_vm10, %v3279_v23, %v3283_v57 }
0x15b9   : > { %3336 = vrot.lane.b32.xlu0 %v6958_v39, %s5283_s26  ;;  %3352 = vrot.lane.b32.xlu1 %v6958_v39, %s5270_s27  ;;  %v3420_v13 = vpack.c.bf16 %v6984_v10, %v6958_v39 }
0x15ba   : > { %3368 = vrot.lane.b32.xlu2 %v6958_v39, %s7656_s5 }
0x15c1   : > { %3326 = vrot.lane.b32.xlu0 %v6958_v39, %s7652_s4  ;;  %3342 = vrot.lane.b32.xlu1 %v6958_v39, %s5271_s24 }
0x15c2   : > { %3358 = vrot.lane.b32.xlu2 %v6958_v39, %s7665_s3 }
0x15c9   : > { %3288 = vrot.lane.b32.xlu0 %v6958_v39, %s7658_s28  ;;  %3304 = vrot.lane.b32.xlu1 %v6958_v39, %s7657_s2 }
0x15ca   : > { %3320 = vrot.lane.b32.xlu2 %v6958_v39, %s5280_s23 }
0x15d1   : > { %3370 = vrot.lane.b32.xlu1 %v6984_v10, %s7656_s5  ;;  %3386 = vrot.lane.b32.xlu0 %v6984_v10, %s7654_s21  ;;  %s7712_s21 = smov 16   ;;  %s7715_s5 = smov 17  }
0x15d2   : > { %3310 = vrot.lane.b32.xlu2 %v6958_v39, %s7655_s9 }
0x15d9   : > { %3360 = vrot.lane.b32.xlu1 %v6984_v10, %s7665_s3  ;;  %3392 = vrot.lane.b32.xlu0 %v6984_v10, %s7653_s25  ;;  %s7797_s3 = sld [smem:[#allocation79_spill]] }
0x15da   : > { %3376 = vrot.lane.b32.xlu2 %v6984_v10, %s7659_s22  ;;  %s7726_s22 = smov 111  }
0x15e1   : > { %3322 = vrot.lane.b32.xlu1 %v6984_v10, %s5280_s23  ;;  %3354 = vrot.lane.b32.xlu0 %v6984_v10, %s5270_s27 }
0x15e2   : > { %3338 = vrot.lane.b32.xlu2 %v6984_v10, %s5283_s26  ;;  %s7798_s26 = sld [smem:[#allocation81_spill]] }
0x15e9   : > { %3312 = vrot.lane.b32.xlu1 %v6984_v10, %s7655_s9  ;;  %3344 = vrot.lane.b32.xlu0 %v6984_v10, %s5271_s24  ;;  %s7713_s9 = smov 112  }
0x15ea   : > { %3328 = vrot.lane.b32.xlu2 %v6984_v10, %s7652_s4 }
0x15f1   : > { %3294 = vrot.lane.b32.xlu1 %v6958_v39, %s7660_s6  ;;  %3306 = vrot.lane.b32.xlu0 %v6984_v10, %s7657_s2  ;;  %s7716_s2 = smov 113  }
0x15f2   : > { %3400 = vrot.lane.b32.xlu2 %v6958_v39, %s7666_s29 }
0x15f9   : > { %3402 = vrot.lane.b32.xlu1 %v6984_v10, %s7666_s29  ;;  %3296 = vrot.lane.b32.xlu0 %v6984_v10, %s7660_s6  ;;  %s7794_s6 = sld [smem:[#allocation80_spill]]  ;;  %s4552_s29 = sshll.u32 %s7802_s0, 3 }
0x15fa   : > { %3290 = vrot.lane.b32.xlu2 %v6984_v10, %s7658_s28  ;;  %s7718_s28 = smov 15   ;;  %s874_s4 = scalar_lea.vmem %s7798_s26, %s4552_s29 }
0x1601   : > { %3406 = vrot.lane.b32.xlu0 %v6958_v39, %s7667_s12 }
0x1602   : > { %3408 = vrot.lane.b32.xlu2 %v6984_v10, %s7667_s12 }
0x160c   : > { %v3385_v12 = vpop.permute.xlu2 %3384 }
0x1614   : > { %v3369_v56 = vpop.permute.xlu2 %3368 }
0x161c   : > { %v3359_v43 = vpop.permute.xlu2 %3358 }
0x1623   : > { %v3375_v62 = vpop.permute.xlu0 %3374  ;;  %v3391_v30 = vpop.permute.xlu1 %3390 }
0x1624   : > { %v3321_v25 = vpop.permute.xlu2 %3320  ;;  %v3396_v49 = vsel %vm7696_vm12, %v3385_v12, %v3391_v30  ;;  %v3380_v29 = vsel %vm1493_vm3, %v3369_v56, %v3375_v62  ;;  %v4490_v30 = vld [vmem:[#allocation16] sm:$0xf] }
0x1625   : > { %v3398_v7 = vmul.f32 %v3396_v49, %v7677_v2  ;;  %v3382_v42 = vmul.f32 %v3380_v29, %v7663_v32 }
0x162b   : > { %v3337_v36 = vpop.permute.xlu0 %3336  ;;  %v3353_v45 = vpop.permute.xlu1 %3352 }
0x162c   : > { %v3311_v22 = vpop.permute.xlu2 %3310  ;;  %v3364_v33 = vsel %vm7698_vm14, %v3353_v45, %v3359_v43 }
0x162d   : > { %v3366_v21 = vmul.f32 %v3364_v33, %v7683_v53 }
0x1633   : > { %v3327_v50 = vpop.permute.xlu0 %3326  ;;  %v3343_v19 = vpop.permute.xlu1 %3342 }
0x1634   : > { %v3377_v40 = vpop.permute.xlu2 %3376  ;;  %v3348_v58 = vsel %vm1473_vm8, %v3337_v36, %v3343_v19 }
0x1635   : > { %v3350_v55 = vmul.f32 %v3348_v58, %v7668_v4 }
0x163b   : > { %v3289_v37 = vpop.permute.xlu0 %3288  ;;  %v3305_v34 = vpop.permute.xlu1 %3304 }
0x163c   : > { %v3339_v31 = vpop.permute.xlu2 %3338  ;;  %v3316_v39 = vsel %vm1453_vm0, %v3305_v34, %v3311_v22 }
0x163d   : > { %v3318_v61 = vmul.f32 %v3316_v39, %v7679_v51 }
0x1643   : > { %v3387_v9 = vpop.permute.xlu0 %3386  ;;  %v3371_v14 = vpop.permute.xlu1 %3370 }
0x1644   : > { %v3381_v16 = vsel %vm1493_vm3, %v3371_v14, %v3377_v40  ;;  %v3329_v3 = vpop.permute.xlu2 %3328  ;;  %vm7700_vm3 = vcmask 56320   ;;  %v4492_v14 = vld [vmem:[#allocation16 + $0x8] sm:$0xf0] }
0x1645   : > { %v3383_v38 = vmul.f32 %v3381_v16, %v7663_v32  ;;  %vm7701_vm6 = vmmov %vm7700_vm3 }
0x1647   : > { %v3422_v6 = vpack.c.bf16 %v3383_v38, %v3382_v42 }
0x164b   : > { %v3393_v15 = vpop.permute.xlu0 %3392  ;;  %v3361_v17 = vpop.permute.xlu1 %3360 }
0x164c   : > { %v3397_v60 = vsel %vm7697_vm7, %v3387_v9, %v3393_v15  ;;  %v3401_v18 = vpop.permute.xlu2 %3400  ;;  %v4594_v9 = vld [vmem:[#allocation16 + $0x4] sm:$0xf] }
0x164d   : > { %v3399_v11 = vmul.f32 %v3397_v60, %v7677_v2 }
0x164f   : > { %v3423_v1 = vpack.c.bf16 %v3399_v11, %v3398_v7 }
0x1651   : > { %3439 = vmatpush.bf16.msrb.mxu3 %v3423_v1 }
0x1653   : > { %v3355_v24 = vpop.permute.xlu0 %3354  ;;  %v3323_v41 = vpop.permute.xlu1 %3322 }
0x1654   : > { %v3365_v44 = vsel %vm7699_vm15, %v3355_v24, %v3361_v17  ;;  %v3333_v63 = vsel %vm7700_vm3, %v3323_v41, %v3329_v3  ;;  %v3291_v57 = vpop.permute.xlu2 %3290 }
0x1655   : > { %v3367_v2 = vmul.f32 %v3365_v44, %v7683_v53  ;;  %3440 = vmatpush.bf16.msrb.mxu3 %v3422_v6  ;;  %v3332_v53 = vsel %vm7701_vm6, %v3321_v25, %v3327_v50  ;;  %v3335_v52 = vmul.f32 %v3333_v63, %v7672_v35  ;;  %v4595_v25 = vld [vmem:[#allocation16 + $0x4] sm:$0xf0] }
0x1656   : > { %v3334_v0 = vmul.f32 %v3332_v53, %v7672_v35  ;;  %v4491_v50 = vor.u32 %v4595_v25, %v4490_v30 }
0x1657   : > { %v3421_v47 = vpack.c.bf16 %v3367_v2, %v3366_v21 }
0x1658   : > { %v3418_v20 = vpack.c.bf16 %v3335_v52, %v3334_v0 }
0x1659   : > { %3441 = vmatpush.bf16.msrb.mxu3 %v3421_v47 }
0x165b   : > { %v3345_v27 = vpop.permute.xlu0 %3344  ;;  %v3313_v32 = vpop.permute.xlu1 %3312 }
0x165c   : > { %v3349_v8 = vsel %vm1473_vm8, %v3339_v31, %v3345_v27  ;;  %vm7702_vm8 = vcmask 449536   ;;  %v4495_v31 = vor.u32 %v4594_v9, %v4492_v14  ;;  %v4601_v9 = vld [vmem:[%s7432_s7 + $0x14] sm:$0xf0]  ;;  %v4600_v14 = vld [vmem:[%s7432_s7 + $0x14] sm:$0xf] }
0x165d   : > { %v3351_v5 = vmul.f32 %v3349_v8, %v7668_v4  ;;  %3442 = vmatpush.bf16.msrb.mxu3 %v3420_v13  ;;  %vm7703_vm2 = vmmov %vm7702_vm8 }
0x165f   : > { %v3419_v46 = vpack.c.bf16 %v3351_v5, %v3350_v55 }
0x1661   : > { %3443 = vmatpush.bf16.msrb.mxu3 %v3419_v46 }
0x1663   : > { %v3307_v26 = vpop.permute.xlu0 %3306  ;;  %v3295_v4 = vpop.permute.xlu1 %3294 }
0x1664   : > { %v3317_v28 = vsel %vm1453_vm0, %v3307_v26, %v3313_v32  ;;  %v3300_v12 = vsel %vm1443_vm9, %v3289_v37, %v3295_v4  ;;  %v4535_v4 = vld [vmem:[%s7432_s7 + $0x38] sm:$0xf0] }
0x1665   : > { %v3319_v23 = vmul.f32 %v3317_v28, %v7679_v51  ;;  %3444 = vmatpush.bf16.msrb.mxu3 %v3418_v20  ;;  %v3302_v43 = vmul.f32 %v3300_v12, %v7681_v59  ;;  %v3409_v51 = vpop.permute.xlu2 %3408  ;;  %v4605_v20 = vld [vmem:[%s7432_s7 + $0x34] sm:$0xf0]  ;;  %v4604_v28 = vld [vmem:[%s7432_s7 + $0x34] sm:$0xf] }
0x1667   : > { %v3417_v10 = vpack.c.bf16 %v3319_v23, %v3318_v61 }
0x1669   : > { %3445 = vmatpush.bf16.msrb.mxu3 %v3417_v10  ;;  %v4603_v10 = vld [vmem:[%s7432_s7 + $0x24] sm:$0xf0] }
0x166b   : > { %v3297_v56 = vpop.permute.xlu0 %3296  ;;  %v3403_v36 = vpop.permute.xlu1 %3402 }
0x166c   : > { %v3301_v35 = vsel %vm1443_vm9, %v3291_v57, %v3297_v56  ;;  %v3413_v19 = vsel %vm7702_vm8, %v3403_v36, %v3409_v51  ;;  %vm7704_vm9 = vcmask 523264   ;;  %v4525_v57 = vld [vmem:[%s7432_s7 + $0x20] sm:$0xf]  ;;  %v4538_v56 = vor.u32 %v4604_v28, %v4535_v4 }
0x166d   : > { %v3303_v62 = vmul.f32 %v3301_v35, %v7681_v59  ;;  %v3415_v37 = vmul.f32 %v6941_v48, %v3413_v19  ;;  %vm7705_vm4 = vmmov %vm7704_vm9  ;;  %v4526_v35 = vor.u32 %v4603_v10, %v4525_v57  ;;  %v4596_v51 = vld [vmem:[%s7442_s17] sm:$0xff]  ;;  %v4597_v19 = vld [vmem:[%s7442_s17 + $0x8] sm:$0xff] }
0x166e   : > { %vm7706_vm5 = vmmov %vm7705_vm4 }
0x166f   : > { %v3416_v45 = vpack.c.bf16 %v3303_v62, %v3302_v43  ;;  %vm7707_vm13 = vmmov %vm7705_vm4 }
0x1670   : > { %vm7708_vm8 = vmmov %vm7705_vm4 }
0x1671   : > { %3446 = vmatpush.bf16.msrb.mxu3 %v3416_v45 }
0x1673   : > { %v3407_v22 = vpop.permute.xlu0 %3406 }
0x1674   : > { %v3412_v34 = vsel %vm7703_vm2, %v3401_v18, %v3407_v22  ;;  %3447 = vmatmul.bf16.vlgmr.msrb.gmra.mxu3 %v4491_v50  ;;  %v4602_v22 = vld [vmem:[%s7432_s7 + $0x24] sm:$0xf]  ;;  %vm7709_vm2 = vmmov %vm7705_vm4 }
0x1675   : > { %v3414_v40 = vmul.f32 %v6941_v48, %v3412_v34  ;;  %3636 = vmatpush.bf16.msra.mxu3 %v4538_v56  ;;  %v4527_v34 = vld [vmem:[%s7432_s7 + $0x28] sm:$0xf0] }
0x1677   : > { %v3424_v59 = vpack.c.bf16 %v3415_v37, %v3414_v40  ;;  %v4530_v37 = vor.u32 %v4602_v22, %v4527_v34  ;;  %v4517_v40 = vld [vmem:[%s7432_s7 + $0x10] sm:$0xf] }
0x1679   : > { %3460 = vmatpush.bf16.msra.mxu0 %v3424_v59  ;;  %3637 = vmatpush.bf16.msra.mxu3 %v4530_v37  ;;  %v4518_v59 = vor.u32 %v4601_v9, %v4517_v40 }
0x167c   : > { %4496 = vmatmul.msk.bf16.vlgmr.msra.gmra.mxu0 %vm1757_vm1, %v4495_v31  ;;  %v4519_v31 = vld [vmem:[%s7432_s7 + $0x18] sm:$0xf0] }
0x16f7   : > { %v3448_v49 = vpop.f32.mrf.mxu3 }
0x16f9   : > { %v3462_v15 = vpop.f32.mrf.mxu0 }
0x16fa   : > { %v3463_v17 = vadd.f32 %v3462_v15, %v3448_v49  ;;  %v4522_v49 = vor.u32 %v4600_v14, %v4519_v31  ;;  %v4509_v15 = vld [vmem:[%s7432_s7] sm:$0xf]  ;;  %v7733_v31 = vld [vmem:[#allocation30_spill] sm:$0xff] }
0x16fc   : > { %v3467_v16 = vsel %vm7704_vm9, %v3463_v17, 0.0  ;;  %3638 = vmatpush.bf16.msra.mxu3 %v4522_v49  ;;  %vm7710_vm9 = vmmov %vm7709_vm2 }
0x16fd   : > { %3468 = vadd.xlane.f32.xlu1 %v3467_v16  ;;  %v4598_v16 = vld [vmem:[%s7432_s7 + $0x4] sm:$0xf] }
0x16ff   : > { %v3450_v60 = vpop.f32.mrf.mxu3 }
0x1701   : > { %v3464_v7 = vpop.f32.mrf.mxu0 }
0x1702   : > { %v3465_v11 = vadd.f32 %v3464_v7, %v3450_v60  ;;  %v4511_v7 = vld [vmem:[%s7432_s7 + $0x8] sm:$0xf0] }
0x1704   : > { %v3470_v29 = vsel %vm7705_vm4, %v3465_v11, 0.0  ;;  %vm7711_vm4 = vmmov %vm7709_vm2 }
0x1705   : > { %3471 = vadd.xlane.f32.xlu0 %v3470_v29 }
0x1770   : > { %v3469_v48 = vpop.xlane.xlu1 %3468 }
0x1771   : > { %v3473_v38 = vmul.f32 %v3469_v48, %v7693_v54 }
0x1773   : > { %v3475_v1 = vsub.f32 %v3463_v17, %v3473_v38  ;;  %v4599_v17 = vld [vmem:[%s7432_s7 + $0x4] sm:$0xf0] }
0x1774   : > { %v4510_v60 = vor.u32 %v4599_v17, %v4509_v15  ;;  %v7734_v15 = vld [vmem:[#allocation31_spill] sm:$0xff] }
0x1775   : > { %v3477_v42 = vmul.f32 %v3475_v1, %v3475_v1 }
0x1777   : > { %v3479_v33 = vsel %vm7706_vm5, %v3477_v42, 0.0 }
0x1778   : > { %v3472_v3 = vpop.xlane.xlu0 %3471  ;;  %3480 = vadd.xlane.f32.xlu2 %v3479_v33 }
0x1779   : > { %v3474_v24 = vmul.f32 %v3472_v3, %v7693_v54 }
0x177b   : > { %v3476_v41 = vsub.f32 %v3465_v11, %v3474_v24  ;;  %v4514_v11 = vor.u32 %v4598_v16, %v4511_v7 }
0x177d   : > { %v3478_v6 = vmul.f32 %v3476_v41, %v3476_v41  ;;  %3639 = vmatpush.bf16.msra.mxu3 %v4514_v11 }
0x177f   : > { %v3482_v44 = vsel %vm7707_vm13, %v3478_v6, 0.0 }
0x1780   : > { %3483 = vadd.xlane.f32.xlu1 %v3482_v44 }
0x17eb   : > { %v3481_v21 = vpop.xlane.xlu2 %3480 }
0x17ec   : > { %v3485_v2 = vmul.f32 %v3481_v21, %v7693_v54 }
0x17ee   : > { %v3487_v47 = vadd.f32 1e-05, %v3485_v2 }
0x17f0   : > { %4840 = vrsqrt.f32 %v3487_v47  ;;  %vm3495_vm10 = vweird.f32 %v3487_v47 }
0x17f3   : > { %v3484_v58 = vpop.xlane.xlu1 %3483 }
0x17f4   : > { %v3486_v27 = vmul.f32 %v3484_v58, %v7693_v54  ;;  %v4533_v54 = vld [vmem:[%s7432_s7 + $0x30] sm:$0xf] }
0x17f5   : > { %v4534_v23 = vor.u32 %v4605_v20, %v4533_v54 }
0x17f6   : > { %v4841_v32 = vpop.eup %4840  ;;  %v3488_v13 = vadd.f32 1e-05, %v3486_v27  ;;  %v7717_v27 = vld [vmem:[#allocation46_spill] sm:$0xff] }
0x17f7   : > { %v3490_v63 = vmul.f32 %v4841_v32, %v3487_v47  ;;  %vm3496_vm11 = vweird.f32 %v4841_v32  ;;  %3617 = vmatpush.bf16.msra.mxu1 %v4534_v23  ;;  %v7714_v47 = vld [vmem:[#allocation45_spill] sm:$0xff] }
0x17f8   : > { %4842 = vrsqrt.f32 %v3488_v13  ;;  %vm3497_vm12 = vmor %vm3495_vm10, %vm3496_vm11  ;;  %vm3505_vm14 = vweird.f32 %v3488_v13 }
0x17f9   : > { %v3491_v8 = vmul.f32 %v4841_v32, %v3490_v63 }
0x17fb   : > { %v3492_v55 = vmul.f32 0.5, %v3491_v8  ;;  %3618 = vmatpush.bf16.msra.mxu1 %v4526_v35  ;;  %v7719_v8 = vld [vmem:[#allocation29_spill] sm:$0xff] }
0x17fc   : > { %vm7720_vm5 = vcmp.lt.s32.totalorder %v7719_v8, 1  ;;  %vm7722_vm11 = vcmp.lt.s32.totalorder %v7719_v8, 16 }
0x17fd   : > { %v3493_v18 = vsub.f32 1.5, %v3492_v55  ;;  %vm7721_vm13 = vmmov %vm7720_vm5 }
0x17fe   : > { %v4843_v5 = vpop.eup %4842  ;;  %vm7723_vm10 = vmmov %vm7722_vm11 }
0x17ff   : > { %v3494_v53 = vmul.f32 %v4841_v32, %v3493_v18  ;;  %v3500_v52 = vmul.f32 %v4843_v5, %v3488_v13  ;;  %vm3506_vm7 = vweird.f32 %v4843_v5  ;;  %3619 = vmatpush.bf16.msra.mxu1 %v4518_v59 }
0x1800   : > { %vm3507_vm15 = vmor %vm3505_vm14, %vm3506_vm7  ;;  %vm7727_vm14 = vcmp.lt.s32.totalorder %v7719_v8, 112 }
0x1801   : > { %v3501_v46 = vmul.f32 %v4843_v5, %v3500_v52  ;;  %v3498_v0 = vsel %vm3497_vm12, %v4841_v32, %v3494_v53  ;;  %vm7724_vm12 = vcmp.lt.s32.totalorder %v7719_v8, 17 }
0x1802   : > { %v3509_v61 = vmul.f32 %v3498_v0, %v3475_v1  ;;  %vm7725_vm7 = vmmov %vm7724_vm12 }
0x1803   : > { %v3502_v39 = vmul.f32 0.5, %v3501_v46  ;;  %3620 = vmatpush.bf16.msra.mxu1 %v4510_v60 }
0x1804   : > { %v3513_v30 = vmul.f32 0.2, %v3509_v61  ;;  %vm3511_vm3 = vcmp.ge.f32.partialorder %v3509_v61, 0.0 }
0x1805   : > { %v3503_v26 = vsub.f32 1.5, %v3502_v39 }
0x1806   : > { %v3515_v36 = vsel %vm3511_vm3, %v3509_v61, %v3513_v30  ;;  %vm7729_vm3 = vcmp.lt.s32.totalorder %v7719_v8, 113 }
0x1807   : > { %v3504_v12 = vmul.f32 %v4843_v5, %v3503_v26 }
0x1809   : > { %v3508_v43 = vsel %vm3507_vm15, %v4843_v5, %v3504_v12  ;;  %vm7728_vm15 = vmmov %vm7727_vm14 }
0x180a   : > { %v3510_v62 = vmul.f32 %v3508_v43, %v3476_v41 }
0x180c   : > { %vm3512_vm6 = vcmp.ge.f32.partialorder %v3510_v62, 0.0  ;;  %v3514_v25 = vmul.f32 0.2, %v3510_v62 }
0x180e   : > { %v3516_v45 = vsel %vm3512_vm6, %v3510_v62, %v3514_v25  ;;  %vm7730_vm6 = vmmov %vm7729_vm3 }
0x180f   : > { %v3521_v50 = vpack.c.bf16 %v3516_v45, %v3515_v36 }
0x1811   : > { %3545 = vmatpush.bf16.msrb.mxu0 %v3521_v50 }
0x1814   : > { %4505 = vmatmul.msk.bf16.vlgmr.msrb.gmra.mxu0 %vm1757_vm1, %v4596_v51 }
0x1824   : > { %4506 = vmatmul.msk.bf16.gmra.mxu0 %vm1757_vm1, %v4597_v19 }
0x1891   : > { %v3547_v29 = vpop.f32.mrf.mxu0 }
0x1899   : > { %v3549_v48 = vpop.f32.mrf.mxu0 }
0x189a   : > { %v3557_v38 = vpack.c.bf16 %v3549_v48, %v3547_v29  ;;  %v7737_v29 = vld [vmem:[#allocation32_spill] sm:$0xff] }
0x189c   : > { %4539 = vmatmul.msk.bf16.vlgmr.msra.gmra.mxu1 %vm7708_vm8, %v3557_v38  ;;  %4541 = vmatmul.msk.bf16.vlgmr.msra.gmra.mxu3 %vm7709_vm2, %v3557_v38  ;;  %vm7731_vm8 = vmmov %vm7727_vm14  ;;  %v7738_v38 = vld [vmem:[#allocation33_spill] sm:$0xff] }
0x189d   : > { %vm7732_vm2 = vmmov %vm7731_vm8 }
0x18a1   : > { %v3552_v1 = vpop.f32.mrf.mxu0 }
0x18a9   : > { %v3554_v42 = vpop.f32.mrf.mxu0 }
0x18aa   : > { %v3558_v33 = vpack.c.bf16 %v3554_v42, %v3552_v1 }
0x18ac   : > { %4540 = vmatmul.msk.bf16.gmra.mxu1 %vm7710_vm9, %v3558_v33  ;;  %4542 = vmatmul.msk.bf16.gmra.mxu3 %vm7711_vm4, %v3558_v33  ;;  %vm7735_vm9 = vmmov %vm7729_vm3 }
0x18ad   : > { %vm7736_vm4 = vmmov %vm7729_vm3 }
0x1919   : > { %v3622_v3 = vpop.f32.mrf.mxu1 }
0x191f   : > { %v3641_v24 = vpop.f32.mrf.mxu3 }
0x1921   : > { %v3624_v41 = vpop.f32.mrf.mxu1 }
0x1922   : > { %3651 = vrot.lane.b32.xlu0 %v3624_v41, %s5271_s24 }
0x1927   : > { %v3643_v6 = vpop.f32.mrf.mxu3 }
0x1928   : > { %3653 = vrot.lane.b32.xlu2 %v3643_v6, %s5271_s24 }
0x1929   : > { %v3627_v44 = vpop.f32.mrf.mxu1 }
0x192a   : > { %3659 = vrot.lane.b32.xlu1 %v3627_v44, %s7712_s21 }
0x192f   : > { %v3646_v21 = vpop.f32.mrf.mxu3 }
0x1930   : > { %3661 = vrot.lane.b32.xlu0 %v3646_v21, %s7712_s21 }
0x1931   : > { %v3629_v2 = vpop.f32.mrf.mxu1 }
0x1932   : > { %3765 = vrot.lane.b32.xlu1 %v7714_v47, %s7713_s9  ;;  %3667 = vrot.lane.b32.xlu2 %v3629_v2, %s7715_s5  ;;  %v7739_v2 = vld [vmem:[#allocation34_spill] sm:$0xff] }
0x1937   : > { %v3648_v58 = vpop.f32.mrf.mxu3 }
0x1938   : > { %3669 = vrot.lane.b32.xlu0 %v3648_v58, %s7715_s5  ;;  %v7740_v58 = vld [vmem:[#allocation47_spill] sm:$0xff] }
0x193a   : > { %3753 = vrot.lane.b32.xlu1 %v7717_v27, %s7716_s2  ;;  %3749 = vrot.lane.b32.xlu2 %v7714_v47, %s7716_s2 }
0x1940   : > { %3769 = vrot.lane.b32.xlu0 %v7717_v27, %s7713_s9 }
0x1942   : > { %3727 = vrot.lane.b32.xlu1 %v7717_v27, %s5271_s24  ;;  %3723 = vrot.lane.b32.xlu2 %v7714_v47, %s5271_s24 }
0x1948   : > { %3707 = vrot.lane.b32.xlu0 %v7714_v47, %s7718_s28 }
0x194a   : > { %3691 = vrot.lane.b32.xlu1 %v7714_v47, %s7712_s21  ;;  %3711 = vrot.lane.b32.xlu2 %v7717_v27, %s7718_s28 }
0x1950   : > { %3695 = vrot.lane.b32.xlu0 %v7717_v27, %s7712_s21 }
0x1952   : > { %3675 = vrot.lane.b32.xlu2 %v7714_v47, %s7715_s5 }
0x1982   : > { %v3654_v13 = vpop.permute.xlu2 %3653 }
0x198c   : > { %v3668_v39 = vpop.permute.xlu2 %3667 }
0x1994   : > { %v3652_v32 = vpop.permute.xlu0 %3651  ;;  %v3750_v57 = vpop.permute.xlu2 %3749 }
0x1995   : > { %v3655_v55 = vsel %vm7720_vm5, %v3652_v32, %v3654_v13  ;;  %v3656_v18 = vsel %vm7721_vm13, %v3654_v13, %v3652_v32  ;;  %v3745_v32 = vmul.f32 %v7740_v58, %v7739_v2  ;;  %vm7741_vm5 = vcmp.lt.s32.totalorder %v7719_v8, 127 }
0x1996   : > { %v3657_v46 = vadd.f32 %v3656_v18, %v3622_v3  ;;  %v3658_v0 = vadd.f32 %v3655_v55, %v3641_v24  ;;  %vm7742_vm13 = vmmov %vm7741_vm5  ;;  %v7743_v55 = vld [vmem:[#allocation35_spill] sm:$0xff]  ;;  %v7744_v18 = vld [vmem:[#allocation48_spill] sm:$0xff] }
0x199c   : > { %v3660_v5 = vpop.permute.xlu1 %3659  ;;  %v3724_v10 = vpop.permute.xlu2 %3723 }
0x19a2   : > { %v3662_v63 = vpop.permute.xlu0 %3661 }
0x19a3   : > { %v3663_v53 = vsel %vm7722_vm11, %v3660_v5, %v3662_v63  ;;  %v3664_v52 = vsel %vm7723_vm10, %v3662_v63, %v3660_v5  ;;  %v3746_v5 = vmul.f32 %v7744_v18, %v7743_v55  ;;  %vm7745_vm11 = vcmp.lt.s32.totalorder %v7719_v8, 1 }
0x19a4   : > { %v3665_v54 = vadd.f32 %v3664_v52, %v3657_v46  ;;  %v3666_v26 = vadd.f32 %v3663_v53, %v3658_v0  ;;  %v3766_v12 = vpop.permute.xlu1 %3765  ;;  %v7211_v35 = vpop.permute.xlu2 %3711  ;;  %vm7746_vm10 = vmmov %vm7745_vm11 }
0x19aa   : > { %v3670_v20 = vpop.permute.xlu0 %3669 }
0x19ab   : > { %v3671_v28 = vsel %vm7724_vm12, %v3668_v39, %v3670_v20  ;;  %v3672_v61 = vsel %vm7725_vm7, %v3670_v20, %v3668_v39  ;;  %vm7747_vm12 = vmmov %vm7746_vm10 }
0x19ac   : > { %v7169_v23 = vadd.f32 %v3672_v61, %v3665_v54  ;;  %v7171_v4 = vadd.f32 %v3671_v28, %v3666_v26  ;;  %v3754_v43 = vpop.permute.xlu1 %3753  ;;  %v7215_v30 = vpop.permute.xlu2 %3675  ;;  %vm7748_vm7 = vmmov %vm7746_vm10 }
0x19ad   : > { %v3757_v7 = vsel %vm7735_vm9, %v3750_v57, %v3754_v43  ;;  %v3759_v11 = vsel %vm7736_vm4, %v3754_v43, %v3750_v57  ;;  %v7749_v43 = vld [vmem:[#allocation36_spill] sm:$0xff] }
0x19ae   : > { %3751 = vrot.lane.b32.xlu0 %v7169_v23, %s7716_s2  ;;  %3767 = vrot.lane.b32.xlu2 %v7169_v23, %s7713_s9  ;;  %v3761_v3 = vmul.f32 %v3757_v7, %v7737_v29  ;;  %v3762_v24 = vmul.f32 %v3759_v11, %v7738_v38 }
0x19af   : > { %3771 = vrot.lane.b32.xlu1 %v7171_v4, %s7713_s9 }
0x19b2   : > { %v3770_v56 = vpop.permute.xlu0 %3769 }
0x19b3   : > { %v3773_v51 = vsel %vm7727_vm14, %v3766_v12, %v3770_v56  ;;  %v3775_v19 = vsel %vm7728_vm15, %v3770_v56, %v3766_v12  ;;  %v3805_v12 = vpack.c.bf16 %v7169_v23, %v7714_v47  ;;  %v3806_v56 = vpack.c.bf16 %v7171_v4, %v7717_v27 }
0x19b4   : > { %v3728_v25 = vpop.permute.xlu1 %3727  ;;  %v3777_v49 = vmul.f32 %v3773_v51, %v7733_v31  ;;  %v3778_v17 = vmul.f32 %v3775_v19, %v7734_v15  ;;  %v7750_v51 = vld [vmem:[#allocation37_spill] sm:$0xff]  ;;  %vm7751_vm14 = vcmp.lt.s32.totalorder %v7719_v8, 15 }
0x19b5   : > { %v3731_v54 = vsel %vm7745_vm11, %v3724_v10, %v3728_v25  ;;  %v3733_v26 = vsel %vm7746_vm10, %v3728_v25, %v3724_v10  ;;  %vm7752_vm15 = vmmov %vm7751_vm14 }
0x19b6   : > { %3739 = vrot.lane.b32.xlu0 %v7169_v23, %s5270_s27  ;;  %3755 = vrot.lane.b32.xlu2 %v7171_v4, %s7716_s2  ;;  %v3736_v10 = vmul.f32 %v3731_v54, %v7750_v51 }
0x19b7   : > { %3741 = vrot.lane.b32.xlu1 %v7171_v4, %s5270_s27 }
0x19ba   : > { %v7213_v62 = vpop.permute.xlu0 %3707 }
0x19bc   : > { %v7219_v50 = vpop.permute.xlu1 %3691 }
0x19be   : > { %3725 = vrot.lane.b32.xlu0 %v7169_v23, %s5271_s24  ;;  %3729 = vrot.lane.b32.xlu2 %v7171_v4, %s5271_s24 }
0x19bf   : > { %3709 = vrot.lane.b32.xlu1 %v7169_v23, %s7718_s28 }
0x19c2   : > { %v7217_v45 = vpop.permute.xlu0 %3695 }
0x19c6   : > { %3713 = vrot.lane.b32.xlu0 %v7171_v4, %s7718_s28  ;;  %3693 = vrot.lane.b32.xlu2 %v7169_v23, %s7712_s21 }
0x19c7   : > { %3697 = vrot.lane.b32.xlu1 %v7171_v4, %s7712_s21 }
0x19ce   : > { %3677 = vrot.lane.b32.xlu0 %v7169_v23, %s7715_s5  ;;  %3681 = vrot.lane.b32.xlu2 %v7171_v4, %s7715_s5 }
0x19cf   : > { %3679 = vrot.lane.b32.xlu1 %v7717_v27, %s7715_s5 }
0x19d6   : > { %3781 = vrot.lane.b32.xlu0 %v7714_v47, %s7726_s22  ;;  %3785 = vrot.lane.b32.xlu2 %v7717_v27, %s7726_s22  ;;  %v3715_v47 = vsel %vm7751_vm14, %v7213_v62, %v7211_v35  ;;  %v3717_v27 = vsel %vm7752_vm15, %v7211_v35, %v7213_v62 }
0x19d7   : > { %3783 = vrot.lane.b32.xlu1 %v7169_v23, %s7726_s22 }
0x19de   : > { %3787 = vrot.lane.b32.xlu0 %v7171_v4, %s7726_s22 }
0x1a08   : > { %v3768_v36 = vpop.permute.xlu2 %3767 }
0x1a10   : > { %v3756_v34 = vpop.permute.xlu2 %3755 }
0x1a18   : > { %v3730_v46 = vpop.permute.xlu2 %3729 }
0x1a20   : > { %v3752_v22 = vpop.permute.xlu0 %3751  ;;  %v3694_v23 = vpop.permute.xlu2 %3693 }
0x1a21   : > { %v3772_v37 = vpop.permute.xlu1 %3771  ;;  %v3758_v40 = vsel %vm7729_vm3, %v3752_v22, %v3756_v34  ;;  %v3760_v9 = vsel %vm7730_vm6, %v3756_v34, %v3752_v22  ;;  %vm7755_vm3 = vmmov %vm7751_vm14 }
0x1a22   : > { %v3774_v14 = vsel %vm7731_vm8, %v3768_v36, %v3772_v37  ;;  %v3776_v59 = vsel %vm7732_vm2, %v3772_v37, %v3768_v36  ;;  %v3763_v48 = vmul.f32 %v3758_v40, %v7737_v29  ;;  %v3764_v1 = vmul.f32 %v3760_v9, %v7738_v38  ;;  %v7753_v37 = vld [vmem:[#allocation38_spill] sm:$0xff]  ;;  %v7754_v9 = vld [vmem:[#allocation39_spill] sm:$0xff]  ;;  %vm7756_vm6 = vmmov %vm7755_vm3 }
0x1a23   : > { %v3779_v16 = vmul.f32 %v3774_v14, %v7733_v31  ;;  %v3780_v60 = vmul.f32 %v3776_v59, %v7734_v15  ;;  %v3735_v36 = vmul.f32 %v3733_v26, %v7749_v43  ;;  %v3719_v40 = vmul.f32 %v3717_v27, %v7753_v37  ;;  %v7328_v27 = vld [vmem:[#allocation2 + $0x18] ss:$0 sm:$0xff] }
0x1a24   : > { %v3809_v44 = vpack.c.bf16 %v3763_v48, %v3761_v3  ;;  %v3810_v21 = vpack.c.bf16 %v3764_v1, %v3762_v24  ;;  %v3720_v14 = vmul.f32 %v3715_v47, %v7754_v9  ;;  %vm7757_vm8 = vcmp.lt.s32.totalorder %v7719_v8, 16  ;;  %v7761_v48 = vld [vmem:[#allocation40_spill] sm:$0xff]  ;;  %v7762_v3 = vld [vmem:[#allocation41_spill] sm:$0xff] }
0x1a25   : > { %v3811_v42 = vpack.c.bf16 %v3779_v16, %v3777_v49  ;;  %v3812_v33 = vpack.c.bf16 %v3780_v60, %v3778_v17  ;;  %vm7758_vm2 = vmmov %vm7757_vm8 }
0x1a26   : > { %vm7759_vm9 = vmmov %vm7758_vm2 }
0x1a27   : > { %3825 = vmatpush.bf16.msrb.mxu2 %v3811_v42  ;;  %3851 = vmatpush.bf16.msra.mxu0 %v3812_v33  ;;  %v3701_v7 = vsel %vm7759_vm9, %v7217_v45, %v7219_v50  ;;  %vm7760_vm4 = vmmov %vm7758_vm2 }
0x1a28   : > { %v3740_v41 = vpop.permute.xlu0 %3739  ;;  %v3699_v11 = vsel %vm7760_vm4, %v7219_v50, %v7217_v45 }
0x1a29   : > { %v3742_v6 = vpop.permute.xlu1 %3741 }
0x1a2a   : > { %v3743_v13 = vsel %vm7741_vm5, %v3740_v41, %v3742_v6  ;;  %v3744_v63 = vsel %vm7742_vm13, %v3742_v6, %v3740_v41  ;;  %v3703_v41 = vmul.f32 %v3701_v7, %v7761_v48  ;;  %v3815_v6 = vld [vmem:[#allocation18] sm:$0xff]  ;;  %vm7763_vm5 = vcmp.lt.s32.totalorder %v7719_v8, 17 }
0x1a2b   : > { %v3747_v53 = vmul.f32 %v3743_v13, %v7739_v2  ;;  %v3748_v52 = vmul.f32 %v3744_v63, %v7743_v55  ;;  %3826 = vmatpush.bf16.msrb.mxu2 %v3809_v44  ;;  %3852 = vmatpush.bf16.msra.mxu0 %v3810_v21  ;;  %v3704_v44 = vmul.f32 %v3699_v11, %v7762_v3  ;;  %v3682_v21 = vpop.permute.xlu2 %3681  ;;  %vm7764_vm13 = vmmov %vm7763_vm5  ;;  %v3817_v18 = vunpack.c.l.b16 %v3815_v6 }
0x1a2c   : > { %vm7767_vm11 = vmmov %vm7763_vm5 }
0x1a2d   : > { %v3807_v0 = vpack.c.bf16 %v3747_v53, %v3745_v32  ;;  %v3808_v39 = vpack.c.bf16 %v3748_v52, %v3746_v5  ;;  %v7765_v5 = vld [vmem:[#allocation42_spill] sm:$0xff]  ;;  %v7766_v52 = vld [vmem:[#allocation43_spill] sm:$0xff]  ;;  %vm7768_vm10 = vmmov %vm7763_vm5 }
0x1a2f   : > { %3827 = vmatpush.bf16.msrb.mxu2 %v3807_v0  ;;  %3853 = vmatpush.bf16.msra.mxu0 %v3808_v39 }
0x1a30   : > { %v3726_v20 = vpop.permute.xlu0 %3725 }
0x1a31   : > { %v3732_v28 = vsel %vm7747_vm12, %v3726_v20, %v3730_v46  ;;  %v3734_v61 = vsel %vm7748_vm7, %v3730_v46, %v3726_v20  ;;  %v3710_v57 = vpop.permute.xlu1 %3709  ;;  %vm7769_vm12 = vcmp.lt.s32.totalorder %v7719_v8, 111 }
0x1a32   : > { %v3737_v25 = vmul.f32 %v3734_v61, %v7749_v43  ;;  %v3738_v19 = vmul.f32 %v3732_v28, %v7750_v51  ;;  %v3819_v61 = vpack.c.b16 %v3817_v18, %v3817_v18  ;;  %vm7770_vm7 = vmmov %vm7769_vm12 }
0x1a33   : > { %3828 = vmatpush.bf16.msrb.mxu2 %v3805_v12  ;;  %3854 = vmatpush.bf16.msra.mxu0 %v3806_v56  ;;  %v3786_v12 = vpop.permute.xlu2 %3785  ;;  %vm7771_vm14 = vmmov %vm7770_vm7 }
0x1a34   : > { %v3803_v22 = vpack.c.bf16 %v3737_v25, %v3735_v36  ;;  %v3804_v34 = vpack.c.bf16 %v3738_v19, %v3736_v10  ;;  %v3818_v25 = vunpack.c.h.b16 %v3815_v6  ;;  %vm7772_vm15 = vmmov %vm7770_vm7  ;;  %v7773_v6 = vld [vmem:[#allocation44_spill] sm:$0xff] }
0x1a35   : > { %vm7774_vm9 = vmmov %vm7770_vm7 }
0x1a36   : > { %vm7775_vm4 = vmmov %vm7770_vm7 }
0x1a37   : > { %3829 = vmatpush.bf16.msrb.mxu2 %v3803_v22  ;;  %3855 = vmatpush.bf16.msra.mxu0 %v3804_v34  ;;  %v7325_v34 = vld [vmem:[#allocation2 + $0x10] ss:$0 sm:$0xff] }
0x1a38   : > { %v3714_v4 = vpop.permute.xlu0 %3713 }
0x1a39   : > { %v3716_v59 = vsel %vm7755_vm3, %v3710_v57, %v3714_v4  ;;  %v3718_v49 = vsel %vm7756_vm6, %v3714_v4, %v3710_v57  ;;  %v3698_v17 = vpop.permute.xlu1 %3697 }
0x1a3a   : > { %v3721_v16 = vmul.f32 %v3718_v49, %v7753_v37  ;;  %v3722_v60 = vmul.f32 %v3716_v59, %v7754_v9  ;;  %v3700_v35 = vsel %vm7757_vm8, %v3694_v23, %v3698_v17  ;;  %v3702_v62 = vsel %vm7758_vm2, %v3698_v17, %v3694_v23 }
0x1a3b   : > { %v3705_v1 = vmul.f32 %v3702_v62, %v7761_v48  ;;  %v3706_v24 = vmul.f32 %v3700_v35, %v7762_v3  ;;  %v3820_v49 = vpack.c.b16 %v3818_v25, %v3818_v25 }
0x1a3c   : > { %v3801_v42 = vpack.c.bf16 %v3721_v16, %v3719_v40  ;;  %v3802_v33 = vpack.c.bf16 %v3722_v60, %v3720_v14 }
0x1a3d   : > { %v3799_v32 = vpack.c.bf16 %v3705_v1, %v3703_v41  ;;  %v3800_v63 = vpack.c.bf16 %v3706_v24, %v3704_v44 }
0x1a3e   : > { %3830 = vmatpush.bf16.msrb.mxu2 %v3801_v42  ;;  %3856 = vmatpush.bf16.msra.mxu0 %v3802_v33 }
0x1a40   : > { %v3678_v58 = vpop.permute.xlu0 %3677 }
0x1a41   : > { %v3684_v13 = vsel %vm7763_vm5, %v3678_v58, %v3682_v21  ;;  %v3686_v45 = vsel %vm7764_vm13, %v3682_v21, %v3678_v58  ;;  %v3680_v50 = vpop.permute.xlu1 %3679  ;;  %vm7776_vm5 = vcmask 1043456  }
0x1a42   : > { %v3689_v53 = vmul.f32 %v3686_v45, %v7765_v5  ;;  %v3690_v46 = vmul.f32 %v3684_v13, %v7766_v52  ;;  %v3683_v0 = vsel %vm7767_vm11, %v7215_v30, %v3680_v50  ;;  %v3685_v39 = vsel %vm7768_vm10, %v3680_v50, %v7215_v30  ;;  %3831 = vmatpush.bf16.msrb.mxu2 %v3799_v32  ;;  %vm7777_vm13 = vmmov %vm7776_vm5 }
0x1a43   : > { %v3687_v54 = vmul.f32 %v3685_v39, %v7765_v5  ;;  %v3688_v26 = vmul.f32 %v3683_v0, %v7766_v52  ;;  %3857 = vmatpush.bf16.msra.mxu0 %v3800_v63  ;;  %vm7778_vm11 = vcmp.lt.s32.totalorder %v7719_v8, 113 }
0x1a44   : > { %vm7779_vm10 = vmmov %vm7778_vm11 }
0x1a45   : > { %v3797_v20 = vpack.c.bf16 %v3689_v53, %v3687_v54  ;;  %v3798_v28 = vpack.c.bf16 %v3690_v46, %v3688_v26 }
0x1a47   : > { %3832 = vmatpush.bf16.msrb.mxu2 %v3797_v20  ;;  %3858 = vmatpush.bf16.msra.mxu0 %v3798_v28 }
0x1a48   : > { %v3782_v57 = vpop.permute.xlu0 %3781 }
0x1a49   : > { %v3789_v56 = vsel %vm7769_vm12, %v3782_v57, %v3786_v12  ;;  %v3791_v30 = vsel %vm7770_vm7, %v3786_v12, %v3782_v57  ;;  %v3784_v36 = vpop.permute.xlu1 %3783  ;;  %vm7780_vm12 = vcmp.lt.s32.totalorder %v7719_v8, 112 }
0x1a4a   : > { %3833 = vmatmul.bf16.vlgmr.msrb.gmra.mxu2 %v3819_v61  ;;  %3859 = vmatmul.bf16.vlgmr.msra.gmra.mxu0 %v3819_v61  ;;  %v3793_v47 = vmul.f32 %v7325_v34, %v3789_v56  ;;  %v3794_v23 = vmul.f32 %v7328_v27, %v3791_v30  ;;  %vm7781_vm7 = vmmov %vm7780_vm12 }
0x1a50   : > { %v3788_v10 = vpop.permute.xlu0 %3787 }
0x1a51   : > { %v3790_v19 = vsel %vm7771_vm14, %v3784_v36, %v3788_v10  ;;  %v3792_v22 = vsel %vm7772_vm15, %v3788_v10, %v3784_v36  ;;  %vm7782_vm14 = vcmp.lt.s32.totalorder %v7719_v8, 127 }
0x1a52   : > { %v3795_v4 = vmul.f32 %v7325_v34, %v3790_v19  ;;  %v3796_v40 = vmul.f32 %v7328_v27, %v3792_v22  ;;  %vm7783_vm15 = vmmov %vm7782_vm14 }
0x1a54   : > { %v3813_v14 = vpack.c.bf16 %v3795_v4, %v3793_v47  ;;  %v3814_v59 = vpack.c.bf16 %v3796_v40, %v3794_v23 }
0x1a56   : > { %3845 = vmatpush.bf16.msra.mxu2 %v3813_v14  ;;  %3871 = vmatpush.bf16.msrb.mxu1 %v3814_v59 }
0x1a59   : > { %4544 = vmatmul.msk.bf16.vlgmr.msrb.gmra.mxu1 %vm1757_vm1, %v3820_v49 }
0x1a5a   : > { %4543 = vmatmul.msk.bf16.vlgmr.msra.gmra.mxu2 %vm1757_vm1, %v3820_v49 }
0x1ac7   : > { %v3860_v17 = vpop.f32.mrf.mxu0 }
0x1acd   : > { %v3834_v16 = vpop.f32.mrf.mxu2 }
0x1acf   : > { %v3862_v60 = vpop.f32.mrf.mxu0 }
0x1ad5   : > { %v3836_v35 = vpop.f32.mrf.mxu2 }
0x1ad6   : > { %v3873_v62 = vpop.f32.mrf.mxu1 }
0x1ad7   : > { %v3874_v7 = vadd.f32 %v3873_v62, %v3860_v17 }
0x1add   : > { %v3847_v11 = vpop.f32.mrf.mxu2 }
0x1ade   : > { %v3848_v1 = vadd.f32 %v3847_v11, %v3834_v16  ;;  %v3875_v42 = vpop.f32.mrf.mxu1 }
0x1ae0   : > { %v3877_v33 = vadd.f32 %v3874_v7, %v3848_v1 }
0x1ae2   : > { %3878 = vadd.xlane.f32.xlu1 %v3877_v33 }
0x1ae5   : > { %v3849_v24 = vpop.f32.mrf.mxu2 }
0x1b55   : > { %v3879_v41 = vpop.xlane.xlu1 %3878 }
0x1b56   : > { %v3880_v44 = vmul.f32 %v3879_v41, %v7773_v6 }
0x1b58   : > { %v3881_v21 = vsub.f32 %v3848_v1, %v3880_v44  ;;  %v3882_v58 = vsub.f32 %v3874_v7, %v3880_v44 }
0x1b5a   : > { %v3883_v32 = vmul.f32 %v3881_v21, %v3881_v21  ;;  %v3884_v13 = vmul.f32 %v3882_v58, %v3882_v58 }
0x1b5c   : > { %v3885_v45 = vadd.f32 %v3884_v13, %v3883_v32 }
0x1b5e   : > { %3886 = vadd.xlane.f32.xlu2 %v3885_v45 }
0x1bd1   : > { %v3887_v50 = vpop.xlane.xlu2 %3886 }
0x1bd2   : > { %v3888_v63 = vmul.f32 %v3887_v50, %v7773_v6 }
0x1bd4   : > { %v3889_v18 = vadd.f32 1e-05, %v3888_v63 }
0x1bd6   : > { %4844 = vrsqrt.f32 %v3889_v18  ;;  %vm3896_vm3 = vweird.f32 %v3889_v18 }
0x1bdc   : > { %v4845_v53 = vpop.eup %4844 }
0x1bdd   : > { %v3891_v46 = vmul.f32 %v4845_v53, %v3889_v18  ;;  %vm3897_vm1 = vweird.f32 %v4845_v53 }
0x1bde   : > { %vm3898_vm6 = vmor %vm3896_vm3, %vm3897_vm1  ;;  %vm7784_vm1 = vcmp.lt.s32.totalorder %v7719_v8, 1 }
0x1bdf   : > { %v3892_v0 = vmul.f32 %v4845_v53, %v3891_v46  ;;  %vm7785_vm3 = vmmov %vm7784_vm1 }
0x1be1   : > { %v3893_v39 = vmul.f32 0.5, %v3892_v0 }
0x1be3   : > { %v3894_v54 = vsub.f32 1.5, %v3893_v39 }
0x1be5   : > { %v3895_v26 = vmul.f32 %v4845_v53, %v3894_v54 }
0x1be7   : > { %v3899_v20 = vsel %vm3898_vm6, %v4845_v53, %v3895_v26  ;;  %vm7786_vm6 = vcmp.lt.s32.totalorder %v7719_v8, 15 }
0x1be8   : > { %v3900_v28 = vmul.f32 %v3899_v20, %v3881_v21  ;;  %v3901_v61 = vmul.f32 %v3899_v20, %v3882_v58 }
0x1bea   : > { %vm3902_vm8 = vcmp.ge.f32.partialorder %v3900_v28, 0.0  ;;  %vm3903_vm2 = vcmp.ge.f32.partialorder %v3901_v61, 0.0  ;;  %v3904_v57 = vmul.f32 0.2, %v3900_v28  ;;  %v3905_v12 = vmul.f32 0.2, %v3901_v61 }
0x1bec   : > { %v3906_v56 = vsel %vm3902_vm8, %v3900_v28, %v3904_v57  ;;  %v3907_v30 = vsel %vm3903_vm2, %v3901_v61, %v3905_v12  ;;  %vm7787_vm8 = vmmov %vm7786_vm6  ;;  %vm7788_vm2 = vcmp.lt.s32.totalorder %v7719_v8, 17 }
0x1bed   : > { %3958 = vrot.lane.b32.xlu2 %v3907_v30, %s7713_s9  ;;  %3940 = vrot.lane.b32.xlu1 %v3906_v56, %s5270_s27 }
0x1bee   : > { %3964 = vrot.lane.b32.xlu0 %v3906_v56, %s7726_s22 }
0x1bf5   : > { %3932 = vrot.lane.b32.xlu2 %v3906_v56, %s5271_s24  ;;  %3934 = vrot.lane.b32.xlu1 %v3907_v30, %s5271_s24 }
0x1bf6   : > { %3966 = vrot.lane.b32.xlu0 %v3907_v30, %s7726_s22 }
0x1bfd   : > { %3910 = vrot.lane.b32.xlu2 %v3907_v30, %s7715_s5  ;;  %3916 = vrot.lane.b32.xlu1 %v3906_v56, %s7712_s21 }
0x1bfe   : > { %3948 = vrot.lane.b32.xlu0 %v3906_v56, %s7716_s2 }
0x1c06   : > { %3950 = vrot.lane.b32.xlu0 %v3907_v30, %s7716_s2 }
0x1c0e   : > { %3956 = vrot.lane.b32.xlu0 %v3906_v56, %s7713_s9 }
0x1c16   : > { %3942 = vrot.lane.b32.xlu0 %v3907_v30, %s5270_s27 }
0x1c1e   : > { %3924 = vrot.lane.b32.xlu0 %v3906_v56, %s7718_s28 }
0x1c26   : > { %3926 = vrot.lane.b32.xlu0 %v3907_v30, %s7718_s28 }
0x1c2e   : > { %3908 = vrot.lane.b32.xlu0 %v3906_v56, %s7715_s5 }
0x1c36   : > { %3918 = vrot.lane.b32.xlu0 %v3907_v30, %s7712_s21 }
0x1c47   : > { %v3959_v60 = vpop.permute.xlu2 %3958 }
0x1c4f   : > { %v3933_v13 = vpop.permute.xlu2 %3932 }
0x1c57   : > { %v3911_v20 = vpop.permute.xlu2 %3910 }
0x1c5f   : > { %v3941_v24 = vpop.permute.xlu1 %3940 }
0x1c60   : > { %v3965_v36 = vpop.permute.xlu0 %3964 }
0x1c67   : > { %v3935_v32 = vpop.permute.xlu1 %3934 }
0x1c68   : > { %v3967_v10 = vpop.permute.xlu0 %3966  ;;  %v3936_v45 = vsel %vm7784_vm1, %v3933_v13, %v3935_v32  ;;  %v3937_v50 = vsel %vm7785_vm3, %v3935_v32, %v3933_v13  ;;  %vm7795_vm1 = vcmask 1043456  }
0x1c69   : > { %v3968_v25 = vsel %vm7774_vm9, %v3965_v36, %v3967_v10  ;;  %v3969_v19 = vsel %vm7775_vm4, %v3967_v10, %v3965_v36  ;;  %v3939_v53 = vmul.f32 %v3936_v45, %v7750_v51  ;;  %vm7789_vm9 = vmmov %vm7788_vm2  ;;  %vm7790_vm4 = vcmp.lt.s32.totalorder %v7719_v8, 16 }
0x1c6a   : > { %v3970_v22 = vmul.f32 %v7325_v34, %v3968_v25  ;;  %v3971_v47 = vmul.f32 %v7328_v27, %v3969_v19  ;;  %v3982_v25 = vld [vmem:[#allocation19] sm:$0xf]  ;;  %vm7796_vm3 = vmmov %vm7795_vm1 }
0x1c6c   : > { %v3980_v23 = vpack.c.bf16 %v3970_v22, %v3970_v22  ;;  %v3981_v4 = vpack.c.bf16 %v3971_v47, %v3971_v47 }
0x1c6e   : > { %v3987_v40 = vsel %vm7776_vm5, %v3980_v23, 0  ;;  %v3990_v14 = vsel %vm7777_vm13, %v3981_v4, 0  ;;  %vm7791_vm5 = vmmov %vm7790_vm4  ;;  %vm7792_vm13 = vcmask 588800  }
0x1c6f   : > { %3995 = vmatpush.bf16.msrb.mxu3 %v3987_v40  ;;  %4008 = vmatpush.bf16.msrb.mxu2 %v3990_v14  ;;  %v3917_v57 = vpop.permute.xlu1 %3916 }
0x1c70   : > { %v3949_v59 = vpop.permute.xlu0 %3948 }
0x1c78   : > { %v3951_v49 = vpop.permute.xlu0 %3950 }
0x1c79   : > { %v3952_v17 = vsel %vm7778_vm11, %v3949_v59, %v3951_v49  ;;  %v3953_v16 = vsel %vm7779_vm10, %v3951_v49, %v3949_v59  ;;  %vm7793_vm11 = vmmov %vm7792_vm13 }
0x1c7a   : > { %v3954_v62 = vmul.f32 %v3952_v17, %v7737_v29  ;;  %v3955_v7 = vmul.f32 %v3953_v16, %v7738_v38  ;;  %v4052_v17 = vld [vmem:[%s7794_s6] sm:$0x7] }
0x1c80   : > { %v3957_v34 = vpop.permute.xlu0 %3956 }
0x1c81   : > { %v3960_v27 = vsel %vm7780_vm12, %v3957_v34, %v3959_v60  ;;  %v3961_v35 = vsel %vm7781_vm7, %v3959_v60, %v3957_v34  ;;  %v5305_v60 = vmov 0  }
0x1c82   : > { %v3962_v11 = vmul.f32 %v3960_v27, %v7733_v31  ;;  %v3963_v1 = vmul.f32 %v3961_v35, %v7734_v15  ;;  %4797 = vset.pattern.permute.xlu0 %v5305_v60 }
0x1c83   : > { %4055 = vperm.xlu0 %4797, %v4052_v17  }
0x1c84   : > { %v3978_v42 = vpack.c.bf16 %v3962_v11, %v3954_v62  ;;  %v3979_v33 = vpack.c.bf16 %v3963_v1, %v3955_v7 }
0x1c86   : > { %3996 = vmatpush.bf16.msrb.mxu3 %v3978_v42  ;;  %4009 = vmatpush.bf16.msrb.mxu2 %v3979_v33 }
0x1c88   : > { %v3943_v41 = vpop.permute.xlu0 %3942 }
0x1c89   : > { %v3944_v44 = vsel %vm7782_vm14, %v3941_v24, %v3943_v41  ;;  %v3945_v21 = vsel %vm7783_vm15, %v3943_v41, %v3941_v24 }
0x1c8a   : > { %v3946_v29 = vmul.f32 %v3944_v44, %v7739_v2  ;;  %v3947_v38 = vmul.f32 %v3945_v21, %v7743_v55  ;;  %v3938_v55 = vmul.f32 %v3937_v50, %v7749_v43 }
0x1c8c   : > { %v3976_v58 = vpack.c.bf16 %v3946_v29, %v3906_v56  ;;  %v3977_v31 = vpack.c.bf16 %v3947_v38, %v3907_v30 }
0x1c8e   : > { %3997 = vmatpush.bf16.msrb.mxu3 %v3976_v58  ;;  %4010 = vmatpush.bf16.msrb.mxu2 %v3977_v31  ;;  %v4049_v31 = vld [vmem:[%s7797_s3] sm:$0x3] }
0x1c90   : > { %v3925_v15 = vpop.permute.xlu0 %3924 }
0x1c98   : > { %v3927_v63 = vpop.permute.xlu0 %3926 }
0x1c99   : > { %v3928_v18 = vsel %vm7786_vm6, %v3925_v15, %v3927_v63  ;;  %v3929_v2 = vsel %vm7787_vm8, %v3927_v63, %v3925_v15  ;;  %vm7799_vm6 = vmmov %vm7795_vm1 }
0x1c9a   : > { %v3930_v46 = vmul.f32 %v3929_v2, %v7753_v37  ;;  %v3931_v0 = vmul.f32 %v3928_v18, %v7754_v9 }
0x1c9c   : > { %v3974_v39 = vpack.c.bf16 %v3938_v55, %v3930_v46  ;;  %v3975_v54 = vpack.c.bf16 %v3939_v53, %v3931_v0 }
0x1c9e   : > { %3998 = vmatpush.bf16.msrb.mxu3 %v3974_v39  ;;  %4011 = vmatpush.bf16.msrb.mxu2 %v3975_v54 }
0x1ca0   : > { %v3909_v26 = vpop.permute.xlu0 %3908 }
0x1ca1   : > { %v3912_v28 = vsel %vm7788_vm2, %v3909_v26, %v3911_v20  ;;  %v3913_v61 = vsel %vm7789_vm9, %v3911_v20, %v3909_v26 }
0x1ca2   : > { %v3914_v9 = vmul.f32 %v3913_v61, %v7765_v5  ;;  %v3915_v12 = vmul.f32 %v3912_v28, %v7766_v52 }
0x1ca8   : > { %v3919_v43 = vpop.permute.xlu0 %3918 }
0x1ca9   : > { %v3920_v51 = vsel %vm7790_vm4, %v3917_v57, %v3919_v43  ;;  %v3921_v37 = vsel %vm7791_vm5, %v3919_v43, %v3917_v57 }
0x1caa   : > { %v3922_v56 = vmul.f32 %v3921_v37, %v7761_v48  ;;  %v3923_v30 = vmul.f32 %v3920_v51, %v7762_v3 }
0x1cac   : > { %v3972_v36 = vpack.c.bf16 %v3922_v56, %v3914_v9  ;;  %v3973_v10 = vpack.c.bf16 %v3923_v30, %v3915_v12 }
0x1cae   : > { %3999 = vmatpush.bf16.msrb.mxu3 %v3972_v36  ;;  %4012 = vmatpush.bf16.msrb.mxu2 %v3973_v10 }
0x1cb1   : > { %4545 = vmatmul.msk.bf16.vlgmr.msrb.gmra.mxu3 %vm7792_vm13, %v3982_v25  ;;  %4546 = vmatmul.msk.bf16.vlgmr.msrb.gmra.mxu2 %vm7793_vm11, %v3982_v25 }
0x1cf5   : > { %v4056_v15 = vpop.permute.xlu0 %4055 }
0x1d34   : > { %v4001_v19 = vpop.f32.mrf.mxu3  ;;  %v4014_v8 = vpop.f32.mrf.mxu2 }
0x1d35   : > { %v4018_v22 = vadd.f32 %v4014_v8, %v4001_v19 }
0x1d37   : > { %4019 = vadd.xlane.f32.xlu2 %v4018_v22 }
0x1d3c   : > { %v4003_v5 = vpop.f32.mrf.mxu3  ;;  %v4016_v47 = vpop.f32.mrf.mxu2 }
0x1daa   : > { %v4020_v52 = vpop.xlane.xlu2 %4019 }
0x1dab   : > { %v4021_v48 = vmul.f32 %v4020_v52, %v7773_v6 }
0x1dad   : > { %v4022_v23 = vsub.f32 %v4001_v19, %v4021_v48  ;;  %v4023_v3 = vsub.f32 %v4014_v8, %v4021_v48 }
0x1daf   : > { %v4024_v4 = vmul.f32 %v4022_v23, %v4022_v23  ;;  %v4025_v40 = vmul.f32 %v4023_v3, %v4023_v3 }
0x1db1   : > { %v4026_v14 = vadd.f32 %v4025_v40, %v4024_v4 }
0x1db3   : > { %4027 = vadd.xlane.f32.xlu1 %v4026_v14 }
0x1e26   : > { %v4028_v59 = vpop.xlane.xlu1 %4027 }
0x1e27   : > { %v4029_v49 = vmul.f32 %v4028_v59, %v7773_v6 }
0x1e29   : > { %v4030_v16 = vadd.f32 1e-05, %v4029_v49 }
0x1e2b   : > { %4846 = vrsqrt.f32 %v4030_v16  ;;  %vm4037_vm12 = vweird.f32 %v4030_v16 }
0x1e31   : > { %v4847_v34 = vpop.eup %4846 }
0x1e32   : > { %v4032_v27 = vmul.f32 %v4847_v34, %v4030_v16  ;;  %vm4038_vm10 = vweird.f32 %v4847_v34 }
0x1e33   : > { %vm4039_vm7 = vmor %vm4037_vm12, %vm4038_vm10 }
0x1e34   : > { %v4033_v35 = vmul.f32 %v4847_v34, %v4032_v27 }
0x1e36   : > { %v4034_v62 = vmul.f32 0.5, %v4033_v35 }
0x1e38   : > { %v4035_v7 = vsub.f32 1.5, %v4034_v62 }
0x1e3a   : > { %v4036_v11 = vmul.f32 %v4847_v34, %v4035_v7 }
0x1e3c   : > { %v4040_v1 = vsel %vm4039_vm7, %v4847_v34, %v4036_v11 }
0x1e3d   : > { %v4041_v6 = vmul.f32 %v4040_v1, %v4022_v23  ;;  %v4042_v42 = vmul.f32 %v4040_v1, %v4023_v3 }
0x1e3f   : > { %vm4043_vm14 = vcmp.ge.f32.partialorder %v4041_v6, 0.0  ;;  %v4045_v33 = vmul.f32 0.2, %v4041_v6  ;;  %vm4044_vm15 = vcmp.ge.f32.partialorder %v4042_v42, 0.0  ;;  %v4046_v24 = vmul.f32 0.2, %v4042_v42 }
0x1e41   : > { %v4047_v41 = vsel %vm4043_vm14, %v4041_v6, %v4045_v33  ;;  %v4048_v44 = vsel %vm4044_vm15, %v4042_v42, %v4046_v24 }
0x1e42   : > { %v4050_v21 = vpack.c.bf16 %v4047_v41, %v4047_v41  ;;  %v4051_v29 = vpack.c.bf16 %v4048_v44, %v4048_v44 }
0x1e44   : > { %v4062_v38 = vsel %vm7795_vm1, %v4050_v21, 0  ;;  %v4065_v58 = vsel %vm7796_vm3, %v4051_v29, 0 }
0x1e45   : > { %4074 = vmatpush.bf16.msrb.mxu0 %v4062_v38  ;;  %4087 = vmatpush.bf16.msra.mxu1 %v4065_v58 }
0x1e48   : > { %4547 = vmatmul.msk.bf16.vlgmr.msrb.gmra.mxu0 %vm1453_vm0, %v4049_v31  ;;  %4548 = vmatmul.msk.bf16.vlgmr.msra.gmra.mxu1 %vm1453_vm0, %v4049_v31 }
0x1ec5   : > { %v4076_v32 = vpop.f32.mrf.mxu0  ;;  %v4089_v13 = vpop.f32.mrf.mxu1 }
0x1ec6   : > { %v4090_v45 = vadd.f32 %v4089_v13, %v4056_v15  ;;  %v4077_v50 = vadd.f32 %v4076_v32, %v4056_v15 }
0x1ec8   : > { %v4095_v63 = vrot.slane %v4090_v45, 4 }
0x1eca   : > { %v4096_v18 = vsel %vm7799_vm6, %v4077_v50, %v4095_v63 }
0x1ecb   : > { %4098 = vst [vmem:[%s874_s4] sm:$0x77] %v4096_v18 }
0x1ecd   : > { %v4078_v2 = vpop.f32.mrf.mxu0  ;;  %v4091_v55 = vpop.f32.mrf.mxu1 }
0x1ece PF: > { %s7800_s25 = sld [smem:[#allocation28_spill]] }
0x1ed4   : > { %s39_s3 = sadd.s32 1, %s7800_s25  }
0x1ed5   : > { %p36_p7 = scmp.ge.s32.totalorder %s39_s3, 4  }
0x1ed7   :  { %38 = sbr.rel (!%p36_p7) target bundleno = 20 (0x14), region = 187 }
0x1edc   :  { %4120 = vsyncpa [#allocation3], 1 }
0x1edd   :  { %4122 = vsyncpa [#allocation3 + $0x1], 1 }
0x1ede   :  { %4123 = vsyncpa [#allocation5], 1 }
0x1edf   :  { %4124 = vsyncpa [#allocation8], 1 }
0x1ee0   :  { %4125 = vsyncpa [#allocation11], 1 }
0x1ee1   :  { %4126 = vsyncpa [#allocation14], 1 }
0x1ee2   :  { %4127 = vsyncpa [#allocation17], 1 }
0x1ee3   :  { %4128 = vsyncpa [#allocation20], 1 }

</bundles_post_ra>
